<compile_context>
chip_gen: v6e
topology: v6e:2x2x1
jax: 0.10.0
libtpu: 0.0.40
codegen_flags: <defaults>
</compile_context>

<pallas_src>
import math

import jax
import jax.numpy as jnp
from jax.experimental import pallas as pl
from jax.experimental.pallas import tpu as pltpu

INPUT_LEN = 68
HIDDEN = (2048, 1024, 256)
OUTPUT_LEN = 8

_OUT_SIZES = HIDDEN + (OUTPUT_LEN,)            # (2048, 1024, 256, 8)
_OUT_OFFSETS = []
_off = 0
for _n in _OUT_SIZES:
    _OUT_OFFSETS.append(_off)
    _off += _n
_OUT_OFFSETS = tuple(_OUT_OFFSETS)             # (0, 2048, 3072, 3328)
_TOTAL_OUT = _off                              # 3336


def qfunction_kernel(x_ref, w1_ref, w2_ref, w3_ref, w4_ref, sb_ref, o_ref):
    """Whole forward pass in one invocation; everything resident in VMEM.

    w*_ref: int8 weights stored (in, out).  sb_ref: (2, 3336) f32 where
    row 0 = per-output-channel dequant scales, row 1 = biases (0.01).
    """
    def dense(h_f32, w_ref, off, n):
        # Dequantize int8 -> bf16 (two-step i8->f32->bf16 keeps to conversions
        # Mosaic lowers on all generations; int8 values are exact in bf16).
        w = w_ref[...].astype(jnp.float32).astype(jnp.bfloat16)
        acc = jnp.dot(h_f32.astype(jnp.bfloat16), w,
                      preferred_element_type=jnp.float32)
        scale = sb_ref[0:1, off:off + n]       # (1, n) static slice
        bias = sb_ref[1:2, off:off + n]
        return acc * scale + bias              # fold dequant scale into f32 acc

    # Layer 1: Linear(68 -> 2048) + ReLU
    h = jnp.maximum(dense(x_ref[...], w1_ref, _OUT_OFFSETS[0], _OUT_SIZES[0]), 0.0)
    # Layer 2: Linear(2048 -> 1024) + ReLU
    h = jnp.maximum(dense(h, w2_ref, _OUT_OFFSETS[1], _OUT_SIZES[1]), 0.0)
    # Layer 3: Linear(1024 -> 256) + ReLU
    h = jnp.maximum(dense(h, w3_ref, _OUT_OFFSETS[2], _OUT_SIZES[2]), 0.0)
    # Layer 4: Linear(256 -> 8)
    logits = dense(h, w4_ref, _OUT_OFFSETS[3], _OUT_SIZES[3])

    # Softmax over dim=0 (the batch axis), matching nn.Softmax(dim=0).
    m = jnp.max(logits, axis=0, keepdims=True)
    e = jnp.exp(logits - m)
    s = jnp.sum(e, axis=0, keepdims=True)
    o_ref[...] = (e / s).astype(o_ref.dtype)   # exact divide (not approx recip)


def qfunction_forward(x, params):
    """x: (B, 68) float32.
    params: [w1_q, w2_q, w3_q, w4_q, scale_bias] with w*_q int8 stored (in, out)
    and scale_bias (2, 3336) f32 (row 0 scales, row 1 biases)."""
    B = x.shape[0]
    vmem_spec = pl.BlockSpec(memory_space=pltpu.MemorySpace.VMEM)
    n_args = 1 + len(params)

    sizes = (INPUT_LEN,) + HIDDEN + (OUTPUT_LEN,)
    n_weights = sum(fi * fo for fi, fo in zip(sizes[:-1], sizes[1:]))
    flops = 2 * B * n_weights
    bytes_accessed = (1 * n_weights             # int8 weights
                      + 2 * 4 * _TOTAL_OUT      # f32 scales + biases
                      + 4 * B * INPUT_LEN       # x
                      + 4 * B * OUTPUT_LEN)     # out
    cost = pl.CostEstimate(flops=flops,
                           transcendentals=B * OUTPUT_LEN,
                           bytes_accessed=bytes_accessed)

    return pl.pallas_call(
        qfunction_kernel,
        out_shape=jax.ShapeDtypeStruct((B, OUTPUT_LEN), jnp.float32),
        in_specs=[vmem_spec] * n_args,
        out_specs=vmem_spec,
        compiler_params=pltpu.CompilerParams(vmem_limit_bytes=32 << 20),
        cost_estimate=cost,
    )(x, *params)


def init_params(key):
    """Xavier-uniform (gain = calculate_gain('relu') = sqrt(2)) weights, biases
    filled with 0.01, matching weights_initialize().  Weights are stored as
    (in, out) int8 with per-output-channel symmetric scales; scales and biases
    are packed into one (2, 3336) f32 array."""
    sizes = (INPUT_LEN,) + HIDDEN + (OUTPUT_LEN,)
    gain = math.sqrt(2.0)
    weights_q, scales, biases = [], [], []
    for fan_in, fan_out in zip(sizes[:-1], sizes[1:]):
        key, sub = jax.random.split(key)
        bound = gain * math.sqrt(6.0 / (fan_in + fan_out))
        # stored as (in, out): transpose of the PyTorch (out, in) layout
        w = jax.random.uniform(sub, (fan_in, fan_out), jnp.float32,
                               minval=-bound, maxval=bound)
        amax = jnp.max(jnp.abs(w), axis=0, keepdims=True)       # (1, out)
        scale = jnp.maximum(amax, 1e-12) / 127.0
        q = jnp.clip(jnp.round(w / scale), -127.0, 127.0).astype(jnp.int8)
        weights_q.append(q)
        scales.append(scale)
        biases.append(jnp.full((1, fan_out), 0.01, dtype=jnp.float32))
    scale_bias = jnp.concatenate(
        [jnp.concatenate(scales, axis=1), jnp.concatenate(biases, axis=1)],
        axis=0)                                                  # (2, 3336)
    return weights_q + [scale_bias]


def _reference(x, params):
    """Pure-JAX reference following the same int8-dequant / bf16-dot /
    f32-accumulate path as the kernel."""
    w1, w2, w3, w4, sb = params
    qs = (w1, w2, w3, w4)

    def dense(h, q, off, n):
        w = q.astype(jnp.float32).astype(jnp.bfloat16)
        acc = jnp.dot(h.astype(jnp.bfloat16), w,
                      preferred_element_type=jnp.float32)
        return acc * sb[0:1, off:off + n] + sb[1:2, off:off + n]

    h = x
    for i in range(3):
        h = jnp.maximum(dense(h, qs[i], _OUT_OFFSETS[i], _OUT_SIZES[i]), 0.0)
    logits = dense(h, qs[3], _OUT_OFFSETS[3], _OUT_SIZES[3])
    return jax.nn.softmax(logits, axis=0)      # dim=0, as in the PyTorch module


if __name__ == "__main__":
    key = jax.random.PRNGKey(0)
    pkey, xkey = jax.random.split(key)
    params = init_params(pkey)

    B = 8  # small batch
    x = jax.random.normal(xkey, (B, INPUT_LEN), dtype=jnp.float32)

    out = qfunction_forward(x, params)
    out = jax.block_until_ready(out)

    ref = _reference(x, params)
    assert out.shape == (B, OUTPUT_LEN)
    # Kernel and reference share the identical quantized numeric path.
    assert jnp.allclose(out, ref, atol=2e-3, rtol=2e-3)
    # Each output column is a softmax over the batch axis -> columns sum to 1
    # (exact divide, so this holds to f32 rounding).
    assert jnp.allclose(jnp.sum(out, axis=0), jnp.ones(OUTPUT_LEN), atol=1e-3)

    print("KERNEL_OK")
</pallas_src>

<mosaic_0001>
module attributes {stable_mosaic.version = 11 : i64} {
  func.func @qfunction_kernel(%arg0: memref<8x68xf32, #tpu.memory_space<vmem>>, %arg1: memref<68x2048xi8, #tpu.memory_space<vmem>>, %arg2: memref<2048x1024xi8, #tpu.memory_space<vmem>>, %arg3: memref<1024x256xi8, #tpu.memory_space<vmem>>, %arg4: memref<256x8xi8, #tpu.memory_space<vmem>>, %arg5: memref<2x3336xf32, #tpu.memory_space<vmem>>, %arg6: memref<8x8xf32, #tpu.memory_space<vmem>>) attributes {dimension_semantics = [], scalar_prefetch = 0 : i64, scratch_operands = 0 : i64, tpu.core_type = #tpu.core_type<tc>} {
    %c0 = arith.constant 0 : index
    %c0_0 = arith.constant 0 : index
    %0 = vector.load %arg0[%c0, %c0_0] : memref<8x68xf32, #tpu.memory_space<vmem>>, vector<8x68xf32>
    %c0_1 = arith.constant 0 : index
    %c0_2 = arith.constant 0 : index
    %1 = vector.load %arg1[%c0_1, %c0_2] : memref<68x2048xi8, #tpu.memory_space<vmem>>, vector<68x2048xi8>
    %2 = arith.sitofp %1 : vector<68x2048xi8> to vector<68x2048xf32>
    %3 = arith.truncf %2 : vector<68x2048xf32> to vector<68x2048xbf16>
    %4 = arith.truncf %0 : vector<8x68xf32> to vector<8x68xbf16>
    %cst = arith.constant dense<0.000000e+00> : vector<8x2048xf32>
    %5 = tpu.matmul %4, %3, %cst {dimension_numbers = #tpu.dot_dimension_numbers<[1], [0], [0], [1], [0, 0, 1, 1], [], []>} : vector<8x68xbf16>, vector<68x2048xbf16>, vector<8x2048xf32> -> vector<8x2048xf32>
    %c0_3 = arith.constant 0 : index
    %c0_4 = arith.constant 0 : index
    %6 = vector.load %arg5[%c0_3, %c0_4] : memref<2x3336xf32, #tpu.memory_space<vmem>>, vector<1x2048xf32>
    %c1 = arith.constant 1 : index
    %c0_5 = arith.constant 0 : index
    %7 = vector.load %arg5[%c1, %c0_5] : memref<2x3336xf32, #tpu.memory_space<vmem>>, vector<1x2048xf32>
    %8 = vector.broadcast %6 : vector<1x2048xf32> to vector<8x2048xf32>
    %9 = arith.mulf %5, %8 : vector<8x2048xf32>
    %10 = vector.broadcast %7 : vector<1x2048xf32> to vector<8x2048xf32>
    %11 = arith.addf %9, %10 : vector<8x2048xf32>
    %cst_6 = arith.constant 0.000000e+00 : f32
    %12 = vector.broadcast %cst_6 : f32 to vector<8x2048xf32>
    %13 = arith.maximumf %11, %12 : vector<8x2048xf32>
    %c0_7 = arith.constant 0 : index
    %c0_8 = arith.constant 0 : index
    %14 = vector.load %arg2[%c0_7, %c0_8] : memref<2048x1024xi8, #tpu.memory_space<vmem>>, vector<2048x1024xi8>
    %15 = arith.sitofp %14 : vector<2048x1024xi8> to vector<2048x1024xf32>
    %16 = arith.truncf %15 : vector<2048x1024xf32> to vector<2048x1024xbf16>
    %17 = arith.truncf %13 : vector<8x2048xf32> to vector<8x2048xbf16>
    %cst_9 = arith.constant dense<0.000000e+00> : vector<8x1024xf32>
    %18 = tpu.matmul %17, %16, %cst_9 {dimension_numbers = #tpu.dot_dimension_numbers<[1], [0], [0], [1], [0, 0, 1, 1], [], []>} : vector<8x2048xbf16>, vector<2048x1024xbf16>, vector<8x1024xf32> -> vector<8x1024xf32>
    %c0_10 = arith.constant 0 : index
    %c2048 = arith.constant 2048 : index
    %19 = vector.load %arg5[%c0_10, %c2048] : memref<2x3336xf32, #tpu.memory_space<vmem>>, vector<1x1024xf32>
    %c1_11 = arith.constant 1 : index
    %c2048_12 = arith.constant 2048 : index
    %20 = vector.load %arg5[%c1_11, %c2048_12] : memref<2x3336xf32, #tpu.memory_space<vmem>>, vector<1x1024xf32>
    %21 = vector.broadcast %19 : vector<1x1024xf32> to vector<8x1024xf32>
    %22 = arith.mulf %18, %21 : vector<8x1024xf32>
    %23 = vector.broadcast %20 : vector<1x1024xf32> to vector<8x1024xf32>
    %24 = arith.addf %22, %23 : vector<8x1024xf32>
    %cst_13 = arith.constant 0.000000e+00 : f32
    %25 = vector.broadcast %cst_13 : f32 to vector<8x1024xf32>
    %26 = arith.maximumf %24, %25 : vector<8x1024xf32>
    %c0_14 = arith.constant 0 : index
    %c0_15 = arith.constant 0 : index
    %27 = vector.load %arg3[%c0_14, %c0_15] : memref<1024x256xi8, #tpu.memory_space<vmem>>, vector<1024x256xi8>
    %28 = arith.sitofp %27 : vector<1024x256xi8> to vector<1024x256xf32>
    %29 = arith.truncf %28 : vector<1024x256xf32> to vector<1024x256xbf16>
    %30 = arith.truncf %26 : vector<8x1024xf32> to vector<8x1024xbf16>
    %cst_16 = arith.constant dense<0.000000e+00> : vector<8x256xf32>
    %31 = tpu.matmul %30, %29, %cst_16 {dimension_numbers = #tpu.dot_dimension_numbers<[1], [0], [0], [1], [0, 0, 1, 1], [], []>} : vector<8x1024xbf16>, vector<1024x256xbf16>, vector<8x256xf32> -> vector<8x256xf32>
    %c0_17 = arith.constant 0 : index
    %c3072 = arith.constant 3072 : index
    %32 = vector.load %arg5[%c0_17, %c3072] : memref<2x3336xf32, #tpu.memory_space<vmem>>, vector<1x256xf32>
    %c1_18 = arith.constant 1 : index
    %c3072_19 = arith.constant 3072 : index
    %33 = vector.load %arg5[%c1_18, %c3072_19] : memref<2x3336xf32, #tpu.memory_space<vmem>>, vector<1x256xf32>
    %34 = vector.broadcast %32 : vector<1x256xf32> to vector<8x256xf32>
    %35 = arith.mulf %31, %34 : vector<8x256xf32>
    %36 = vector.broadcast %33 : vector<1x256xf32> to vector<8x256xf32>
    %37 = arith.addf %35, %36 : vector<8x256xf32>
    %cst_20 = arith.constant 0.000000e+00 : f32
    %38 = vector.broadcast %cst_20 : f32 to vector<8x256xf32>
    %39 = arith.maximumf %37, %38 : vector<8x256xf32>
    %c0_21 = arith.constant 0 : index
    %c0_22 = arith.constant 0 : index
    %40 = vector.load %arg4[%c0_21, %c0_22] : memref<256x8xi8, #tpu.memory_space<vmem>>, vector<256x8xi8>
    %41 = arith.sitofp %40 : vector<256x8xi8> to vector<256x8xf32>
    %42 = arith.truncf %41 : vector<256x8xf32> to vector<256x8xbf16>
    %43 = arith.truncf %39 : vector<8x256xf32> to vector<8x256xbf16>
    %cst_23 = arith.constant dense<0.000000e+00> : vector<8x8xf32>
    %44 = tpu.matmul %43, %42, %cst_23 {dimension_numbers = #tpu.dot_dimension_numbers<[1], [0], [0], [1], [0, 0, 1, 1], [], []>} : vector<8x256xbf16>, vector<256x8xbf16>, vector<8x8xf32> -> vector<8x8xf32>
    %c0_24 = arith.constant 0 : index
    %c3328 = arith.constant 3328 : index
    %45 = vector.load %arg5[%c0_24, %c3328] : memref<2x3336xf32, #tpu.memory_space<vmem>>, vector<1x8xf32>
    %c1_25 = arith.constant 1 : index
    %c3328_26 = arith.constant 3328 : index
    %46 = vector.load %arg5[%c1_25, %c3328_26] : memref<2x3336xf32, #tpu.memory_space<vmem>>, vector<1x8xf32>
    %47 = vector.broadcast %45 : vector<1x8xf32> to vector<8x8xf32>
    %48 = arith.mulf %44, %47 : vector<8x8xf32>
    %49 = vector.broadcast %46 : vector<1x8xf32> to vector<8x8xf32>
    %50 = arith.addf %48, %49 : vector<8x8xf32>
    %cst_27 = arith.constant dense<0xFF800000> : vector<8xf32>
    %51 = vector.multi_reduction <maximumf>, %50, %cst_27 [0] : vector<8x8xf32> to vector<8xf32>
    %52 = vector.shape_cast %51 : vector<8xf32> to vector<1x8xf32>
    %53 = vector.broadcast %52 : vector<1x8xf32> to vector<8x8xf32>
    %54 = arith.subf %50, %53 : vector<8x8xf32>
    %55 = math.exp %54 : vector<8x8xf32>
    %cst_28 = arith.constant dense<0.000000e+00> : vector<8xf32>
    %56 = vector.multi_reduction <add>, %55, %cst_28 [0] : vector<8x8xf32> to vector<8xf32>
    %57 = vector.shape_cast %56 : vector<8xf32> to vector<1x8xf32>
    %58 = vector.broadcast %57 : vector<1x8xf32> to vector<8x8xf32>
    %59 = arith.divf %55, %58 : vector<8x8xf32>
    %c0_29 = arith.constant 0 : index
    %c0_30 = arith.constant 0 : index
    %60 = vector.load %arg6[%c0_29, %c0_30] : memref<8x8xf32, #tpu.memory_space<vmem>>, vector<8x8xf32>
    tpu.vector_store %arg6[%c0_29, %c0_30], %59 {strides = array<i32>} : memref<8x8xf32, #tpu.memory_space<vmem>>, vector<8x8xf32>,
    return
  }
}

</mosaic_0001>

<bundles_post_ra>
// kernel: tpu_custom_call.1
= control target key start
LH: loop header
LB: loop body
LE: loop exit
PB: predicated region body
PF: predicated region fallthrough
CT: control target
= control target key end

     0   :  { %11 = vsyncpa [#allocation3], 0  ;;  %s5789_s0 = inlined_call_operand.hbm [shape: f32[8,68], index: 0, kind: input, shape index: {}]   ;;  %s5790_s1 = inlined_call_operand.hbm [shape: s8[68,2048], index: 1, kind: input, shape index: {}]   ;;  %s5791_s2 = inlined_call_operand.hbm [shape: s8[2048,1024], index: 2, kind: input, shape index: {}]   ;;  %s5792_s3 = inlined_call_operand.hbm [shape: s8[1024,256], index: 3, kind: input, shape index: {}]   ;;  %s5793_s4 = inlined_call_operand.vmem [shape: s8[256,8], index: 4, kind: input, shape index: {}]   ;;  %s5794_s5 = inlined_call_operand.hbm [shape: f32[2,3336], index: 5, kind: input, shape index: {}]   ;;  %s5795_s6 = inlined_call_operand.hbm [shape: f32[8,8], index: 6, kind: output, shape index: {}]  }
   0x1   :  { %12 = vsyncpa [#allocation6], 0 }
   0x2   :  { %13 = vsyncpa [#allocation9], 0 }
   0x3   :  { %14 = vsyncpa [#allocation4], 0  ;;  %s5063_s21 = smov [#allocation5]  }
   0x4   :  { %s30_s22 = sshll.u32 %s5063_s21, 4  ;;  %s31_s22 = int_to_ptr.vmem [resolvable:$true] %s30_s22 }
   0x5   :  { %s4943_s23 = scalar_lea.vmem %s31_s22, 4608  ;;  %p4948_p1 = scmp.lt.s32.totalorder %s31_s22, %s31_s22 }
   0x6   :  { %p4944_p0 = scmp.ne.s32.totalorder %s31_s22, %s4943_s23  ;;  %p4949_p2 = scmp.lt.s32.totalorder %s4943_s23, %s4943_s23 }
   0x8   :  { %p4950_p3 = por %p4949_p2, %p4948_p1 }
   0xa   :  { %p4951_p4 = pnand %p4950_p3, %p4944_p0 }
   0xc   :  { %4954 = shalt.err (!%p4951_p4)
}
   0xd   :  { %s5064_s24 = smov 512   ;;  %s5065_s25 = smov 32  }
   0xe   :  { %36 = dma.hbm_to_vmem [thread:$0]  %s5790_s1, 4608, %s31_s22, [#allocation6], %s5064_s24, %s5064_s24, %s5065_s25  }
   0xf   :  { %s5066_s28 = smov [#allocation8]  }
  0x10   :  { %s54_s29 = sshll.u32 %s5066_s28, 4  ;;  %s55_s29 = int_to_ptr.vmem [resolvable:$true] %s54_s29 }
  0x11   :  { %s4963_s30 = scalar_lea.vmem %s55_s29, 8192  ;;  %p4968_p6 = scmp.lt.s32.totalorder %s55_s29, %s55_s29 }
  0x12   :  { %p4964_p5 = scmp.ne.s32.totalorder %s55_s29, %s4963_s30  ;;  %p4969_p7 = scmp.lt.s32.totalorder %s4963_s30, %s4963_s30 }
  0x14   :  { %p4970_p8 = por %p4969_p7, %p4968_p6 }
  0x16   :  { %p4971_p9 = pnand %p4970_p8, %p4964_p5 }
  0x18   :  { %4974 = shalt.err (!%p4971_p9)
}
  0x19   :  { %s5067_s7 = smov 256   ;;  %s5068_s8 = smov 16  }
  0x1a   :  { %60 = dma.hbm_to_vmem [thread:$0]  %s5792_s3, 8192, %s55_s29, [#allocation9], %s5067_s7, %s5067_s7, %s5068_s8  }
  0x1b   :  { %s5069_s11 = smov [#allocation2]   ;;  %s5070_s13 = smov [#allocation7]  }
  0x1c   :  { %s21_s12 = sshll.u32 %s5069_s11, 4  ;;  %s42_s1 = sshll.u32 %s5070_s13, 4  ;;  %s22_s12 = int_to_ptr.vmem [resolvable:$true] %s21_s12  ;;  %s43_s1 = int_to_ptr.vmem [resolvable:$true] %s42_s1 }
  0x1d   :  { %s4983_s14 = scalar_lea.vmem %s22_s12, 128  ;;  %p4988_p11 = scmp.lt.s32.totalorder %s22_s12, %s22_s12 }
  0x1e   :  { %p4984_p10 = scmp.ne.s32.totalorder %s22_s12, %s4983_s14  ;;  %p4989_p12 = scmp.lt.s32.totalorder %s4983_s14, %s4983_s14 }
  0x20   :  { %p4990_p13 = por %p4989_p12, %p4988_p11 }
  0x22   :  { %p4991_p0 = pnand %p4990_p13, %p4984_p10 }
  0x24   :  { %4994 = shalt.err (!%p4991_p0)
}
  0x25   :  { %24 = dma.hbm_to_vmem [thread:$0]  %s5789_s0, 128, %s22_s12, [#allocation3]  }
  0x26   :  { %s5003_s17 = scalar_lea.vmem %s43_s1, 65536  ;;  %p5008_p2 = scmp.lt.s32.totalorder %s43_s1, %s43_s1 }
  0x27   :  { %p5004_p1 = scmp.ne.s32.totalorder %s43_s1, %s5003_s17  ;;  %p5009_p3 = scmp.lt.s32.totalorder %s5003_s17, %s5003_s17 }
  0x29   :  { %p5010_p4 = por %p5009_p3, %p5008_p2 }
  0x2b   :  { %p5011_p5 = pnand %p5010_p4, %p5004_p1 }
  0x2d   :  { %5014 = shalt.err (!%p5011_p5)
}
  0x2e   :  { %s5071_s3 = smov 1024   ;;  %s5072_s18 = smov 64  }
  0x2f   :  { %48 = dma.hbm_to_vmem [thread:$0]  %s5791_s2, 65536, %s43_s1, [#allocation6], %s5071_s3, %s5071_s3, %s5072_s18  }
  0x30   :  { %s5073_s21 = smov [#allocation10]  }
  0x31   :  { %s69_s22 = sshll.u32 %s5073_s21, 4  ;;  %s70_s22 = int_to_ptr.vmem [resolvable:$true] %s69_s22 }
  0x32   :  { %s5023_s23 = scalar_lea.vmem %s70_s22, 864  ;;  %p5028_p7 = scmp.lt.s32.totalorder %s70_s22, %s70_s22 }
  0x33   :  { %p5024_p6 = scmp.ne.s32.totalorder %s70_s22, %s5023_s23  ;;  %p5029_p8 = scmp.lt.s32.totalorder %s5023_s23, %s5023_s23 }
  0x35   :  { %p5030_p9 = por %p5029_p8, %p5028_p7 }
  0x37   :  { %p5031_p10 = pnand %p5030_p9, %p5024_p6 }
  0x39   :  { %5034 = shalt.err (!%p5031_p10)
}
  0x3a   :  { %72 = dma.hbm_to_vmem [thread:$0]  %s5794_s5, 864, %s70_s22, [#allocation9]  }
  0x3b   :  { %5055 = dma.done.wait [#allocation3], 128  }
  0x3c   :  { %5056 = vsyncadd [#allocation3], 4294967168 }
  0x3d   :  { %5057 = dma.done.wait [#allocation6], 70144  }
  0x3e   :  { %5058 = vsyncadd [#allocation6], 4294897152 }
  0x3f   :  { %5059 = dma.done.wait [#allocation9], 9056  }
  0x40   :  { %5060 = vsyncadd [#allocation9], 4294958240  ;;  %v5074_v0 = vmov 0   ;;  %v122_v1 = vld [vmem:[#allocation5 + $0x100] sm:$0x55]  ;;  %vm563_vm0 = vcmask 1041408  }
  0x41   :  { %644 = vmatprep.mubr.bf16.mxu1 %v5074_v0  ;;  %726 = vmatprep.mubr.bf16.mxu0 %v5074_v0  ;;  %v5128_v2 = vld [vmem:[#allocation5 + $0xc0] sm:$0xff]  ;;  %v190_v4 = vunpack.c.l.s8.bf16 %v122_v1  ;;  %v5148_v21 = vld [vmem:[#allocation5 + $0x108] sm:$0x55]  ;;  %v191_v44 = vunpack.c.h.s8.bf16 %v122_v1  ;;  %v89_v53 = vld [vmem:[#allocation2] sm:$0xff]  ;;  %vm559_vm1 = vcmask 556032   ;;  %vm4743_vm2 = vcmask 64512  }
  0x42   :  { %v5130_v3 = vld [vmem:[#allocation5 + $0xe0] sm:$0xff]  ;;  %v174_v5 = vunpack.c.l.s8.bf16 %v5128_v2  ;;  %v5150_v22 = vld [vmem:[#allocation5 + $0xc8] sm:$0xff]  ;;  %v192_v28 = vunpack.c.l.s8.bf16 %v5148_v21  ;;  %v175_v54 = vunpack.c.h.s8.bf16 %v5128_v2  ;;  %v5185_v62 = vpack.c.bf16 %v89_v53, %v89_v53  ;;  %v5187_v63 = vld [vmem:[#allocation5 + $0x110] sm:$0x55] }
  0x43   :  { %v182_v6 = vunpack.c.l.s8.bf16 %v5130_v3  ;;  %v5134_v7 = vld [vmem:[#allocation5 + $0x80] sm:$0xff]  ;;  %v4846_v10 = vcombine.high %v190_v4, %v190_v4  ;;  %v4845_v11 = vcombine.low %v190_v4, %v190_v4  ;;  %v5156_v25 = vld [vmem:[#allocation5 + $0xe8] sm:$0xff]  ;;  %v176_v29 = vunpack.c.l.s8.bf16 %v5150_v22 }
  0x44   :  { %v5136_v8 = vld [vmem:[#allocation5 + $0xa0] sm:$0xff]  ;;  %v158_v9 = vunpack.c.l.s8.bf16 %v5134_v7  ;;  %v5158_v26 = vld [vmem:[#allocation5 + $0x88] sm:$0xff]  ;;  %v184_v34 = vunpack.c.l.s8.bf16 %v5156_v25  ;;  %v4850_v35 = vcombine.high %v192_v28, %v192_v28  ;;  %v4849_v36 = vcombine.low %v192_v28, %v192_v28  ;;  %v5207_v28 = vld [vmem:[#allocation5 + $0xb0] sm:$0xff] }
  0x45   :  { %v4830_v12 = vcombine.high %v174_v5, %v182_v6  ;;  %v166_v13 = vunpack.c.l.s8.bf16 %v5136_v8  ;;  %v5140_v14 = vld [vmem:[#allocation5 + $0x40] sm:$0xff]  ;;  %4861 = vmatprep.subr.msk.bf16.mxu1 %vm563_vm0, %v4846_v10  ;;  %v565_v16 = vsel %vm563_vm0, %v4845_v11, 0  ;;  %v4829_v17 = vcombine.low %v174_v5, %v182_v6  ;;  %v5162_v30 = vld [vmem:[#allocation5 + $0xa8] sm:$0xff]  ;;  %v5196_v10 = vld [vmem:[#allocation5 + $0xd0] sm:$0xff] }
  0x46   :  { %v5142_v15 = vld [vmem:[#allocation5 + $0x60] sm:$0xff]  ;;  %619 = vmatpush1.bf16.msra.mxu1 %v565_v16  ;;  %v142_v19 = vunpack.c.l.s8.bf16 %v5140_v14  ;;  %v160_v37 = vunpack.c.l.s8.bf16 %v5158_v26  ;;  %v4834_v38 = vcombine.high %v176_v29, %v184_v34  ;;  %v168_v39 = vunpack.c.l.s8.bf16 %v5162_v30  ;;  %v5169_v40 = vld [vmem:[#allocation5 + $0x48] sm:$0xff]  ;;  %4865 = vmatprep.subr.msk.bf16.mxu0 %vm563_vm0, %v4850_v35  ;;  %v5198_v11 = vld [vmem:[#allocation5 + $0xf0] sm:$0xff] }
  0x47   :  { %620 = vmatprep.subr.bf16.mxu1 %v4830_v12  ;;  %v4814_v18 = vcombine.high %v158_v9, %v166_v13  ;;  %v150_v20 = vunpack.c.l.s8.bf16 %v5142_v15  ;;  %v5152_v23 = vld [vmem:[#allocation5] sm:$0xff]  ;;  %v4813_v27 = vcombine.low %v158_v9, %v166_v13  ;;  %v5171_v41 = vld [vmem:[#allocation5 + $0x68] sm:$0xff]  ;;  %v577_v43 = vsel %vm563_vm0, %v4849_v36, 0  ;;  %v5215_v36 = vld [vmem:[#allocation5 + $0x50] sm:$0xff] }
  0x48   :  { %v5154_v24 = vld [vmem:[#allocation5 + $0x20] sm:$0xff]  ;;  %v126_v32 = vunpack.c.l.s8.bf16 %v5152_v23  ;;  %701 = vmatpush1.bf16.msra.mxu0 %v577_v43  ;;  %v4833_v46 = vcombine.low %v176_v29, %v184_v34  ;;  %v4818_v47 = vcombine.high %v160_v37, %v168_v39  ;;  %v144_v48 = vunpack.c.l.s8.bf16 %v5169_v40  ;;  %v5177_v50 = vld [vmem:[#allocation5 + $0x8] sm:$0xff] }
  0x49   :  { %v4798_v31 = vcombine.high %v142_v19, %v150_v20  ;;  %v134_v33 = vunpack.c.l.s8.bf16 %v5154_v24  ;;  %v4797_v42 = vcombine.low %v142_v19, %v150_v20  ;;  %702 = vmatprep.subr.bf16.mxu0 %v4834_v38  ;;  %v152_v49 = vunpack.c.l.s8.bf16 %v5171_v41  ;;  %v5179_v51 = vld [vmem:[#allocation5 + $0x28] sm:$0xff] }
  0x4a   :  { %621 = vmatpush1.bf16.msra.mxu1 %v4829_v17  ;;  %v4848_v55 = vcombine.high %v191_v44, %v191_v44  ;;  %v4847_v56 = vcombine.low %v191_v44, %v191_v44  ;;  %v183_v57 = vunpack.c.h.s8.bf16 %v5130_v3  ;;  %v4817_v58 = vcombine.low %v160_v37, %v168_v39  ;;  %v5217_v37 = vld [vmem:[#allocation5 + $0x70] sm:$0xff] }
  0x4b   :  { %622 = vmatprep.subr.bf16.mxu1 %v4814_v18  ;;  %v4782_v45 = vcombine.high %v126_v32, %v134_v33  ;;  %v4781_v52 = vcombine.low %v126_v32, %v134_v33  ;;  %v4802_v59 = vcombine.high %v144_v48, %v152_v49  ;;  %v128_v60 = vunpack.c.l.s8.bf16 %v5177_v50 }
  0x4c   :  { %703 = vmatpush1.bf16.msra.mxu0 %v4833_v46  ;;  %v136_v61 = vunpack.c.l.s8.bf16 %v5179_v51  ;;  %v159_v1 = vunpack.c.h.s8.bf16 %v5134_v7  ;;  %v571_v2 = vsel %vm563_vm0, %v4847_v56, 0  ;;  %v4832_v3 = vcombine.high %v175_v54, %v183_v57  ;;  %v5227_v46 = vld [vmem:[#allocation5 + $0x30] sm:$0xff] }
  0x4d   :  { %704 = vmatprep.subr.bf16.mxu0 %v4818_v47  ;;  %v167_v4 = vunpack.c.h.s8.bf16 %v5136_v8  ;;  %v4801_v5 = vcombine.low %v144_v48, %v152_v49  ;;  %v194_v9 = vunpack.c.l.s8.bf16 %v5187_v63  ;;  %v4831_v7 = vcombine.low %v175_v54, %v183_v57  ;;  %v5233_v57 = vld [vmem:[#allocation5 + $0x118] sm:$0x55] }
  0x4e   :  { %623 = vmatpush1.bf16.msra.mxu1 %v4813_v27  ;;  %v4786_v6 = vcombine.high %v128_v60, %v136_v61  ;;  %v143_v8 = vunpack.c.h.s8.bf16 %v5140_v14  ;;  %v151_v13 = vunpack.c.h.s8.bf16 %v5142_v15  ;;  %v4785_v16 = vcombine.low %v128_v60, %v136_v61  ;;  %v5205_v27 = vld [vmem:[#allocation5 + $0x90] sm:$0xff] }
  0x4f   :  { %624 = vmatprep.subr.bf16.mxu1 %v4798_v31  ;;  %v4816_v12 = vcombine.high %v159_v1, %v167_v4  ;;  %v4854_v17 = vcombine.high %v194_v9, %v194_v9  ;;  %v4853_v18 = vcombine.low %v194_v9, %v194_v9  ;;  %v178_v19 = vunpack.c.l.s8.bf16 %v5196_v10 }
  0x50   :  { %705 = vmatpush1.bf16.msra.mxu0 %v4817_v58  ;;  %v186_v20 = vunpack.c.l.s8.bf16 %v5198_v11  ;;  %v4815_v29 = vcombine.low %v159_v1, %v167_v4  ;;  %v4800_v31 = vcombine.high %v143_v8, %v151_v13  ;;  %v127_v14 = vunpack.c.h.s8.bf16 %v5152_v23 }
  0x51   :  { %706 = vmatprep.subr.bf16.mxu0 %v4802_v59  ;;  %v135_v15 = vunpack.c.h.s8.bf16 %v5154_v24  ;;  %v589_v32 = vsel %vm563_vm0, %v4853_v18, 0  ;;  %v162_v34 = vunpack.c.l.s8.bf16 %v5205_v27  ;;  %v170_v35 = vunpack.c.l.s8.bf16 %v5207_v28 }
  0x52   :  { %625 = vmatpush1.bf16.msra.mxu1 %v4797_v42  ;;  %v4838_v33 = vcombine.high %v178_v19, %v186_v20  ;;  %v4799_v38 = vcombine.low %v143_v8, %v151_v13  ;;  %v193_v23 = vunpack.c.h.s8.bf16 %v5148_v21  ;;  %v4837_v39 = vcombine.low %v178_v19, %v186_v20  ;;  %v5251_v13 = vld [vmem:[#allocation5 + $0x98] sm:$0xff] }
  0x53   :  { %626 = vmatprep.subr.bf16.mxu1 %v4782_v45  ;;  %v4784_v24 = vcombine.high %v127_v14, %v135_v15  ;;  %v4822_v42 = vcombine.high %v162_v34, %v170_v35  ;;  %v146_v43 = vunpack.c.l.s8.bf16 %v5215_v36  ;;  %v154_v44 = vunpack.c.l.s8.bf16 %v5217_v37  ;;  %v5225_v45 = vld [vmem:[#allocation5 + $0x10] sm:$0xff] }
  0x54   :  { %707 = vmatpush1.bf16.msra.mxu0 %v4801_v5  ;;  %v4783_v21 = vcombine.low %v127_v14, %v135_v15  ;;  %v4851_v47 = vcombine.low %v193_v23, %v193_v23  ;;  %v4852_v48 = vcombine.high %v193_v23, %v193_v23  ;;  %v177_v49 = vunpack.c.h.s8.bf16 %v5150_v22  ;;  %v5261_v14 = vld [vmem:[#allocation5 + $0x58] sm:$0xff] }
  0x55   :  { %708 = vmatprep.subr.bf16.mxu0 %v4786_v6  ;;  %v4821_v53 = vcombine.low %v162_v34, %v170_v35  ;;  %v4806_v54 = vcombine.high %v146_v43, %v154_v44  ;;  %v138_v56 = vunpack.c.l.s8.bf16 %v5227_v46  ;;  %v161_v22 = vunpack.c.h.s8.bf16 %v5158_v26  ;;  %v5263_v15 = vld [vmem:[#allocation5 + $0x78] sm:$0xff] }
  0x56   :  { %627 = vmatpush1.bf16.msra.mxu1 %v4781_v52  ;;  %v185_v52 = vunpack.c.h.s8.bf16 %v5156_v25  ;;  %v583_v58 = vsel %vm563_vm0, %v4851_v47, 0  ;;  %v169_v25 = vunpack.c.h.s8.bf16 %v5162_v30  ;;  %v4805_v60 = vcombine.low %v146_v43, %v154_v44  ;;  %v5271_v23 = vld [vmem:[#allocation5 + $0x18] sm:$0xff] }
  0x57   :  { %4863 = vmatprep.subr.msk.bf16.mxu1 %vm563_vm0, %v4848_v55  ;;  %v130_v55 = vunpack.c.l.s8.bf16 %v5225_v45  ;;  %v196_v1 = vunpack.c.l.s8.bf16 %v5233_v57  ;;  %v145_v30 = vunpack.c.h.s8.bf16 %v5169_v40  ;;  %v153_v5 = vunpack.c.h.s8.bf16 %v5171_v41 }
  0x58   :  { %709 = vmatpush1.bf16.msra.mxu0 %v4785_v16  ;;  %v4836_v59 = vcombine.high %v177_v49, %v185_v52  ;;  %v4835_v4 = vcombine.low %v177_v49, %v185_v52  ;;  %v4820_v26 = vcombine.high %v161_v22, %v169_v25  ;;  %v5253_v16 = vld [vmem:[#allocation5 + $0xb8] sm:$0xff]  ;;  %v129_v40 = vunpack.c.h.s8.bf16 %v5177_v50 }
  0x59   :  { %4862 = vmatmul.mubr.msk.bf16.vlgmr.msra.gmra.mxu1 %vm559_vm1, %v5185_v62  ;;  %4869 = vmatprep.subr.msk.bf16.mxu0 %vm563_vm0, %v4854_v17  ;;  %v4790_v61 = vcombine.high %v130_v55, %v138_v56  ;;  %v4789_v6 = vcombine.low %v130_v55, %v138_v56  ;;  %v4858_v9 = vcombine.high %v196_v1, %v196_v1  ;;  %v137_v41 = vunpack.c.h.s8.bf16 %v5179_v51  ;;  %v1184_v56 = vld [vmem:[#allocation7 + $0xc8] sm:$0xff] }
  0x5a   :  { %660 = vmatpush1.bf16.msra.mxu1 %v571_v2  ;;  %685 = vmatprep.mubr.bf16.mxu1 %v5074_v0  ;;  %v5242_v2 = vld [vmem:[#allocation5 + $0xd8] sm:$0xff]  ;;  %v4819_v17 = vcombine.low %v161_v22, %v169_v25  ;;  %v4804_v18 = vcombine.high %v145_v30, %v153_v5  ;;  %v195_v50 = vunpack.c.h.s8.bf16 %v5187_v63  ;;  %v148_v35 = vunpack.c.l.s8.bf16 %v5261_v14 }
  0x5b   :  { %661 = vmatprep.subr.bf16.mxu1 %v4832_v3  ;;  %4866 = vmatmul.mubr.msk.bf16.vlgmr.msra.gmra.mxu0 %vm559_vm1, %v5185_v62  ;;  %v5244_v3 = vld [vmem:[#allocation5 + $0xf8] sm:$0xff]  ;;  %v4788_v51 = vcombine.high %v129_v40, %v137_v41  ;;  %v4787_v63 = vcombine.low %v129_v40, %v137_v41  ;;  %v179_v43 = vunpack.c.h.s8.bf16 %v5196_v10  ;;  %v187_v44 = vunpack.c.h.s8.bf16 %v5198_v11 }
  0x5c   :  { %783 = vmatpush1.bf16.msra.mxu0 %v589_v32  ;;  %808 = vmatprep.mubr.bf16.mxu0 %v5074_v0  ;;  %v188_v8 = vunpack.c.l.s8.bf16 %v5244_v3  ;;  %v4803_v32 = vcombine.low %v145_v30, %v153_v5  ;;  %v163_v52 = vunpack.c.h.s8.bf16 %v5205_v27  ;;  %v171_v10 = vunpack.c.h.s8.bf16 %v5207_v28 }
  0x5d   :  { %784 = vmatprep.subr.bf16.mxu0 %v4838_v33  ;;  %v155_v22 = vunpack.c.h.s8.bf16 %v5217_v37  ;;  %v1728_v25 = vunpack.c.h.s8.bf16 %v1184_v56  ;;  %v1720_v5 = vunpack.c.l.s8.bf16 %v1184_v56  ;;  %v189_v40 = vunpack.c.h.s8.bf16 %v5244_v3  ;;  %v1167_v3 = vld [vmem:[#allocation7 + $0x40] sm:$0xff] }
  0x5e   :  { %662 = vmatpush1.bf16.msra.mxu1 %v4831_v7  ;;  %v4857_v7 = vcombine.low %v196_v1, %v196_v1  ;;  %v4824_v27 = vcombine.high %v163_v52, %v171_v10 }
  0x5f   :  { %663 = vmatprep.subr.bf16.mxu1 %v4816_v12  ;;  %v180_v12 = vunpack.c.l.s8.bf16 %v5242_v2 }
  0x60   :  { %785 = vmatpush1.bf16.msra.mxu0 %v4837_v39  ;;  %v601_v19 = vsel %vm563_vm0, %v4857_v7, 0  ;;  %v4856_v39 = vcombine.high %v195_v50, %v195_v50 }
  0x61   :  { %786 = vmatprep.subr.bf16.mxu0 %v4822_v42  ;;  %v4842_v20 = vcombine.high %v180_v12, %v188_v8  ;;  %v4841_v33 = vcombine.low %v180_v12, %v188_v8  ;;  %v4855_v42 = vcombine.low %v195_v50, %v195_v50  ;;  %v1175_v12 = vld [vmem:[#allocation7 + $0x80] sm:$0xff] }
  0x62   :  { %664 = vmatpush1.bf16.msra.mxu1 %v4815_v29  ;;  %v164_v29 = vunpack.c.l.s8.bf16 %v5251_v13  ;;  %v1703_v50 = vunpack.c.l.s8.bf16 %v1175_v12 }
  0x63   :  { %665 = vmatprep.subr.bf16.mxu1 %v4800_v31  ;;  %v172_v31 = vunpack.c.l.s8.bf16 %v5253_v16 }
  0x64   :  { %787 = vmatpush1.bf16.msra.mxu0 %v4821_v53  ;;  %v595_v53 = vsel %vm563_vm0, %v4855_v42, 0  ;;  %v133_v42 = vunpack.c.h.s8.bf16 %v5271_v23 }
  0x65   :  { %788 = vmatprep.subr.bf16.mxu0 %v4806_v54  ;;  %v4826_v34 = vcombine.high %v164_v29, %v172_v31  ;;  %v4840_v54 = vcombine.high %v179_v43, %v187_v44 }
  0x66   :  { %666 = vmatpush1.bf16.msra.mxu1 %v4799_v38  ;;  %v156_v38 = vunpack.c.l.s8.bf16 %v5263_v15 }
  0x67   :  { %667 = vmatprep.subr.bf16.mxu1 %v4784_v24  ;;  %v5273_v24 = vld [vmem:[#allocation5 + $0x38] sm:$0xff] }
  0x68   :  { %789 = vmatpush1.bf16.msra.mxu0 %v4805_v60  ;;  %v4810_v47 = vcombine.high %v148_v35, %v156_v38  ;;  %v140_v49 = vunpack.c.l.s8.bf16 %v5273_v24  ;;  %v4809_v11 = vcombine.low %v148_v35, %v156_v38  ;;  %v1183_v60 = vld [vmem:[#allocation7 + $0xc0] sm:$0xff]  ;;  %v1160_v38 = vld [vmem:[#allocation7 + $0x8] sm:$0xff] }
  0x69   :  { %790 = vmatprep.subr.bf16.mxu0 %v4790_v61  ;;  %v4823_v61 = vcombine.low %v163_v52, %v171_v10  ;;  %v1727_v30 = vunpack.c.h.s8.bf16 %v1183_v60  ;;  %v1719_v7 = vunpack.c.l.s8.bf16 %v1183_v60  ;;  %v1216_v52 = vld [vmem:[#allocation7 + $0x1c8] sm:$0xff]  ;;  %v1239_v60 = vld [vmem:[#allocation7 + $0x280] sm:$0xff] }
  0x6a   :  { %668 = vmatpush1.bf16.msra.mxu1 %v4783_v21  ;;  %v4825_v21 = vcombine.low %v164_v29, %v172_v31  ;;  %v165_v31 = vunpack.c.h.s8.bf16 %v5251_v13  ;;  %v157_v13 = vunpack.c.h.s8.bf16 %v5263_v15  ;;  %v1792_v10 = vunpack.c.h.s8.bf16 %v1216_v52 }
  0x6b   :  { %4867 = vmatprep.subr.msk.bf16.mxu1 %vm563_vm0, %v4852_v48  ;;  %v132_v48 = vunpack.c.l.s8.bf16 %v5271_v23 }
  0x6c   :  { %791 = vmatpush1.bf16.msra.mxu0 %v4789_v6  ;;  %v197_v6 = vunpack.c.h.s8.bf16 %v5233_v57  ;;  %v1711_v57 = vunpack.c.h.s8.bf16 %v1175_v12 }
  0x6d   :  { %4864 = vmatmul.mubr.msk.bf16.vlgmr.msra.gmra.mxu1 %vm559_vm1, %v5185_v62  ;;  %4873 = vmatprep.subr.msk.bf16.mxu0 %vm563_vm0, %v4858_v9  ;;  %v4794_v55 = vcombine.high %v132_v48, %v140_v49  ;;  %v4793_v28 = vcombine.low %v132_v48, %v140_v49  ;;  %v1248_v48 = vld [vmem:[#allocation7 + $0x2c8] sm:$0xff]  ;;  %v1672_v49 = vunpack.c.l.s8.bf16 %v1160_v38 }
  0x6e   :  { %742 = vmatpush1.bf16.msra.mxu1 %v583_v58  ;;  %767 = vmatprep.mubr.bf16.mxu1 %v5074_v0  ;;  %v4839_v58 = vcombine.low %v179_v43, %v187_v44  ;;  %v4859_v8 = vcombine.low %v197_v6, %v197_v6  ;;  %v141_v43 = vunpack.c.h.s8.bf16 %v5273_v24  ;;  %v1680_v44 = vunpack.c.h.s8.bf16 %v1160_v38  ;;  %v1247_v24 = vld [vmem:[#allocation7 + $0x2c0] sm:$0xff] }
  0x6f   :  { %743 = vmatprep.subr.bf16.mxu1 %v4836_v59  ;;  %4870 = vmatmul.mubr.msk.bf16.vlgmr.msra.gmra.mxu0 %vm559_vm1, %v5185_v62  ;;  %v147_v59 = vunpack.c.h.s8.bf16 %v5215_v36  ;;  %v1176_v36 = vld [vmem:[#allocation7 + $0x88] sm:$0xff]  ;;  %v1856_v23 = vunpack.c.h.s8.bf16 %v1248_v48  ;;  %v1848_v56 = vunpack.c.l.s8.bf16 %v1248_v48  ;;  %v1279_v38 = vld [vmem:[#allocation7 + $0x3c0] sm:$0xff] }
  0x70   :  { %865 = vmatpush1.bf16.msra.mxu0 %v601_v19  ;;  %890 = vmatprep.mubr.bf16.mxu0 %v5074_v0  ;;  %v1704_v41 = vunpack.c.l.s8.bf16 %v1176_v36  ;;  %v1168_v19 = vld [vmem:[#allocation7 + $0x48] sm:$0xff] }
  0x71   :  { %866 = vmatprep.subr.bf16.mxu0 %v4842_v20  ;;  %v4808_v1 = vcombine.high %v147_v59, %v155_v22  ;;  %v4807_v37 = vcombine.low %v147_v59, %v155_v22  ;;  %v607_v20 = vsel %vm563_vm0, %v4859_v8, 0  ;;  %v1688_v35 = vunpack.c.l.s8.bf16 %v1168_v19  ;;  %v1208_v22 = vld [vmem:[#allocation7 + $0x188] sm:$0xff] }
  0x72   :  { %744 = vmatpush1.bf16.msra.mxu1 %v4835_v4  ;;  %v131_v4 = vunpack.c.h.s8.bf16 %v5225_v45  ;;  %v1712_v45 = vunpack.c.h.s8.bf16 %v1176_v36  ;;  %v1784_v59 = vunpack.c.l.s8.bf16 %v1216_v52  ;;  %v1232_v36 = vld [vmem:[#allocation7 + $0x248] sm:$0xff] }
  0x73   :  { %745 = vmatprep.subr.bf16.mxu1 %v4820_v26  ;;  %v139_v26 = vunpack.c.h.s8.bf16 %v5227_v46  ;;  %v1264_v48 = vld [vmem:[#allocation7 + $0x348] sm:$0xff] }
  0x74   :  { %867 = vmatpush1.bf16.msra.mxu0 %v4841_v33  ;;  %v1888_v52 = vunpack.c.h.s8.bf16 %v1264_v48 }
  0x75   :  { %868 = vmatprep.subr.bf16.mxu0 %v4826_v34  ;;  %v4792_v9 = vcombine.high %v131_v4, %v139_v26  ;;  %v4791_v46 = vcombine.low %v131_v4, %v139_v26  ;;  %v149_v34 = vunpack.c.h.s8.bf16 %v5261_v14  ;;  %v1159_v14 = vld [vmem:[#allocation7] sm:$0xff]  ;;  %v1839_v26 = vunpack.c.h.s8.bf16 %v1239_v60 }
  0x76   :  { %746 = vmatpush1.bf16.msra.mxu1 %v4819_v17  ;;  %v4860_v17 = vcombine.high %v197_v6, %v197_v6  ;;  %v1207_v4 = vld [vmem:[#allocation7 + $0x180] sm:$0xff]  ;;  %v1831_v6 = vunpack.c.l.s8.bf16 %v1239_v60 }
  0x77   :  { %747 = vmatprep.subr.bf16.mxu1 %v4804_v18  ;;  %v181_v18 = vunpack.c.h.s8.bf16 %v5242_v2  ;;  %v1696_v2 = vunpack.c.h.s8.bf16 %v1168_v19  ;;  %v4811_v15 = vcombine.low %v149_v34, %v157_v13 }
  0x78   :  { %869 = vmatpush1.bf16.msra.mxu0 %v4825_v21  ;;  %v4796_v21 = vcombine.high %v133_v42, %v141_v43 }
  0x79   :  { %870 = vmatprep.subr.bf16.mxu0 %v4810_v47  ;;  %v4844_v29 = vcombine.high %v181_v18, %v189_v40  ;;  %v1679_v47 = vunpack.c.h.s8.bf16 %v1159_v14 }
  0x7a   :  { %748 = vmatpush1.bf16.msra.mxu1 %v4803_v32  ;;  %v173_v32 = vunpack.c.h.s8.bf16 %v5253_v16  ;;  %v1695_v16 = vunpack.c.h.s8.bf16 %v1167_v3 }
  0x7b   :  { %749 = vmatprep.subr.bf16.mxu1 %v4788_v51  ;;  %v4843_v51 = vcombine.low %v181_v18, %v189_v40  ;;  %v1224_v40 = vld [vmem:[#allocation7 + $0x208] sm:$0xff] }
  0x7c   :  { %871 = vmatpush1.bf16.msra.mxu0 %v4809_v11  ;;  %v4828_v33 = vcombine.high %v165_v31, %v173_v32  ;;  %v1215_v11 = vld [vmem:[#allocation7 + $0x1c0] sm:$0xff] }
  0x7d   :  { %872 = vmatprep.subr.bf16.mxu0 %v4794_v55  ;;  %v1855_v55 = vunpack.c.h.s8.bf16 %v1247_v24 }
  0x7e   :  { %750 = vmatpush1.bf16.msra.mxu1 %v4787_v63  ;;  %v4827_v63 = vcombine.low %v165_v31, %v173_v32 }
  0x7f   :  { %4871 = vmatprep.subr.msk.bf16.mxu1 %vm563_vm0, %v4856_v39  ;;  %v4812_v39 = vcombine.high %v149_v34, %v157_v13  ;;  %v5308_v13 = vld [vmem:[#allocation7 + $0x4c8] sm:$0xff] }
  0x80   :  { %873 = vmatpush1.bf16.msra.mxu0 %v4793_v28  ;;  %v1847_v28 = vunpack.c.l.s8.bf16 %v1247_v24  ;;  %v1880_v24 = vunpack.c.l.s8.bf16 %v1264_v48 }
  0x81   :  { %4868 = vmatmul.mubr.msk.bf16.vlgmr.msra.gmra.mxu1 %vm559_vm1, %v5185_v62  ;;  %2711 = vmatprep.subr.bf16.mxu0 %v1728_v25 }
  0x82   :  { %824 = vmatpush1.bf16.msra.mxu1 %v595_v53  ;;  %849 = vmatprep.mubr.bf16.mxu1 %v5074_v0  ;;  %v4795_v53 = vcombine.low %v133_v42, %v141_v43  ;;  %v1919_v42 = vunpack.c.h.s8.bf16 %v1279_v38 }
  0x83   :  { %825 = vmatprep.subr.bf16.mxu1 %v4840_v54  ;;  %4874 = vmatmul.mubr.msk.bf16.vlgmr.msra.gmra.mxu0 %vm559_vm1, %v5185_v62  ;;  %v1671_v54 = vunpack.c.l.s8.bf16 %v1159_v14 }
  0x84   :  { %2712 = vmatpush1.bf16.msra.mxu0 %v1727_v30 }
  0x85   :  { %2713 = vmatprep.subr.bf16.mxu0 %v1720_v5  ;;  %v1775_v5 = vunpack.c.h.s8.bf16 %v1207_v4 }
  0x86   :  { %826 = vmatpush1.bf16.msra.mxu1 %v4839_v58  ;;  %v1791_v58 = vunpack.c.h.s8.bf16 %v1215_v11 }
  0x87   :  { %827 = vmatprep.subr.bf16.mxu1 %v4824_v27  ;;  %v1240_v27 = vld [vmem:[#allocation7 + $0x288] sm:$0xff] }
  0x88   :  { %2714 = vmatpush1.bf16.msra.mxu0 %v1719_v7  ;;  %v1840_v25 = vunpack.c.h.s8.bf16 %v1240_v27  ;;  %v1832_v30 = vunpack.c.l.s8.bf16 %v1240_v27  ;;  %v1231_v7 = vld [vmem:[#allocation7 + $0x240] sm:$0xff]  ;;  %v5311_v27 = vld [vmem:[#allocation7 + $0x6c8] sm:$0xff] }
  0x89   :  { %2715 = vmatprep.subr.bf16.mxu0 %v1712_v45  ;;  %v1767_v45 = vunpack.c.l.s8.bf16 %v1207_v4  ;;  %v1823_v8 = vunpack.c.h.s8.bf16 %v1231_v7  ;;  %v1815_v19 = vunpack.c.l.s8.bf16 %v1231_v7  ;;  %v5324_v4 = vld [vmem:[#allocation10 + $0x1] ss:$2 sm:$0xff] }
  0x8a   :  { %828 = vmatpush1.bf16.msra.mxu1 %v4823_v61  ;;  %v1783_v61 = vunpack.c.l.s8.bf16 %v1215_v11 }
  0x8b   :  { %829 = vmatprep.subr.bf16.mxu1 %v4808_v1  ;;  %v1776_v1 = vunpack.c.h.s8.bf16 %v1208_v22 }
  0x8c   :  { %2716 = vmatpush1.bf16.msra.mxu0 %v1711_v57 }
  0x8d   :  { %2717 = vmatprep.subr.bf16.mxu0 %v1704_v41  ;;  %v1192_v41 = vld [vmem:[#allocation7 + $0x108] sm:$0xff] }
  0x8e   :  { %830 = vmatpush1.bf16.msra.mxu1 %v4807_v37  ;;  %v1200_v37 = vld [vmem:[#allocation7 + $0x148] sm:$0xff]  ;;  %v1744_v32 = vunpack.c.h.s8.bf16 %v1192_v41  ;;  %v1736_v34 = vunpack.c.l.s8.bf16 %v1192_v41 }
  0x8f   :  { %831 = vmatprep.subr.bf16.mxu1 %v4792_v9  ;;  %v1824_v9 = vunpack.c.h.s8.bf16 %v1232_v36  ;;  %v1760_v12 = vunpack.c.h.s8.bf16 %v1200_v37  ;;  %v1752_v57 = vunpack.c.l.s8.bf16 %v1200_v37 }
  0x90   :  { %2718 = vmatpush1.bf16.msra.mxu0 %v1703_v50  ;;  %v1191_v50 = vld [vmem:[#allocation7 + $0x100] sm:$0xff] }
  0x91   :  { %2719 = vmatprep.subr.bf16.mxu0 %v1696_v2 }
  0x92   :  { %832 = vmatpush1.bf16.msra.mxu1 %v4791_v46  ;;  %v1199_v46 = vld [vmem:[#allocation7 + $0x140] sm:$0xff] }
  0x93   :  { %4875 = vmatprep.subr.msk.bf16.mxu1 %vm563_vm0, %v4860_v17  ;;  %v1816_v17 = vunpack.c.l.s8.bf16 %v1232_v36  ;;  %v1759_v18 = vunpack.c.h.s8.bf16 %v1199_v46  ;;  %v1751_v31 = vunpack.c.l.s8.bf16 %v1199_v46 }
  0x94   :  { %2720 = vmatpush1.bf16.msra.mxu0 %v1695_v16 }
  0x95   :  { %4872 = vmatmul.mubr.msk.bf16.vlgmr.msra.gmra.mxu1 %vm559_vm1, %v5185_v62  ;;  %2721 = vmatprep.subr.bf16.mxu0 %v1688_v35 }
  0x96   :  { %906 = vmatpush1.bf16.msra.mxu1 %v607_v20  ;;  %931 = vmatprep.mubr.bf16.mxu1 %v5074_v0  ;;  %v1687_v0 = vunpack.c.l.s8.bf16 %v1167_v3  ;;  %v1808_v20 = vunpack.c.h.s8.bf16 %v1224_v40  ;;  %v1800_v3 = vunpack.c.l.s8.bf16 %v1224_v40 }
  0x97   :  { %907 = vmatprep.subr.bf16.mxu1 %v4844_v29  ;;  %v1223_v29 = vld [vmem:[#allocation7 + $0x200] sm:$0xff] }
  0x98   :  { %2722 = vmatpush1.bf16.msra.mxu0 %v1687_v0  ;;  %v1807_v2 = vunpack.c.h.s8.bf16 %v1223_v29  ;;  %v1799_v16 = vunpack.c.l.s8.bf16 %v1223_v29  ;;  %v1272_v0 = vld [vmem:[#allocation7 + $0x388] sm:$0xff] }
  0x99   :  { %2723 = vmatprep.subr.bf16.mxu0 %v1680_v44  ;;  %v1911_v44 = vunpack.c.l.s8.bf16 %v1279_v38  ;;  %v1904_v14 = vunpack.c.h.s8.bf16 %v1272_v0 }
  0x9a   :  { %908 = vmatpush1.bf16.msra.mxu1 %v4843_v51  ;;  %v1743_v51 = vunpack.c.h.s8.bf16 %v1191_v50 }
  0x9b   :  { %909 = vmatprep.subr.bf16.mxu1 %v4828_v33  ;;  %v1280_v33 = vld [vmem:[#allocation7 + $0x3c8] sm:$0xff] }
  0x9c   :  { %2724 = vmatpush1.bf16.msra.mxu0 %v1679_v47  ;;  %v1920_v35 = vunpack.c.h.s8.bf16 %v1280_v33  ;;  %v1912_v43 = vunpack.c.l.s8.bf16 %v1280_v33  ;;  %v1896_v47 = vunpack.c.l.s8.bf16 %v1272_v0 }
  0x9d   :  { %2725 = vmatprep.subr.bf16.mxu0 %v1672_v49 }
  0x9e   :  { %910 = vmatpush1.bf16.msra.mxu1 %v4827_v63  ;;  %v1735_v63 = vunpack.c.l.s8.bf16 %v1191_v50  ;;  %v1304_v50 = vld [vmem:[#allocation7 + $0x488] sm:$0xff] }
  0x9f   :  { %911 = vmatprep.subr.bf16.mxu1 %v4812_v39  ;;  %v1984_v39 = vunpack.c.h.s8.bf16 %v5308_v13  ;;  %v1960_v0 = vunpack.c.l.s8.bf16 %v1304_v50 }
  0xa0   :  { %2726 = vmatpush1.bf16.msra.mxu0 %v1671_v54  ;;  %v1256_v54 = vld [vmem:[#allocation7 + $0x308] sm:$0xff] }
  0xa1   :  { %2727 = vmatprep.subr.bf16.mxu0 %v1792_v10  ;;  %v1872_v11 = vunpack.c.h.s8.bf16 %v1256_v54 }
  0xa2   :  { %912 = vmatpush1.bf16.msra.mxu1 %v4811_v15  ;;  %v1271_v15 = vld [vmem:[#allocation7 + $0x380] sm:$0xff] }
  0xa3   :  { %913 = vmatprep.subr.bf16.mxu1 %v4796_v21  ;;  %v1903_v21 = vunpack.c.h.s8.bf16 %v1271_v15  ;;  %v1895_v49 = vunpack.c.l.s8.bf16 %v1271_v15 }
  0xa4   :  { %2728 = vmatpush2.bf16.msra.mxu0 %v1791_v58  ;;  %v1864_v58 = vunpack.c.l.s8.bf16 %v1256_v54 }
  0xa5   :  { %2729 = vmatprep.subr.bf16.mxu0 %v1784_v59 }
  0xa6   :  { %914 = vmatpush1.bf16.msra.mxu1 %v4795_v53  ;;  %v1263_v53 = vld [vmem:[#allocation7 + $0x340] sm:$0xff] }
  0xa7   :  { %2752 = vmatprep.subr.bf16.mxu1 %v1856_v23  ;;  %v1887_v23 = vunpack.c.h.s8.bf16 %v1263_v53  ;;  %v1879_v10 = vunpack.c.l.s8.bf16 %v1263_v53 }
  0xa8   :  { %2730 = vmatpush2.bf16.msra.mxu0 %v1783_v61  ;;  %v5319_v61 = vld [vmem:[#allocation10] ss:$2 sm:$0xff] }
  0xa9   :  { %4876 = vmatmul.mubr.msk.bf16.vlgmr.msra.gmra.mxu1 %vm559_vm1, %v5185_v62  ;;  %2731 = vmatprep.subr.bf16.mxu0 %v1776_v1  ;;  %v1768_v62 = vunpack.c.l.s8.bf16 %v1208_v22  ;;  %v2112_v22 = vunpack.c.h.s8.bf16 %v5311_v27 }
  0xaa   :  { %2753 = vmatpush1.bf16.msra.mxu1 %v1855_v55  ;;  %v1255_v55 = vld [vmem:[#allocation7 + $0x300] sm:$0xff] }
  0xab   :  { %2754 = vmatprep.subr.bf16.mxu1 %v1848_v56  ;;  %v1871_v56 = vunpack.c.h.s8.bf16 %v1255_v55  ;;  %v1863_v59 = vunpack.c.l.s8.bf16 %v1255_v55 }
  0xac   :  { %2732 = vmatpush2.bf16.msra.mxu0 %v1775_v5 }
  0xad   :  { %2733 = vmatprep.subr.bf16.mxu0 %v1768_v62 }
  0xae   :  { %2755 = vmatpush1.bf16.msra.mxu1 %v1847_v28  ;;  %v949_v28 = vlaneseq }
  0xaf   :  { %2756 = vmatprep.subr.bf16.mxu1 %v1840_v25 }
  0xb0   :  { %2734 = vmatpush2.bf16.msra.mxu0 %v1767_v45  ;;  %v5314_v25 = vshrl.u32 %v949_v28, 7  ;;  %v1375_v28 = vld [vmem:[#allocation7 + $0x6c0] sm:$0xff] }
  0xb1   :  { %2735 = vmatprep.subr.bf16.mxu0 %v1760_v12 }
  0xb2   :  { %2757 = vmatpush1.bf16.msra.mxu1 %v1839_v26  ;;  %v5317_v60 = vsub.s32 0, %v5314_v25  ;;  %v5322_v1 = vsub.s32 1, %v5314_v25  ;;  %v5335_v12 = vsub.s32 5, %v5314_v25  ;;  %v5351_v33 = vsub.s32 2, %v5314_v25 }
  0xb3   :  { %2758 = vmatprep.subr.bf16.mxu1 %v1832_v30  ;;  %v5354_v38 = vsub.s32 3, %v5314_v25 }
  0xb4   :  { %2736 = vmatpush2.bf16.msra.mxu0 %v1759_v18  ;;  %v952_v26 = vrot.slane %v5319_v61, %v5317_v60  ;;  %v1050_v30 = vrot.slane %v5324_v4, %v5317_v60  ;;  %v956_v5 = vrot.slane %v5319_v61, %v5322_v1  ;;  %v1054_v37 = vrot.slane %v5324_v4, %v5322_v1  ;;  %v1311_v18 = vld [vmem:[#allocation7 + $0x4c0] sm:$0xff] }
  0xb5   :  { %2737 = vmatprep.subr.bf16.mxu0 %v1752_v57  ;;  %v972_v57 = vrot.slane %v5319_v61, %v5335_v12  ;;  %v964_v15 = vrot.slane %v5319_v61, %v5354_v38 }
  0xb6   :  { %2759 = vmatpush1.bf16.msra.mxu1 %v1831_v6 }
  0xb7   :  { %2760 = vmatprep.subr.bf16.mxu1 %v1824_v9 }
  0xb8   :  { %2738 = vmatpush2.bf16.msra.mxu0 %v1751_v31  ;;  %v1976_v31 = vunpack.c.l.s8.bf16 %v5308_v13 }
  0xb9   :  { %2739 = vmatprep.subr.bf16.mxu0 %v1744_v32  ;;  %v1070_v32 = vrot.slane %v5324_v4, %v5335_v12 }
  0xba   :  { %2761 = vmatpush1.bf16.msra.mxu1 %v1823_v8 }
  0xbb   :  { %2762 = vmatprep.subr.bf16.mxu1 %v1816_v17 }
  0xbc   :  { %2740 = vmatpush2.bf16.msra.mxu0 %v1743_v51  ;;  %v1975_v51 = vunpack.c.l.s8.bf16 %v1311_v18 }
  0xbd   :  { %2741 = vmatprep.subr.bf16.mxu0 %v1736_v34 }
  0xbe   :  { %2763 = vmatpush1.bf16.msra.mxu1 %v1815_v19  ;;  %v1983_v19 = vunpack.c.h.s8.bf16 %v1311_v18  ;;  %v2103_v18 = vunpack.c.l.s8.bf16 %v1375_v28 }
  0xbf   :  { %2764 = vmatprep.subr.bf16.mxu1 %v1808_v20 }
  0xc0   :  { %2742 = vmatpush2.bf16.msra.mxu0 %v1735_v63 }
  0xc1   :  { %2793 = vmatprep.subr.bf16.mxu0 %v1984_v39 }
  0xc2   :  { %2765 = vmatpush1.bf16.msra.mxu1 %v1807_v2 }
  0xc3   :  { %2766 = vmatprep.subr.bf16.mxu1 %v1800_v3 }
  0xc6   :  { %2767 = vmatpush1.bf16.msra.mxu1 %v1799_v16  ;;  %v1968_v16 = vunpack.c.h.s8.bf16 %v1304_v50 }
  0xc7   :  { %2768 = vmatprep.subr.bf16.mxu1 %v1920_v35  ;;  %v1303_v35 = vld [vmem:[#allocation7 + $0x480] sm:$0xff] }
  0xca   :  { %2769 = vmatpush2.bf16.msra.mxu1 %v1919_v42  ;;  %v960_v42 = vrot.slane %v5319_v61, %v5351_v33 }
  0xcb   :  { %2770 = vmatprep.subr.bf16.mxu1 %v1912_v43  ;;  %v1967_v43 = vunpack.c.h.s8.bf16 %v1303_v35 }
  0xce   :  { %2771 = vmatpush2.bf16.msra.mxu1 %v1911_v44 }
  0xcf   :  { %2772 = vmatprep.subr.bf16.mxu1 %v1904_v14  ;;  %v1058_v14 = vrot.slane %v5324_v4, %v5351_v33 }
  0xd2   :  { %2773 = vmatpush2.bf16.msra.mxu1 %v1903_v21  ;;  %v1296_v21 = vld [vmem:[#allocation7 + $0x448] sm:$0xff] }
  0xd3   :  { %2774 = vmatprep.subr.bf16.mxu1 %v1896_v47 }
  0xd6   :  { %2775 = vmatpush2.bf16.msra.mxu1 %v1895_v49  ;;  %v1062_v49 = vrot.slane %v5324_v4, %v5354_v38 }
  0xd7   :  { %2776 = vmatprep.subr.bf16.mxu1 %v1888_v52  ;;  %v1959_v52 = vunpack.c.l.s8.bf16 %v1303_v35  ;;  %v1360_v35 = vld [vmem:[#allocation7 + $0x648] sm:$0xff] }
  0xda   :  { %2777 = vmatpush2.bf16.msra.mxu1 %v1887_v23  ;;  %v1952_v23 = vunpack.c.h.s8.bf16 %v1296_v21 }
  0xdb   :  { %2778 = vmatprep.subr.bf16.mxu1 %v1880_v24  ;;  %v1295_v24 = vld [vmem:[#allocation7 + $0x440] sm:$0xff] }
  0xde   :  { %2779 = vmatpush2.bf16.msra.mxu1 %v1879_v10 }
  0xdf   :  { %2780 = vmatprep.subr.bf16.mxu1 %v1872_v11 }
  0xe2   :  { %2781 = vmatpush2.bf16.msra.mxu1 %v1871_v56  ;;  %v1951_v56 = vunpack.c.h.s8.bf16 %v1295_v24 }
  0xe3   :  { %2782 = vmatprep.subr.bf16.mxu1 %v1864_v58 }
  0xe6   :  { %2783 = vmatpush2.bf16.msra.mxu1 %v1863_v59 }
  0xe7   :  { %2834 = vmatprep.subr.bf16.mxu1 %v2112_v22  ;;  %v1944_v22 = vunpack.c.l.s8.bf16 %v1296_v21 }
 0x119   :  { %v646_v36 = vpop.f32.mrf.mxu1 }
 0x11a   :  { %v1029_v62 = vmul.f32 %v952_v26, %v646_v36  ;;  %v1943_v36 = vunpack.c.l.s8.bf16 %v1295_v24 }
 0x11b   :  { %v648_v6 = vpop.f32.mrf.mxu1  ;;  %v5341_v20 = vpop.f32.mrf.mxu0 }
 0x11c   :  { %v1127_v9 = vadd.f32 %v1050_v30, %v1029_v62  ;;  %v1030_v7 = vmul.f32 %v956_v5, %v648_v6  ;;  %v1288_v30 = vld [vmem:[#allocation7 + $0x408] sm:$0xff]  ;;  %v2111_v62 = vunpack.c.h.s8.bf16 %v1375_v28  ;;  %v5394_v28 = vld [vmem:[#allocation10 + $0x11] ss:$2 sm:$0xff] }
 0x11d   :  { %v650_v45 = vpop.f32.mrf.mxu1  ;;  %v730_v2 = vpop.f32.mrf.mxu0 }
 0x11e   :  { %v1128_v46 = vadd.f32 %v1054_v37, %v1030_v7  ;;  %v1143_v8 = vmax.f32 %v1127_v9, 0.0  ;;  %v1034_v3 = vmul.f32 %v972_v57, %v730_v2  ;;  %v1936_v9 = vunpack.c.h.s8.bf16 %v1288_v30  ;;  %v1287_v45 = vld [vmem:[#allocation7 + $0x400] sm:$0xff] }
 0x11f   :  { %v651_v17 = vpop.f32.mrf.mxu1  ;;  %v732_v34 = vpop.f32.mrf.mxu0  ;;  %v2104_v7 = vunpack.c.l.s8.bf16 %v5311_v27  ;;  %v1928_v57 = vunpack.c.l.s8.bf16 %v1288_v30  ;;  %v5379_v27 = vsub.s32 7, %v5314_v25  ;;  %v1927_v2 = vunpack.c.l.s8.bf16 %v1287_v45 }
 0x120   :  { %v1144_v40 = vmax.f32 %v1128_v46, 0.0  ;;  %v5343_v29 = vpack.c.bf16 %v1143_v8, %v1143_v8  ;;  %v1132_v13 = vadd.f32 %v1070_v32, %v1034_v3  ;;  %v1368_v46 = vld [vmem:[#allocation7 + $0x688] sm:$0xff]  ;;  %v1935_v17 = vunpack.c.h.s8.bf16 %v1287_v45 }
 0x121   :  { %v733_v63 = vpop.f32.mrf.mxu0  ;;  %v1344_v32 = vld [vmem:[#allocation7 + $0x5c8] sm:$0xff]  ;;  %v2088_v34 = vunpack.c.l.s8.bf16 %v1368_v46 }
 0x122   :  { %v5339_v41 = vpack.c.bf16 %v1144_v40, %v1144_v40  ;;  %v1148_v39 = vmax.f32 %v1132_v13, 0.0  ;;  %v980_v13 = vrot.slane %v5319_v61, %v5379_v27 }
 0x124   :  { %2743 = vmatprep.mubr.bf16.mxu0 %v5339_v41  ;;  %v5358_v44 = vpack.c.bf16 %v1148_v39, %v1148_v39 }
 0x125   :  { %2744 = vmatmul.mubr.bf16.vlgmr.msra.gmra.mxu0 %v5343_v29 }
 0x126   :  { %2794 = vmatpush1.bf16.msra.mxu0 %v1983_v19  ;;  %2825 = vmatprep.mubr.bf16.mxu0 %v5358_v44  ;;  %v2096_v19 = vunpack.c.h.s8.bf16 %v1368_v46 }
 0x127   :  { %2795 = vmatprep.subr.bf16.mxu0 %v1976_v31  ;;  %v1367_v31 = vld [vmem:[#allocation7 + $0x680] sm:$0xff] }
 0x128   :  { %v2095_v3 = vunpack.c.h.s8.bf16 %v1367_v31 }
 0x12a   :  { %2796 = vmatpush1.bf16.msra.mxu0 %v1975_v51  ;;  %v2048_v51 = vunpack.c.h.s8.bf16 %v1344_v32 }
 0x12b   :  { %2797 = vmatprep.subr.bf16.mxu0 %v1968_v16  ;;  %v1343_v16 = vld [vmem:[#allocation7 + $0x5c0] sm:$0xff] }
 0x12c   :  { %v2047_v39 = vunpack.c.h.s8.bf16 %v1343_v16 }
 0x12d   :  { %v687_v47 = vpop.f32.mrf.mxu1 }
 0x12e   :  { %v1031_v48 = vmul.f32 %v960_v42, %v687_v47  ;;  %2798 = vmatpush1.bf16.msra.mxu0 %v1967_v43  ;;  %v2087_v42 = vunpack.c.l.s8.bf16 %v1367_v31  ;;  %v1078_v43 = vrot.slane %v5324_v4, %v5379_v27  ;;  %v1336_v47 = vld [vmem:[#allocation7 + $0x588] sm:$0xff] }
 0x12f   :  { %v689_v53 = vpop.f32.mrf.mxu1  ;;  %2799 = vmatprep.subr.bf16.mxu0 %v1960_v0  ;;  %v5369_v37 = vpop.f32.mrf.mxu0  ;;  %v2040_v0 = vunpack.c.l.s8.bf16 %v1344_v32  ;;  %v2024_v45 = vunpack.c.l.s8.bf16 %v1336_v47 }
 0x130   :  { %v1129_v54 = vadd.f32 %v1058_v14, %v1031_v48  ;;  %v1032_v10 = vmul.f32 %v964_v15, %v689_v53  ;;  %v2080_v14 = vunpack.c.h.s8.bf16 %v1360_v35  ;;  %v1359_v15 = vld [vmem:[#allocation7 + $0x640] sm:$0xff]  ;;  %v2039_v53 = vunpack.c.l.s8.bf16 %v1343_v16 }
 0x131   :  { %v691_v11 = vpop.f32.mrf.mxu1  ;;  %v5375_v8 = vpop.f32.mrf.mxu0  ;;  %v1327_v16 = vld [vmem:[#allocation7 + $0x540] sm:$0xff] }
 0x132   :  { %v1130_v55 = vadd.f32 %v1062_v49, %v1032_v10  ;;  %2800 = vmatpush1.bf16.msra.mxu0 %v1959_v52  ;;  %v1145_v58 = vmax.f32 %v1129_v54, 0.0  ;;  %v5388_v49 = vsub.s32 4, %v5314_v25  ;;  %v5390_v54 = vld [vmem:[#allocation10 + $0x10] ss:$2 sm:$0xff]  ;;  %v2032_v10 = vunpack.c.h.s8.bf16 %v1336_v47  ;;  %v1407_v47 = vld [vmem:[#allocation7 + $0x7c0] sm:$0xff] }
 0x133   :  { %v692_v59 = vpop.f32.mrf.mxu1  ;;  %2801 = vmatprep.subr.bf16.mxu0 %v1952_v23  ;;  %v814_v40 = vpop.f32.mrf.mxu0  ;;  %v2079_v23 = vunpack.c.h.s8.bf16 %v1359_v15  ;;  %v2072_v11 = vunpack.c.l.s8.bf16 %v1360_v35  ;;  %v1004_v30 = vrot.slane %v5390_v54, %v5335_v12 }
 0x134   :  { %v1146_v26 = vmax.f32 %v1130_v55, 0.0  ;;  %v5371_v6 = vpack.c.bf16 %v1145_v58, %v1145_v58  ;;  %v1335_v55 = vld [vmem:[#allocation7 + $0x580] sm:$0xff]  ;;  %v1000_v58 = vrot.slane %v5390_v54, %v5388_v49  ;;  %v1352_v59 = vld [vmem:[#allocation7 + $0x608] sm:$0xff]  ;;  %v1102_v40 = vrot.slane %v5394_v28, %v5335_v12 }
 0x135   :  { %v815_v50 = vpop.f32.mrf.mxu0  ;;  %v2064_v46 = vunpack.c.h.s8.bf16 %v1352_v59 }
 0x136   :  { %v5367_v5 = vpack.c.bf16 %v1146_v26, %v1146_v26  ;;  %2802 = vmatpush1.bf16.msra.mxu0 %v1951_v56  ;;  %v1098_v26 = vrot.slane %v5394_v28, %v5388_v49  ;;  %v2023_v50 = vunpack.c.l.s8.bf16 %v1335_v55 }
 0x137   :  { %2803 = vmatprep.subr.bf16.mxu0 %v1944_v22 }
 0x138   :  { %2784 = vmatprep.mubr.bf16.mxu1 %v5367_v5 }
 0x139   :  { %2785 = vmatmul.mubr.bf16.vlgmr.msra.gmra.mxu1 %v5371_v6 }
 0x13a   :  { %2804 = vmatpush1.bf16.msra.mxu0 %v1943_v36  ;;  %2835 = vmatpush1.bf16.msra.mxu1 %v2111_v62  ;;  %v2031_v36 = vunpack.c.h.s8.bf16 %v1335_v55  ;;  %v2071_v62 = vunpack.c.l.s8.bf16 %v1359_v15  ;;  %v2175_v55 = vunpack.c.h.s8.bf16 %v1407_v47 }
 0x13b   :  { %2805 = vmatprep.subr.bf16.mxu0 %v1936_v9  ;;  %2836 = vmatprep.subr.bf16.mxu1 %v2104_v7 }
 0x13e   :  { %2806 = vmatpush1.bf16.msra.mxu0 %v1935_v17  ;;  %2837 = vmatpush1.bf16.msra.mxu1 %v2103_v18  ;;  %v1351_v17 = vld [vmem:[#allocation7 + $0x600] sm:$0xff] }
 0x13f   :  { %2807 = vmatprep.subr.bf16.mxu0 %v1928_v57  ;;  %2838 = vmatprep.subr.bf16.mxu1 %v2096_v19  ;;  %v1328_v57 = vld [vmem:[#allocation7 + $0x548] sm:$0xff] }
 0x140   :  { %v2008_v15 = vunpack.c.l.s8.bf16 %v1328_v57 }
 0x141   :  { %v5383_v63 = vpop.f32.mrf.mxu1 }
 0x142   :  { %2808 = vmatpush1.bf16.msra.mxu0 %v1927_v2  ;;  %2839 = vmatpush1.bf16.msra.mxu1 %v2095_v3  ;;  %v2063_v2 = vunpack.c.h.s8.bf16 %v1351_v17 }
 0x143   :  { %2809 = vmatprep.subr.bf16.mxu0 %v2048_v51  ;;  %2840 = vmatprep.subr.bf16.mxu1 %v2088_v34  ;;  %v771_v21 = vpop.f32.mrf.mxu1  ;;  %v892_v7 = vpop.f32.mrf.mxu0  ;;  %v2016_v51 = vunpack.c.h.s8.bf16 %v1328_v57  ;;  %v2056_v34 = vunpack.c.l.s8.bf16 %v1352_v59  ;;  %v1399_v57 = vld [vmem:[#allocation7 + $0x780] sm:$0xff] }
 0x144   :  { %v1036_v48 = vmul.f32 %v980_v13, %v771_v21  ;;  %v1041_v18 = vmul.f32 %v1000_v58, %v892_v7  ;;  %v1408_v13 = vld [vmem:[#allocation7 + $0x7c8] sm:$0xff] }
 0x145   :  { %v773_v52 = vpop.f32.mrf.mxu1  ;;  %v894_v19 = vpop.f32.mrf.mxu0  ;;  %v2176_v21 = vunpack.c.h.s8.bf16 %v1408_v13  ;;  %v2168_v59 = vunpack.c.l.s8.bf16 %v1408_v13  ;;  %v1392_v13 = vld [vmem:[#allocation7 + $0x748] sm:$0xff] }
 0x146   :  { %2810 = vmatpush2.bf16.msra.mxu0 %v2047_v39  ;;  %2841 = vmatpush1.bf16.msra.mxu1 %v2087_v42  ;;  %v1134_v24 = vadd.f32 %v1078_v43, %v1036_v48  ;;  %v5405_v31 = vadd.f32 %v1098_v26, %v1041_v18  ;;  %v1042_v32 = vmul.f32 %v1004_v30, %v894_v19  ;;  %v2015_v43 = vunpack.c.h.s8.bf16 %v1327_v16  ;;  %v1320_v48 = vld [vmem:[#allocation7 + $0x508] sm:$0xff] }
 0x147   :  { %2811 = vmatprep.subr.bf16.mxu0 %v2040_v0  ;;  %2842 = vmatprep.subr.bf16.mxu1 %v2080_v14  ;;  %v774_v56 = vpop.f32.mrf.mxu1  ;;  %v896_v3 = vpop.f32.mrf.mxu0  ;;  %v968_v42 = vrot.slane %v5319_v61, %v5388_v49  ;;  %v2055_v0 = vunpack.c.l.s8.bf16 %v1351_v17  ;;  %v992_v14 = vrot.slane %v5390_v54, %v5351_v33  ;;  %v988_v52 = vrot.slane %v5390_v54, %v5322_v1  ;;  %v1400_v30 = vld [vmem:[#allocation7 + $0x788] sm:$0xff] }
 0x148   :  { %v1150_v22 = vmax.f32 %v1134_v24, 0.0  ;;  %v5407_v35 = vadd.f32 %v1102_v40, %v1042_v32  ;;  %v1066_v24 = vrot.slane %v5324_v4, %v5388_v49  ;;  %v2000_v58 = vunpack.c.h.s8.bf16 %v1320_v48  ;;  %v1440_v32 = vld [vmem:[#allocation7 + $0x8c8] sm:$0xff] }
 0x149   :  { %v897_v39 = vpop.f32.mrf.mxu0  ;;  %v2167_v17 = vunpack.c.l.s8.bf16 %v1407_v47  ;;  %v1992_v18 = vunpack.c.l.s8.bf16 %v1320_v48  ;;  %v2160_v40 = vunpack.c.h.s8.bf16 %v1400_v30  ;;  %v2159_v3 = vunpack.c.h.s8.bf16 %v1399_v57  ;;  %v1391_v47 = vld [vmem:[#allocation7 + $0x740] sm:$0xff]  ;;  %v1432_v48 = vld [vmem:[#allocation7 + $0x888] sm:$0xff] }
 0x14a   :  { %2812 = vmatpush2.bf16.msra.mxu0 %v2039_v53  ;;  %2843 = vmatpush1.bf16.msra.mxu1 %v2079_v23  ;;  %v5400_v9 = vpack.c.bf16 %v1150_v22, %v1150_v22  ;;  %v1090_v53 = vrot.slane %v5394_v28, %v5351_v33  ;;  %v1033_v23 = vmul.f32 %v968_v42, %v5341_v20  ;;  %v1319_v22 = vld [vmem:[#allocation7 + $0x500] sm:$0xff] }
 0x14b   :  { %2813 = vmatprep.subr.bf16.mxu0 %v2032_v10  ;;  %2844 = vmatprep.subr.bf16.mxu1 %v2072_v11  ;;  %v2007_v11 = vunpack.c.l.s8.bf16 %v1327_v16  ;;  %v1086_v20 = vrot.slane %v5394_v28, %v5322_v1  ;;  %v1439_v16 = vld [vmem:[#allocation7 + $0x8c0] sm:$0xff] }
 0x14c   :  { %2866 = vmatprep.mubr.bf16.mxu1 %v5400_v9  ;;  %v1131_v7 = vadd.f32 %v1066_v24, %v1033_v23  ;;  %v2231_v23 = vunpack.c.l.s8.bf16 %v1439_v16 }
 0x14e   :  { %2814 = vmatpush2.bf16.msra.mxu0 %v2031_v36  ;;  %2845 = vmatpush1.bf16.msra.mxu1 %v2071_v62  ;;  %v1038_v36 = vmul.f32 %v988_v52, %v5375_v8  ;;  %v1147_v8 = vmax.f32 %v1131_v7, 0.0  ;;  %v1110_v7 = vrot.slane %v5394_v28, %v5379_v27 }
 0x14f   :  { %2815 = vmatprep.subr.bf16.mxu0 %v2024_v45  ;;  %2846 = vmatprep.subr.bf16.mxu1 %v2064_v46  ;;  %v1999_v46 = vunpack.c.h.s8.bf16 %v1319_v22 }
 0x150   :  { %v5427_v42 = vpack.c.bf16 %v1147_v8, %v1147_v8 }
 0x152   :  { %2816 = vmatpush2.bf16.msra.mxu0 %v2023_v50  ;;  %2847 = vmatpush1.bf16.msra.mxu1 %v2063_v2  ;;  %v1136_v50 = vadd.f32 %v1086_v20, %v1038_v36  ;;  %v1991_v2 = vunpack.c.l.s8.bf16 %v1319_v22  ;;  %v1012_v22 = vrot.slane %v5390_v54, %v5379_v27 }
 0x153   :  { %2817 = vmatprep.subr.bf16.mxu0 %v2016_v51  ;;  %2848 = vmatprep.subr.bf16.mxu1 %v2056_v34  ;;  %v2152_v51 = vunpack.c.l.s8.bf16 %v1400_v30  ;;  %v2240_v34 = vunpack.c.h.s8.bf16 %v1440_v32 }
 0x154   :  { %v1152_v39 = vmax.f32 %v1136_v50, 0.0  ;;  %v1094_v50 = vrot.slane %v5394_v28, %v5354_v38 }
 0x155   :  { %v851_v10 = vpop.f32.mrf.mxu1 }
 0x156   :  { %2818 = vmatpush2.bf16.msra.mxu0 %v2015_v43  ;;  %2849 = vmatpush1.bf16.msra.mxu1 %v2055_v0  ;;  %v1039_v56 = vmul.f32 %v992_v14, %v851_v10  ;;  %v2151_v43 = vunpack.c.l.s8.bf16 %v1399_v57  ;;  %v2239_v0 = vunpack.c.h.s8.bf16 %v1439_v16  ;;  %v5430_v14 = vsub.s32 6, %v5314_v25 }
 0x157   :  { %2819 = vmatprep.subr.bf16.mxu0 %v2008_v15  ;;  %2850 = vmatprep.subr.bf16.mxu1 %v2176_v21  ;;  %v5420_v26 = vpop.f32.mrf.mxu1  ;;  %v2144_v15 = vunpack.c.h.s8.bf16 %v1392_v13  ;;  %v2232_v21 = vunpack.c.l.s8.bf16 %v1440_v32  ;;  %v5432_v52 = vpack.c.bf16 %v1152_v39, %v1152_v39  ;;  %v2136_v25 = vunpack.c.l.s8.bf16 %v1392_v13  ;;  %v1423_v39 = vld [vmem:[#allocation7 + $0x840] sm:$0xff] }
 0x158   :  { %v5425_v62 = vadd.f32 %v1090_v53, %v1039_v56  ;;  %v2143_v53 = vunpack.c.h.s8.bf16 %v1391_v47  ;;  %v1008_v24 = vrot.slane %v5390_v54, %v5430_v14  ;;  %v976_v10 = vrot.slane %v5319_v61, %v5430_v14  ;;  %v1384_v56 = vld [vmem:[#allocation7 + $0x708] sm:$0xff] }
 0x159   :  { %v855_v45 = vpop.f32.mrf.mxu1  ;;  %v2135_v61 = vunpack.c.l.s8.bf16 %v1391_v47  ;;  %v2120_v16 = vunpack.c.l.s8.bf16 %v1384_v56 }
 0x15a   :  { %2820 = vmatpush2.bf16.msra.mxu0 %v2007_v11  ;;  %2851 = vmatpush2.bf16.msra.mxu1 %v2175_v55  ;;  %v2224_v11 = vunpack.c.h.s8.bf16 %v1432_v48  ;;  %v1431_v55 = vld [vmem:[#allocation7 + $0x880] sm:$0xff]  ;;  %v1035_v45 = vmul.f32 %v976_v10, %v5383_v63 }
 0x15b   :  { %2821 = vmatprep.subr.bf16.mxu0 %v2000_v58  ;;  %2852 = vmatprep.subr.bf16.mxu1 %v2168_v59  ;;  %v856_v19 = vpop.f32.mrf.mxu1  ;;  %v996_v58 = vrot.slane %v5390_v54, %v5354_v38  ;;  %v1106_v59 = vrot.slane %v5394_v28, %v5430_v14  ;;  %v2223_v36 = vunpack.c.h.s8.bf16 %v1431_v55 }
 0x15c   :  { %v1424_v19 = vld [vmem:[#allocation7 + $0x848] sm:$0xff] }
 0x15d   :  { %v1040_v32 = vmul.f32 %v996_v58, %v5420_v26  ;;  %v2208_v13 = vunpack.c.h.s8.bf16 %v1424_v19 }
 0x15e   :  { %2822 = vmatpush2.bf16.msra.mxu0 %v1999_v46  ;;  %2853 = vmatpush2.bf16.msra.mxu1 %v2167_v17  ;;  %v1074_v46 = vrot.slane %v5324_v4, %v5430_v14  ;;  %v2128_v17 = vunpack.c.h.s8.bf16 %v1384_v56  ;;  %v2215_v4 = vunpack.c.l.s8.bf16 %v1431_v55 }
 0x15f   :  { %2823 = vmatprep.subr.bf16.mxu0 %v1992_v18  ;;  %2854 = vmatprep.subr.bf16.mxu1 %v2160_v40  ;;  %v2216_v18 = vunpack.c.l.s8.bf16 %v1432_v48  ;;  %v1383_v40 = vld [vmem:[#allocation7 + $0x700] sm:$0xff]  ;;  %v2200_v48 = vunpack.c.l.s8.bf16 %v1424_v19 }
 0x160   :  { %v2127_v63 = vunpack.c.h.s8.bf16 %v1383_v40  ;;  %v1471_v19 = vld [vmem:[#allocation7 + $0x9c0] sm:$0xff] }
 0x162   :  { %2824 = vmatpush2.bf16.msra.mxu0 %v1991_v2  ;;  %2855 = vmatpush2.bf16.msra.mxu1 %v2159_v3 }
 0x163   :  { %2856 = vmatprep.subr.bf16.mxu1 %v2152_v51  ;;  %2875 = vmatprep.subr.bf16.mxu0 %v2240_v34  ;;  %v1133_v34 = vadd.f32 %v1074_v46, %v1035_v45  ;;  %v1495_v45 = vld [vmem:[#allocation7 + $0xa80] sm:$0xff]  ;;  %v1472_v46 = vld [vmem:[#allocation7 + $0x9c8] sm:$0xff] }
 0x165   :  { %2826 = vmatmul.mubr.bf16.vlgmr.msra.gmra.mxu0 %v5427_v42  ;;  %v1149_v47 = vmax.f32 %v1133_v34, 0.0  ;;  %v1464_v34 = vld [vmem:[#allocation7 + $0x988] sm:$0xff] }
 0x166   :  { %2857 = vmatpush2.bf16.msra.mxu1 %v2151_v43  ;;  %2876 = vmatpush1.bf16.msra.mxu0 %v2239_v0  ;;  %v1504_v43 = vld [vmem:[#allocation7 + $0xac8] sm:$0xff]  ;;  %v1138_v0 = vadd.f32 %v1094_v50, %v1040_v32  ;;  %v2303_v50 = vunpack.c.h.s8.bf16 %v1471_v19 }
 0x167   :  { %2858 = vmatprep.subr.bf16.mxu1 %v2144_v15  ;;  %2877 = vmatprep.subr.bf16.mxu0 %v2232_v21  ;;  %v2119_v15 = vunpack.c.l.s8.bf16 %v1383_v40  ;;  %v2207_v21 = vunpack.c.h.s8.bf16 %v1423_v39  ;;  %v5458_v55 = vpack.c.bf16 %v1149_v47, %v1149_v47  ;;  %v2360_v58 = vunpack.c.l.s8.bf16 %v1504_v43  ;;  %v1488_v32 = vld [vmem:[#allocation7 + $0xa48] sm:$0xff] }
 0x168   :  { %2907 = vmatprep.mubr.bf16.mxu0 %v5432_v52  ;;  %v1154_v10 = vmax.f32 %v1138_v0, 0.0  ;;  %v2304_v40 = vunpack.c.h.s8.bf16 %v1472_v46  ;;  %v1480_v0 = vld [vmem:[#allocation7 + $0xa08] sm:$0xff]  ;;  %v2280_v47 = vunpack.c.l.s8.bf16 %v1464_v34 }
 0x169   :  { %v933_v30 = vpop.f32.mrf.mxu1 }
 0x16a   :  { %2859 = vmatpush2.bf16.msra.mxu1 %v2143_v53  ;;  %2878 = vmatpush1.bf16.msra.mxu0 %v2231_v23  ;;  %v1043_v20 = vmul.f32 %v1008_v24, %v933_v30  ;;  %v2368_v53 = vunpack.c.h.s8.bf16 %v1504_v43  ;;  %v1503_v23 = vld [vmem:[#allocation7 + $0xac0] sm:$0xff]  ;;  %v1416_v24 = vld [vmem:[#allocation7 + $0x808] sm:$0xff]  ;;  %v5460_v30 = vpack.c.bf16 %v1154_v10, %v1154_v10 }
 0x16b   :  { %2860 = vmatprep.subr.bf16.mxu1 %v2136_v25  ;;  %2879 = vmatprep.subr.bf16.mxu0 %v2224_v11  ;;  %v935_v57 = vpop.f32.mrf.mxu1  ;;  %v2199_v25 = vunpack.c.l.s8.bf16 %v1423_v39  ;;  %v2367_v11 = vunpack.c.h.s8.bf16 %v1503_v23  ;;  %v2192_v56 = vunpack.c.h.s8.bf16 %v1416_v24  ;;  %v2288_v39 = vunpack.c.h.s8.bf16 %v1464_v34  ;;  %v1463_v43 = vld [vmem:[#allocation7 + $0x980] sm:$0xff] }
 0x16c   :  { %v5454_v8 = vadd.f32 %v1106_v59, %v1043_v20  ;;  %v1044_v2 = vmul.f32 %v1012_v22, %v935_v57  ;;  %v1415_v59 = vld [vmem:[#allocation7 + $0x800] sm:$0xff]  ;;  %v1496_v22 = vld [vmem:[#allocation7 + $0xa88] sm:$0xff]  ;;  %v2184_v20 = vunpack.c.l.s8.bf16 %v1416_v24  ;;  %v2279_v24 = vunpack.c.l.s8.bf16 %v1463_v43 }
 0x16d   :  { %v937_v3 = vpop.f32.mrf.mxu1  ;;  %v2344_v57 = vunpack.c.l.s8.bf16 %v1496_v22 }
 0x16e   :  { %2861 = vmatpush2.bf16.msra.mxu1 %v2135_v61  ;;  %2880 = vmatpush1.bf16.msra.mxu0 %v2223_v36  ;;  %v5456_v51 = vadd.f32 %v1110_v7, %v1044_v2  ;;  %v2191_v61 = vunpack.c.h.s8.bf16 %v1415_v59  ;;  %v2359_v36 = vunpack.c.l.s8.bf16 %v1503_v23  ;;  %v2352_v7 = vunpack.c.h.s8.bf16 %v1496_v22  ;;  %v1456_v23 = vld [vmem:[#allocation7 + $0x948] sm:$0xff] }
 0x16f   :  { %2862 = vmatprep.subr.bf16.mxu1 %v2128_v17  ;;  %2881 = vmatprep.subr.bf16.mxu0 %v2216_v18  ;;  %v938_v26 = vpop.f32.mrf.mxu1  ;;  %v2183_v17 = vunpack.c.l.s8.bf16 %v1415_v59  ;;  %v2351_v18 = vunpack.c.h.s8.bf16 %v1495_v45  ;;  %v2343_v2 = vunpack.c.l.s8.bf16 %v1495_v45  ;;  %v2296_v3 = vunpack.c.l.s8.bf16 %v1472_v46  ;;  %v1448_v45 = vld [vmem:[#allocation7 + $0x908] sm:$0xff] }
 0x170   :  { %v2328_v26 = vunpack.c.l.s8.bf16 %v1488_v32  ;;  %v984_v59 = vrot.slane %v5390_v54, %v5317_v60  ;;  %v2256_v54 = vunpack.c.h.s8.bf16 %v1448_v45 }
 0x172   :  { %2863 = vmatpush2.bf16.msra.mxu1 %v2127_v63  ;;  %2882 = vmatpush1.bf16.msra.mxu0 %v2215_v4  ;;  %v2336_v63 = vunpack.c.h.s8.bf16 %v1488_v32  ;;  %v1487_v4 = vld [vmem:[#allocation7 + $0xa40] sm:$0xff]  ;;  %v1037_v46 = vmul.f32 %v984_v59, %v5369_v37  ;;  %v1528_v32 = vld [vmem:[#allocation7 + $0xb88] sm:$0xff]  ;;  %v2248_v37 = vunpack.c.l.s8.bf16 %v1448_v45 }
 0x173   :  { %2864 = vmatprep.subr.bf16.mxu1 %v2120_v16  ;;  %2883 = vmatprep.subr.bf16.mxu0 %v2208_v13  ;;  %v2295_v16 = vunpack.c.l.s8.bf16 %v1471_v19  ;;  %v2335_v13 = vunpack.c.h.s8.bf16 %v1487_v4  ;;  %v1447_v19 = vld [vmem:[#allocation7 + $0x900] sm:$0xff] }
 0x174   :  { %v1559_v59 = vld [vmem:[#allocation7 + $0xc80] sm:$0xff] }
 0x175   :  { %v1511_v45 = vld [vmem:[#allocation7 + $0xb00] sm:$0xff] }
 0x176   :  { %2865 = vmatpush2.bf16.msra.mxu1 %v2119_v15  ;;  %2884 = vmatpush1.bf16.msra.mxu0 %v2207_v21  ;;  %v2287_v15 = vunpack.c.h.s8.bf16 %v1463_v43  ;;  %v2327_v21 = vunpack.c.l.s8.bf16 %v1487_v4  ;;  %v1568_v4 = vld [vmem:[#allocation7 + $0xcc8] sm:$0xff]  ;;  %v1567_v43 = vld [vmem:[#allocation7 + $0xcc0] sm:$0xff] }
 0x177   :  { %2885 = vmatprep.subr.bf16.mxu0 %v2200_v48  ;;  %2916 = vmatprep.subr.bf16.mxu1 %v2368_v53  ;;  %v2320_v48 = vunpack.c.h.s8.bf16 %v1480_v0  ;;  %v1479_v53 = vld [vmem:[#allocation7 + $0xa00] sm:$0xff] }
 0x178   :  { %v2319_v10 = vunpack.c.h.s8.bf16 %v1479_v53 }
 0x179   :  { %2867 = vmatmul.mubr.bf16.vlgmr.msra.gmra.mxu1 %v5458_v55 }
 0x17a   :  { %2886 = vmatpush1.bf16.msra.mxu0 %v2199_v25  ;;  %2917 = vmatpush1.bf16.msra.mxu1 %v2367_v11  ;;  %v2272_v25 = vunpack.c.h.s8.bf16 %v1456_v23  ;;  %v2312_v11 = vunpack.c.l.s8.bf16 %v1480_v0  ;;  %v1520_v0 = vld [vmem:[#allocation7 + $0xb48] sm:$0xff] }
 0x17b   :  { %2887 = vmatprep.subr.bf16.mxu0 %v2192_v56  ;;  %2918 = vmatprep.subr.bf16.mxu1 %v2360_v58  ;;  %v1455_v56 = vld [vmem:[#allocation7 + $0x940] sm:$0xff]  ;;  %v1536_v58 = vld [vmem:[#allocation7 + $0xbc8] sm:$0xff] }
 0x17c   :  { %2948 = vmatprep.mubr.bf16.mxu1 %v5460_v30  ;;  %v2271_v22 = vunpack.c.h.s8.bf16 %v1455_v56 }
 0x17e   :  { %2888 = vmatpush1.bf16.msra.mxu0 %v2191_v61  ;;  %2919 = vmatpush1.bf16.msra.mxu1 %v2359_v36  ;;  %v2311_v61 = vunpack.c.l.s8.bf16 %v1479_v53  ;;  %v2264_v36 = vunpack.c.l.s8.bf16 %v1456_v23  ;;  %v2400_v53 = vunpack.c.h.s8.bf16 %v1520_v0  ;;  %v2488_v23 = vunpack.c.l.s8.bf16 %v1568_v4 }
 0x17f   :  { %2889 = vmatprep.subr.bf16.mxu0 %v2184_v20  ;;  %2920 = vmatprep.subr.bf16.mxu1 %v2352_v7  ;;  %v2432_v20 = vunpack.c.h.s8.bf16 %v1536_v58  ;;  %v1535_v7 = vld [vmem:[#allocation7 + $0xbc0] sm:$0xff] }
 0x182   :  { %2890 = vmatpush1.bf16.msra.mxu0 %v2183_v17  ;;  %2921 = vmatpush1.bf16.msra.mxu1 %v2351_v18  ;;  %v1082_v17 = vrot.slane %v5394_v28, %v5317_v60  ;;  %v2263_v18 = vunpack.c.l.s8.bf16 %v1455_v56  ;;  %v1527_v28 = vld [vmem:[#allocation7 + $0xb80] sm:$0xff]  ;;  %v2392_v56 = vunpack.c.l.s8.bf16 %v1520_v0  ;;  %v1624_v0 = vld [vmem:[#allocation7 + $0xe88] sm:$0xff] }
 0x183   :  { %2891 = vmatprep.subr.bf16.mxu0 %v2304_v40  ;;  %2922 = vmatprep.subr.bf16.mxu1 %v2344_v57  ;;  %v2431_v40 = vunpack.c.h.s8.bf16 %v1535_v7  ;;  %v2424_v57 = vunpack.c.l.s8.bf16 %v1536_v58 }
 0x186   :  { %2892 = vmatpush2.bf16.msra.mxu0 %v2303_v50  ;;  %2923 = vmatpush1.bf16.msra.mxu1 %v2343_v2  ;;  %v1135_v50 = vadd.f32 %v1082_v17, %v1037_v46  ;;  %v2255_v2 = vunpack.c.h.s8.bf16 %v1447_v19  ;;  %v1552_v46 = vld [vmem:[#allocation7 + $0xc48] sm:$0xff]  ;;  %v2383_v17 = vunpack.c.h.s8.bf16 %v1511_v45 }
 0x187   :  { %2893 = vmatprep.subr.bf16.mxu0 %v2296_v3  ;;  %2924 = vmatprep.subr.bf16.mxu1 %v2336_v63  ;;  %v2423_v3 = vunpack.c.l.s8.bf16 %v1535_v7  ;;  %v2416_v63 = vunpack.c.h.s8.bf16 %v1528_v32 }
 0x188   :  { %v1151_v34 = vmax.f32 %v1135_v50, 0.0 }
 0x18a   :  { %2894 = vmatpush2.bf16.msra.mxu0 %v2295_v16  ;;  %2925 = vmatpush1.bf16.msra.mxu1 %v2335_v13  ;;  %v2247_v16 = vunpack.c.l.s8.bf16 %v1447_v19  ;;  %v2415_v13 = vunpack.c.h.s8.bf16 %v1527_v28  ;;  %v1632_v19 = vld [vmem:[#allocation7 + $0xec8] sm:$0xff] }
 0x18b   :  { %2895 = vmatprep.subr.bf16.mxu0 %v2288_v39  ;;  %2926 = vmatprep.subr.bf16.mxu1 %v2328_v26  ;;  %v2408_v39 = vunpack.c.l.s8.bf16 %v1528_v32  ;;  %v2496_v26 = vunpack.c.h.s8.bf16 %v1568_v4  ;;  %v2375_v32 = vunpack.c.l.s8.bf16 %v1511_v45  ;;  %v1544_v4 = vld [vmem:[#allocation7 + $0xc08] sm:$0xff] }
 0x18e   :  { %2896 = vmatpush2.bf16.msra.mxu0 %v2287_v15  ;;  %2927 = vmatpush1.bf16.msra.mxu1 %v2327_v21  ;;  %v1156_v15 = vmax.f32 %v5407_v35, 0.0  ;;  %v5470_v21 = vpack.c.bf16 %v1151_v34, %v1151_v34  ;;  %v2487_v35 = vunpack.c.l.s8.bf16 %v1567_v43 }
 0x18f   :  { %2897 = vmatprep.subr.bf16.mxu0 %v2280_v47  ;;  %2928 = vmatprep.subr.bf16.mxu1 %v2320_v48  ;;  %v2407_v47 = vunpack.c.l.s8.bf16 %v1527_v28  ;;  %v2495_v48 = vunpack.c.h.s8.bf16 %v1567_v43  ;;  %v1158_v28 = vmax.f32 %v5456_v51, 0.0  ;;  %v1543_v43 = vld [vmem:[#allocation7 + $0xc00] sm:$0xff] }
 0x190   :  { %v2447_v51 = vunpack.c.h.s8.bf16 %v1543_v43 }
 0x192   :  { %2898 = vmatpush2.bf16.msra.mxu0 %v2279_v24  ;;  %2929 = vmatpush1.bf16.msra.mxu1 %v2319_v10  ;;  %v1519_v24 = vld [vmem:[#allocation7 + $0xb40] sm:$0xff]  ;;  %v1560_v10 = vld [vmem:[#allocation7 + $0xc88] sm:$0xff] }
 0x193   :  { %2899 = vmatprep.subr.bf16.mxu0 %v2272_v25  ;;  %2930 = vmatprep.subr.bf16.mxu1 %v2312_v11  ;;  %v5472_v25 = vpack.c.bf16 %v1156_v15, %v1156_v15  ;;  %v2399_v11 = vunpack.c.h.s8.bf16 %v1519_v24  ;;  %v2480_v58 = vunpack.c.h.s8.bf16 %v1560_v10  ;;  %v2472_v7 = vunpack.c.l.s8.bf16 %v1560_v10 }
 0x196   :  { %2900 = vmatpush2.bf16.msra.mxu0 %v2271_v22  ;;  %2931 = vmatpush1.bf16.msra.mxu1 %v2311_v61  ;;  %v1512_v22 = vld [vmem:[#allocation7 + $0xb08] sm:$0xff]  ;;  %v2391_v61 = vunpack.c.l.s8.bf16 %v1519_v24  ;;  %v2439_v24 = vunpack.c.l.s8.bf16 %v1543_v43 }
 0x197   :  { %2901 = vmatprep.subr.bf16.mxu0 %v2264_v36  ;;  %2932 = vmatprep.subr.bf16.mxu1 %v2432_v20  ;;  %v2479_v36 = vunpack.c.h.s8.bf16 %v1559_v59  ;;  %v2384_v20 = vunpack.c.h.s8.bf16 %v1512_v22 }
 0x19a   :  { %2902 = vmatpush2.bf16.msra.mxu0 %v2263_v18  ;;  %2933 = vmatpush2.bf16.msra.mxu1 %v2431_v40  ;;  %v2471_v18 = vunpack.c.l.s8.bf16 %v1559_v59  ;;  %v2376_v40 = vunpack.c.l.s8.bf16 %v1512_v22 }
 0x19b   :  { %2903 = vmatprep.subr.bf16.mxu0 %v2256_v54  ;;  %2934 = vmatprep.subr.bf16.mxu1 %v2424_v57  ;;  %v2464_v54 = vunpack.c.h.s8.bf16 %v1552_v46  ;;  %v1551_v57 = vld [vmem:[#allocation7 + $0xc40] sm:$0xff] }
 0x19c   :  { %v2463_v50 = vunpack.c.h.s8.bf16 %v1551_v57  ;;  %v2455_v34 = vunpack.c.l.s8.bf16 %v1551_v57 }
 0x19e   :  { %2904 = vmatpush2.bf16.msra.mxu0 %v2255_v2  ;;  %2935 = vmatpush2.bf16.msra.mxu1 %v2423_v3  ;;  %v1153_v2 = vmax.f32 %v5425_v62, 0.0  ;;  %v2456_v3 = vunpack.c.l.s8.bf16 %v1552_v46  ;;  %v5480_v62 = vpack.c.bf16 %v1158_v28, %v1158_v28 }
 0x19f   :  { %2905 = vmatprep.subr.bf16.mxu0 %v2248_v37  ;;  %2936 = vmatprep.subr.bf16.mxu1 %v2416_v63  ;;  %v2624_v37 = vunpack.c.h.s8.bf16 %v1632_v19  ;;  %v1631_v63 = vld [vmem:[#allocation7 + $0xec0] sm:$0xff] }
 0x1a0   :  { %v2615_v15 = vunpack.c.l.s8.bf16 %v1631_v63 }
 0x1a2   :  { %2906 = vmatpush2.bf16.msra.mxu0 %v2247_v16  ;;  %2937 = vmatpush2.bf16.msra.mxu1 %v2415_v13  ;;  %v2623_v16 = vunpack.c.h.s8.bf16 %v1631_v63  ;;  %v5478_v13 = vpack.c.bf16 %v1153_v2, %v1153_v2  ;;  %v1607_v2 = vld [vmem:[#allocation7 + $0xe00] sm:$0xff] }
 0x1a3   :  { %2938 = vmatprep.subr.bf16.mxu1 %v2408_v39  ;;  %2957 = vmatprep.subr.bf16.mxu0 %v2496_v26  ;;  %v2448_v39 = vunpack.c.h.s8.bf16 %v1544_v4  ;;  %v2616_v26 = vunpack.c.l.s8.bf16 %v1632_v19  ;;  %v2575_v63 = vunpack.c.h.s8.bf16 %v1607_v2 }
 0x1a5   :  { %2908 = vmatmul.mubr.bf16.vlgmr.msra.gmra.mxu0 %v5470_v21 }
 0x1a6   :  { %2939 = vmatpush2.bf16.msra.mxu1 %v2407_v47  ;;  %2958 = vmatpush1.bf16.msra.mxu0 %v2495_v48  ;;  %v2440_v47 = vunpack.c.l.s8.bf16 %v1544_v4  ;;  %v2608_v48 = vunpack.c.h.s8.bf16 %v1624_v0 }
 0x1a7   :  { %2940 = vmatprep.subr.bf16.mxu1 %v2400_v53  ;;  %2959 = vmatprep.subr.bf16.mxu0 %v2488_v23  ;;  %v1623_v53 = vld [vmem:[#allocation7 + $0xe80] sm:$0xff]  ;;  %v1600_v23 = vld [vmem:[#allocation7 + $0xdc8] sm:$0xff] }
 0x1a8   :  { %2989 = vmatprep.mubr.bf16.mxu0 %v5472_v25  ;;  %v2607_v10 = vunpack.c.h.s8.bf16 %v1623_v53  ;;  %v2599_v22 = vunpack.c.l.s8.bf16 %v1623_v53 }
 0x1aa   :  { %2941 = vmatpush2.bf16.msra.mxu1 %v2399_v11  ;;  %2960 = vmatpush1.bf16.msra.mxu0 %v2487_v35  ;;  %v2560_v11 = vunpack.c.h.s8.bf16 %v1600_v23  ;;  %v2600_v35 = vunpack.c.l.s8.bf16 %v1624_v0 }
 0x1ab   :  { %2942 = vmatprep.subr.bf16.mxu1 %v2392_v56  ;;  %2961 = vmatprep.subr.bf16.mxu0 %v2480_v58  ;;  %v1599_v56 = vld [vmem:[#allocation7 + $0xdc0] sm:$0xff]  ;;  %v1616_v58 = vld [vmem:[#allocation7 + $0xe48] sm:$0xff] }
 0x1ac   :  { %v2559_v59 = vunpack.c.h.s8.bf16 %v1599_v56  ;;  %v2551_v45 = vunpack.c.l.s8.bf16 %v1599_v56 }
 0x1ae   :  { %2943 = vmatpush2.bf16.msra.mxu1 %v2391_v61  ;;  %2962 = vmatpush1.bf16.msra.mxu0 %v2479_v36  ;;  %v2552_v61 = vunpack.c.l.s8.bf16 %v1600_v23  ;;  %v2592_v36 = vunpack.c.h.s8.bf16 %v1616_v58 }
 0x1af   :  { %2944 = vmatprep.subr.bf16.mxu1 %v2384_v20  ;;  %2963 = vmatprep.subr.bf16.mxu0 %v2472_v7  ;;  %v1615_v20 = vld [vmem:[#allocation7 + $0xe40] sm:$0xff]  ;;  %v1592_v7 = vld [vmem:[#allocation7 + $0xd88] sm:$0xff] }
 0x1b0   :  { %v2591_v46 = vunpack.c.h.s8.bf16 %v1615_v20  ;;  %v2583_v19 = vunpack.c.l.s8.bf16 %v1615_v20  ;;  %v1155_v20 = vmax.f32 %v5405_v31, 0.0 }
 0x1b2   :  { %2945 = vmatpush2.bf16.msra.mxu1 %v2383_v17  ;;  %2964 = vmatpush1.bf16.msra.mxu0 %v2471_v18  ;;  %v2544_v17 = vunpack.c.h.s8.bf16 %v1592_v7  ;;  %v2584_v18 = vunpack.c.l.s8.bf16 %v1616_v58 }
 0x1b3   :  { %2946 = vmatprep.subr.bf16.mxu1 %v2376_v40  ;;  %2965 = vmatprep.subr.bf16.mxu0 %v2464_v54  ;;  %v1591_v40 = vld [vmem:[#allocation7 + $0xd80] sm:$0xff]  ;;  %v1608_v54 = vld [vmem:[#allocation7 + $0xe08] sm:$0xff] }
 0x1b4   :  { %v2543_v57 = vunpack.c.h.s8.bf16 %v1591_v40  ;;  %v2568_v4 = vunpack.c.l.s8.bf16 %v1608_v54 }
 0x1b6   :  { %2947 = vmatpush2.bf16.msra.mxu1 %v2375_v32  ;;  %2966 = vmatpush1.bf16.msra.mxu0 %v2463_v50  ;;  %v2536_v32 = vunpack.c.l.s8.bf16 %v1592_v7  ;;  %v2576_v50 = vunpack.c.h.s8.bf16 %v1608_v54  ;;  %v5485_v54 = vpack.c.bf16 %v1155_v20, %v1155_v20 }
 0x1b7   :  { %2967 = vmatprep.subr.bf16.mxu0 %v2456_v3  ;;  %2998 = vmatprep.subr.bf16.mxu1 %v2624_v37  ;;  %v1584_v3 = vld [vmem:[#allocation7 + $0xd48] sm:$0xff]  ;;  %v2535_v37 = vunpack.c.l.s8.bf16 %v1591_v40 }
 0x1b8   :  { %v2528_v28 = vunpack.c.h.s8.bf16 %v1584_v3  ;;  %v2520_v43 = vunpack.c.l.s8.bf16 %v1584_v3 }
 0x1b9   :  { %2949 = vmatmul.mubr.bf16.vlgmr.msra.gmra.mxu1 %v5478_v13 }
 0x1ba   :  { %2968 = vmatpush1.bf16.msra.mxu0 %v2455_v34  ;;  %2999 = vmatpush1.bf16.msra.mxu1 %v2623_v16  ;;  %v1583_v34 = vld [vmem:[#allocation7 + $0xd40] sm:$0xff]  ;;  %v1664_v16 = vld [vmem:[#allocation7 + $0xfc8] sm:$0xff] }
 0x1bb   :  { %2969 = vmatprep.subr.bf16.mxu0 %v2448_v39  ;;  %3000 = vmatprep.subr.bf16.mxu1 %v2616_v26  ;;  %v2527_v39 = vunpack.c.h.s8.bf16 %v1583_v34  ;;  %v2567_v26 = vunpack.c.l.s8.bf16 %v1607_v2  ;;  %v2688_v0 = vunpack.c.h.s8.bf16 %v1664_v16  ;;  %v2680_v23 = vunpack.c.l.s8.bf16 %v1664_v16 }
 0x1bc   :  { %3030 = vmatprep.mubr.bf16.mxu1 %v5480_v62 }
 0x1be   :  { %2970 = vmatpush1.bf16.msra.mxu0 %v2447_v51  ;;  %3001 = vmatpush1.bf16.msra.mxu1 %v2615_v15  ;;  %v1663_v51 = vld [vmem:[#allocation7 + $0xfc0] sm:$0xff]  ;;  %v1576_v15 = vld [vmem:[#allocation7 + $0xd08] sm:$0xff] }
 0x1bf   :  { %2971 = vmatprep.subr.bf16.mxu0 %v2440_v47  ;;  %3002 = vmatprep.subr.bf16.mxu1 %v2608_v48  ;;  %v2519_v47 = vunpack.c.l.s8.bf16 %v1583_v34  ;;  %v2687_v48 = vunpack.c.h.s8.bf16 %v1663_v51  ;;  %v2512_v53 = vunpack.c.h.s8.bf16 %v1576_v15  ;;  %v2504_v56 = vunpack.c.l.s8.bf16 %v1576_v15  ;;  %v1640_v34 = vld [vmem:[#allocation7 + $0xf08] sm:$0xff]  ;;  %v1639_v15 = vld [vmem:[#allocation7 + $0xf00] sm:$0xff] }
 0x1c2   :  { %2972 = vmatpush1.bf16.msra.mxu0 %v2439_v24  ;;  %3003 = vmatpush1.bf16.msra.mxu1 %v2607_v10  ;;  %v1575_v24 = vld [vmem:[#allocation7 + $0xd00] sm:$0xff]  ;;  %v1656_v10 = vld [vmem:[#allocation7 + $0xf88] sm:$0xff] }
 0x1c3   :  { %2973 = vmatprep.subr.bf16.mxu0 %v2560_v11  ;;  %3004 = vmatprep.subr.bf16.mxu1 %v2600_v35  ;;  %v2511_v11 = vunpack.c.h.s8.bf16 %v1575_v24  ;;  %v2679_v35 = vunpack.c.l.s8.bf16 %v1663_v51  ;;  %v2672_v58 = vunpack.c.h.s8.bf16 %v1656_v10  ;;  %v2664_v7 = vunpack.c.l.s8.bf16 %v1656_v10  ;;  %v1169_v10 = vld [vmem:[#allocation7 + $0x50] sm:$0xff] }
 0x1c4   :  { %v1689_v20 = vunpack.c.l.s8.bf16 %v1169_v10 }
 0x1c6   :  { %2974 = vmatpush2.bf16.msra.mxu0 %v2559_v59  ;;  %3005 = vmatpush1.bf16.msra.mxu1 %v2599_v22  ;;  %v1655_v59 = vld [vmem:[#allocation7 + $0xf80] sm:$0xff]  ;;  %v1186_v22 = vld [vmem:[#allocation7 + $0xd8] sm:$0xff] }
 0x1c7   :  { %2975 = vmatprep.subr.bf16.mxu0 %v2552_v61  ;;  %3006 = vmatprep.subr.bf16.mxu1 %v2592_v36  ;;  %v2503_v61 = vunpack.c.l.s8.bf16 %v1575_v24  ;;  %v2671_v36 = vunpack.c.h.s8.bf16 %v1655_v59 }
 0x1ca   :  { %2976 = vmatpush2.bf16.msra.mxu0 %v2551_v45  ;;  %3007 = vmatpush1.bf16.msra.mxu1 %v2591_v46  ;;  %v1730_v45 = vunpack.c.h.s8.bf16 %v1186_v22  ;;  %v1185_v46 = vld [vmem:[#allocation7 + $0xd0] sm:$0xff] }
 0x1cb   :  { %2977 = vmatprep.subr.bf16.mxu0 %v2544_v17  ;;  %3008 = vmatprep.subr.bf16.mxu1 %v2584_v18  ;;  %v1648_v17 = vld [vmem:[#allocation7 + $0xf48] sm:$0xff]  ;;  %v2663_v18 = vunpack.c.l.s8.bf16 %v1655_v59  ;;  %v1729_v40 = vunpack.c.h.s8.bf16 %v1185_v46  ;;  %v1721_v3 = vunpack.c.l.s8.bf16 %v1185_v46 }
 0x1ce   :  { %2978 = vmatpush2.bf16.msra.mxu0 %v2543_v57  ;;  %3009 = vmatpush1.bf16.msra.mxu1 %v2583_v19  ;;  %v2656_v57 = vunpack.c.h.s8.bf16 %v1648_v17  ;;  %v1647_v19 = vld [vmem:[#allocation7 + $0xf40] sm:$0xff] }
 0x1cf   :  { %2979 = vmatprep.subr.bf16.mxu0 %v2536_v32  ;;  %3010 = vmatprep.subr.bf16.mxu1 %v2576_v50  ;;  %v1722_v32 = vunpack.c.l.s8.bf16 %v1186_v22  ;;  %v1178_v50 = vld [vmem:[#allocation7 + $0x98] sm:$0xff]  ;;  %v2655_v2 = vunpack.c.h.s8.bf16 %v1647_v19 }
 0x1d0   :  { %v1706_v51 = vunpack.c.l.s8.bf16 %v1178_v50 }
 0x1d2   :  { %2980 = vmatpush2.bf16.msra.mxu0 %v2535_v37  ;;  %3011 = vmatpush1.bf16.msra.mxu1 %v2575_v63  ;;  %v2648_v63 = vunpack.c.l.s8.bf16 %v1648_v17  ;;  %v1161_v17 = vld [vmem:[#allocation7 + $0x10] sm:$0xff] }
 0x1d3   :  { %2981 = vmatprep.subr.bf16.mxu0 %v2528_v28  ;;  %3012 = vmatprep.subr.bf16.mxu1 %v2568_v4  ;;  %v1714_v28 = vunpack.c.h.s8.bf16 %v1178_v50  ;;  %v1177_v4 = vld [vmem:[#allocation7 + $0x90] sm:$0xff] }
 0x1d6   :  { %2982 = vmatpush2.bf16.msra.mxu0 %v2527_v39  ;;  %3013 = vmatpush1.bf16.msra.mxu1 %v2567_v26  ;;  %v2647_v39 = vunpack.c.l.s8.bf16 %v1647_v19  ;;  %v1713_v26 = vunpack.c.h.s8.bf16 %v1177_v4  ;;  %v1681_v19 = vunpack.c.h.s8.bf16 %v1161_v17 }
 0x1d7   :  { %2983 = vmatprep.subr.bf16.mxu0 %v2520_v43  ;;  %3014 = vmatprep.subr.bf16.mxu1 %v2688_v0  ;;  %v2640_v0 = vunpack.c.h.s8.bf16 %v1640_v34 }
 0x1da   :  { %2984 = vmatpush2.bf16.msra.mxu0 %v2519_v47  ;;  %3015 = vmatpush2.bf16.msra.mxu1 %v2687_v48  ;;  %v1170_v47 = vld [vmem:[#allocation7 + $0x58] sm:$0xff]  ;;  %v2639_v48 = vunpack.c.h.s8.bf16 %v1639_v15 }
 0x1db   :  { %2985 = vmatprep.subr.bf16.mxu0 %v2512_v53  ;;  %3016 = vmatprep.subr.bf16.mxu1 %v2680_v23  ;;  %v1705_v53 = vunpack.c.l.s8.bf16 %v1177_v4  ;;  %v2632_v23 = vunpack.c.l.s8.bf16 %v1640_v34  ;;  %v1698_v24 = vunpack.c.h.s8.bf16 %v1170_v47  ;;  %v1690_v59 = vunpack.c.l.s8.bf16 %v1170_v47  ;;  %v1218_v4 = vld [vmem:[#allocation7 + $0x1d8] sm:$0xff] }
 0x1de   :  { %2986 = vmatpush2.bf16.msra.mxu0 %v2511_v11  ;;  %3017 = vmatpush2.bf16.msra.mxu1 %v2679_v35  ;;  %v1250_v11 = vld [vmem:[#allocation7 + $0x2d8] sm:$0xff]  ;;  %v2631_v35 = vunpack.c.l.s8.bf16 %v1639_v15 }
 0x1df   :  { %2987 = vmatprep.subr.bf16.mxu0 %v2504_v56  ;;  %3018 = vmatprep.subr.bf16.mxu1 %v2672_v58  ;;  %v1697_v56 = vunpack.c.h.s8.bf16 %v1169_v10  ;;  %v1157_v58 = vmax.f32 %v5454_v8, 0.0  ;;  %v1858_v22 = vunpack.c.h.s8.bf16 %v1250_v11 }
 0x1e2   :  { %2988 = vmatpush2.bf16.msra.mxu0 %v2503_v61  ;;  %3019 = vmatpush2.bf16.msra.mxu1 %v2671_v36  ;;  %v1249_v61 = vld [vmem:[#allocation7 + $0x2d0] sm:$0xff]  ;;  %v1162_v36 = vld [vmem:[#allocation7 + $0x18] sm:$0xff] }
 0x1e3   :  { %3020 = vmatprep.subr.bf16.mxu1 %v2664_v7  ;;  %3039 = vmatprep.subr.bf16.mxu0 %v1730_v45  ;;  %v1857_v7 = vunpack.c.h.s8.bf16 %v1249_v61  ;;  %v5492_v45 = vpack.c.bf16 %v1157_v58, %v1157_v58  ;;  %v1682_v46 = vunpack.c.h.s8.bf16 %v1162_v36  ;;  %v1226_v58 = vld [vmem:[#allocation7 + $0x218] sm:$0xff] }
 0x1e5   :  { %2990 = vmatmul.mubr.bf16.vlgmr.msra.gmra.mxu0 %v5485_v54  ;;  %v2745_v31 = vpop.f32.mrf.mxu0 }
 0x1e6   :  { %3021 = vmatpush2.bf16.msra.mxu1 %v2663_v18  ;;  %3040 = vmatpush1.bf16.msra.mxu0 %v1729_v40  ;;  %v1850_v18 = vunpack.c.l.s8.bf16 %v1250_v11  ;;  %v1242_v40 = vld [vmem:[#allocation7 + $0x298] sm:$0xff] }
 0x1e7   :  { %3071 = vmatprep.mubr.bf16.mxu0 %v5339_v41  ;;  %v5489_v37 = vpop.f32.mrf.mxu0  ;;  %3022 = vmatprep.subr.bf16.mxu1 %v2656_v57 }
 0x1e8   :  { %3041 = vmatprep.subr.bf16.mxu0 %v1722_v32  ;;  %v1849_v32 = vunpack.c.l.s8.bf16 %v1249_v61 }
 0x1e9   :  { %v2749_v16 = vpop.f32.mrf.mxu0 }
 0x1ea   :  { %3023 = vmatpush2.bf16.msra.mxu1 %v2655_v2  ;;  %3042 = vmatpush1.bf16.msra.mxu0 %v1721_v3  ;;  %v1674_v2 = vunpack.c.l.s8.bf16 %v1162_v36  ;;  %v1842_v3 = vunpack.c.h.s8.bf16 %v1242_v40  ;;  %v1810_v36 = vunpack.c.h.s8.bf16 %v1226_v58 }
 0x1eb   :  { %v2750_v43 = vpop.f32.mrf.mxu0  ;;  %3024 = vmatprep.subr.bf16.mxu1 %v2648_v63  ;;  %3043 = vmatprep.subr.bf16.mxu0 %v1714_v28  ;;  %v1241_v63 = vld [vmem:[#allocation7 + $0x290] sm:$0xff] }
 0x1ec   :  { %v1841_v16 = vunpack.c.h.s8.bf16 %v1241_v63  ;;  %v1834_v43 = vunpack.c.l.s8.bf16 %v1242_v40  ;;  %v1833_v47 = vunpack.c.l.s8.bf16 %v1241_v63  ;;  %v1802_v40 = vunpack.c.l.s8.bf16 %v1226_v58  ;;  %v1281_v63 = vld [vmem:[#allocation7 + $0x3d0] sm:$0xff] }
 0x1ee   :  { %3025 = vmatpush2.bf16.msra.mxu1 %v2647_v39  ;;  %3044 = vmatpush1.bf16.msra.mxu0 %v1713_v26  ;;  %v1794_v26 = vunpack.c.h.s8.bf16 %v1218_v4 }
 0x1ef   :  { %3026 = vmatprep.subr.bf16.mxu1 %v2640_v0  ;;  %3045 = vmatprep.subr.bf16.mxu0 %v1706_v51  ;;  %v1217_v0 = vld [vmem:[#allocation7 + $0x1d0] sm:$0xff]  ;;  %v1234_v51 = vld [vmem:[#allocation7 + $0x258] sm:$0xff] }
 0x1f0   :  { %v1793_v15 = vunpack.c.h.s8.bf16 %v1217_v0 }
 0x1f2   :  { %3027 = vmatpush2.bf16.msra.mxu1 %v2639_v48  ;;  %3046 = vmatpush1.bf16.msra.mxu0 %v1705_v53  ;;  %v1826_v48 = vunpack.c.h.s8.bf16 %v1234_v51  ;;  %v1233_v53 = vld [vmem:[#allocation7 + $0x250] sm:$0xff] }
 0x1f3   :  { %3028 = vmatprep.subr.bf16.mxu1 %v2632_v23  ;;  %3047 = vmatprep.subr.bf16.mxu0 %v1698_v24  ;;  %v1210_v23 = vld [vmem:[#allocation7 + $0x198] sm:$0xff]  ;;  %v1785_v24 = vunpack.c.l.s8.bf16 %v1217_v0  ;;  %v1825_v10 = vunpack.c.h.s8.bf16 %v1233_v53 }
 0x1f4   :  { %v1778_v11 = vunpack.c.h.s8.bf16 %v1210_v23  ;;  %v1770_v61 = vunpack.c.l.s8.bf16 %v1210_v23 }
 0x1f6   :  { %3029 = vmatpush2.bf16.msra.mxu1 %v2631_v35  ;;  %3048 = vmatpush1.bf16.msra.mxu0 %v1697_v56  ;;  %v1818_v35 = vunpack.c.l.s8.bf16 %v1234_v51  ;;  %v1209_v56 = vld [vmem:[#allocation7 + $0x190] sm:$0xff]  ;;  %v1913_v51 = vunpack.c.l.s8.bf16 %v1281_v63 }
 0x1f7   :  { %3049 = vmatprep.subr.bf16.mxu0 %v1690_v59  ;;  %3080 = vmatprep.subr.bf16.mxu1 %v1858_v22  ;;  %v1777_v59 = vunpack.c.h.s8.bf16 %v1209_v56  ;;  %v1817_v22 = vunpack.c.l.s8.bf16 %v1233_v53 }
 0x1f9   :  { %3031 = vmatmul.mubr.bf16.vlgmr.msra.gmra.mxu1 %v5492_v45  ;;  %v2786_v8 = vpop.f32.mrf.mxu1 }
 0x1fa   :  { %v5495_v57 = vadd.f32 %v2786_v8, %v2745_v31  ;;  %3050 = vmatpush1.bf16.msra.mxu0 %v1689_v20  ;;  %3081 = vmatpush1.bf16.msra.mxu1 %v1857_v7  ;;  %v1673_v31 = vunpack.c.l.s8.bf16 %v1161_v17  ;;  %v1225_v20 = vld [vmem:[#allocation7 + $0x210] sm:$0xff]  ;;  %v1202_v7 = vld [vmem:[#allocation7 + $0x158] sm:$0xff] }
 0x1fb   :  { %3112 = vmatprep.mubr.bf16.mxu1 %v5367_v5  ;;  %v2788_v50 = vpop.f32.mrf.mxu1  ;;  %3051 = vmatprep.subr.bf16.mxu0 %v1682_v46  ;;  %v1769_v46 = vunpack.c.l.s8.bf16 %v1209_v56  ;;  %v1809_v17 = vunpack.c.h.s8.bf16 %v1225_v20  ;;  %v1201_v8 = vld [vmem:[#allocation7 + $0x150] sm:$0xff] }
 0x1fc   :  { %v5499_v28 = vadd.f32 %v2788_v50, %v5489_v37  ;;  %3082 = vmatprep.subr.bf16.mxu1 %v1850_v18  ;;  %v1786_v37 = vunpack.c.l.s8.bf16 %v1218_v4  ;;  %v1762_v18 = vunpack.c.h.s8.bf16 %v1202_v7  ;;  %v1801_v50 = vunpack.c.l.s8.bf16 %v1225_v20  ;;  %v1194_v4 = vld [vmem:[#allocation7 + $0x118] sm:$0xff] }
 0x1fd   :  { %v2790_v34 = vpop.f32.mrf.mxu1 }
 0x1fe   :  { %3052 = vmatpush1.bf16.msra.mxu0 %v1681_v19  ;;  %3083 = vmatpush1.bf16.msra.mxu1 %v1849_v32  ;;  %v1282_v19 = vld [vmem:[#allocation7 + $0x3d8] sm:$0xff]  ;;  %v1761_v32 = vunpack.c.h.s8.bf16 %v1201_v8  ;;  %v1753_v34 = vunpack.c.l.s8.bf16 %v1201_v8 }
 0x1ff   :  { %v2791_v39 = vpop.f32.mrf.mxu1  ;;  %3053 = vmatprep.subr.bf16.mxu0 %v1674_v2  ;;  %3084 = vmatprep.subr.bf16.mxu1 %v1842_v3  ;;  %v1754_v2 = vunpack.c.l.s8.bf16 %v1202_v7  ;;  %v1922_v3 = vunpack.c.h.s8.bf16 %v1282_v19 }
 0x200   :  { %v1914_v39 = vunpack.c.l.s8.bf16 %v1282_v19  ;;  %v1305_v19 = vld [vmem:[#allocation7 + $0x490] sm:$0xff] }
 0x202   :  { %3054 = vmatpush1.bf16.msra.mxu0 %v1673_v31  ;;  %3085 = vmatpush1.bf16.msra.mxu1 %v1841_v16  ;;  %v1921_v31 = vunpack.c.h.s8.bf16 %v1281_v63  ;;  %v1746_v16 = vunpack.c.h.s8.bf16 %v1194_v4 }
 0x203   :  { %3055 = vmatprep.subr.bf16.mxu0 %v1794_v26  ;;  %3086 = vmatprep.subr.bf16.mxu1 %v1834_v43  ;;  %v1193_v26 = vld [vmem:[#allocation7 + $0x110] sm:$0xff]  ;;  %v1274_v43 = vld [vmem:[#allocation7 + $0x398] sm:$0xff] }
 0x204   :  { %v1745_v0 = vunpack.c.h.s8.bf16 %v1193_v26  ;;  %v1737_v53 = vunpack.c.l.s8.bf16 %v1193_v26  ;;  %v1961_v26 = vunpack.c.l.s8.bf16 %v1305_v19 }
 0x206   :  { %3056 = vmatpush2.bf16.msra.mxu0 %v1793_v15  ;;  %3087 = vmatpush1.bf16.msra.mxu1 %v1833_v47  ;;  %v1738_v15 = vunpack.c.l.s8.bf16 %v1194_v4  ;;  %v1906_v47 = vunpack.c.h.s8.bf16 %v1274_v43 }
 0x207   :  { %3057 = vmatprep.subr.bf16.mxu0 %v1786_v37  ;;  %3088 = vmatprep.subr.bf16.mxu1 %v1826_v48  ;;  %v1273_v37 = vld [vmem:[#allocation7 + $0x390] sm:$0xff]  ;;  %v1314_v48 = vld [vmem:[#allocation7 + $0x4d8] sm:$0xff] }
 0x208   :  { %v1905_v23 = vunpack.c.h.s8.bf16 %v1273_v37  ;;  %v1897_v56 = vunpack.c.l.s8.bf16 %v1273_v37 }
 0x20a   :  { %3058 = vmatpush2.bf16.msra.mxu0 %v1785_v24  ;;  %3089 = vmatpush1.bf16.msra.mxu1 %v1825_v10  ;;  %v1898_v24 = vunpack.c.l.s8.bf16 %v1274_v43  ;;  %v1986_v10 = vunpack.c.h.s8.bf16 %v1314_v48 }
 0x20b   :  { %3059 = vmatprep.subr.bf16.mxu0 %v1778_v11  ;;  %3090 = vmatprep.subr.bf16.mxu1 %v1818_v35  ;;  %v1313_v11 = vld [vmem:[#allocation7 + $0x4d0] sm:$0xff]  ;;  %v1266_v35 = vld [vmem:[#allocation7 + $0x358] sm:$0xff] }
 0x20c   :  { %v1985_v58 = vunpack.c.h.s8.bf16 %v1313_v11 }
 0x20e   :  { %3060 = vmatpush2.bf16.msra.mxu0 %v1777_v59  ;;  %3091 = vmatpush1.bf16.msra.mxu1 %v1817_v22  ;;  %v1890_v59 = vunpack.c.h.s8.bf16 %v1266_v35  ;;  %v1265_v22 = vld [vmem:[#allocation7 + $0x350] sm:$0xff] }
 0x20f   :  { %3061 = vmatprep.subr.bf16.mxu0 %v1770_v61  ;;  %3092 = vmatprep.subr.bf16.mxu1 %v1810_v36  ;;  %v1978_v61 = vunpack.c.l.s8.bf16 %v1314_v48  ;;  %v1306_v36 = vld [vmem:[#allocation7 + $0x498] sm:$0xff] }
 0x210   :  { %v1970_v8 = vunpack.c.h.s8.bf16 %v1306_v36  ;;  %v1962_v4 = vunpack.c.l.s8.bf16 %v1306_v36 }
 0x212   :  { %3062 = vmatpush2.bf16.msra.mxu0 %v1769_v46  ;;  %3093 = vmatpush1.bf16.msra.mxu1 %v1809_v17  ;;  %v1889_v46 = vunpack.c.h.s8.bf16 %v1265_v22  ;;  %v1977_v17 = vunpack.c.l.s8.bf16 %v1313_v11 }
 0x213   :  { %3063 = vmatprep.subr.bf16.mxu0 %v1762_v18  ;;  %3094 = vmatprep.subr.bf16.mxu1 %v1802_v40  ;;  %v1882_v40 = vunpack.c.l.s8.bf16 %v1266_v35  ;;  %v1289_v35 = vld [vmem:[#allocation7 + $0x410] sm:$0xff] }
 0x216   :  { %3064 = vmatpush2.bf16.msra.mxu0 %v1761_v32  ;;  %3095 = vmatpush1.bf16.msra.mxu1 %v1801_v50  ;;  %v1258_v50 = vld [vmem:[#allocation7 + $0x318] sm:$0xff] }
 0x217   :  { %3065 = vmatprep.subr.bf16.mxu0 %v1754_v2  ;;  %3096 = vmatprep.subr.bf16.mxu1 %v1922_v3  ;;  %v1881_v3 = vunpack.c.l.s8.bf16 %v1265_v22  ;;  %v1874_v63 = vunpack.c.h.s8.bf16 %v1258_v50 }
 0x21a   :  { %3066 = vmatpush2.bf16.msra.mxu0 %v1753_v34  ;;  %3097 = vmatpush2.bf16.msra.mxu1 %v1921_v31  ;;  %v1257_v34 = vld [vmem:[#allocation7 + $0x310] sm:$0xff] }
 0x21b   :  { %3067 = vmatprep.subr.bf16.mxu0 %v1746_v16  ;;  %3098 = vmatprep.subr.bf16.mxu1 %v1914_v39  ;;  %v1298_v16 = vld [vmem:[#allocation7 + $0x458] sm:$0xff]  ;;  %v1873_v39 = vunpack.c.h.s8.bf16 %v1257_v34 }
 0x21c   :  { %v1954_v43 = vunpack.c.h.s8.bf16 %v1298_v16  ;;  %v1946_v37 = vunpack.c.l.s8.bf16 %v1298_v16 }
 0x21e   :  { %3068 = vmatpush2.bf16.msra.mxu0 %v1745_v0  ;;  %3099 = vmatpush2.bf16.msra.mxu1 %v1913_v51  ;;  %v1297_v0 = vld [vmem:[#allocation7 + $0x450] sm:$0xff]  ;;  %v1378_v51 = vld [vmem:[#allocation7 + $0x6d8] sm:$0xff] }
 0x21f   :  { %3069 = vmatprep.subr.bf16.mxu0 %v1738_v15  ;;  %3100 = vmatprep.subr.bf16.mxu1 %v1906_v47  ;;  %v1865_v15 = vunpack.c.l.s8.bf16 %v1257_v34  ;;  %v1953_v47 = vunpack.c.h.s8.bf16 %v1297_v0  ;;  %v2114_v48 = vunpack.c.h.s8.bf16 %v1378_v51 }
 0x222   :  { %3070 = vmatpush2.bf16.msra.mxu0 %v1737_v53  ;;  %3101 = vmatpush2.bf16.msra.mxu1 %v1905_v23  ;;  %v1377_v53 = vld [vmem:[#allocation7 + $0x6d0] sm:$0xff]  ;;  %v1290_v23 = vld [vmem:[#allocation7 + $0x418] sm:$0xff] }
 0x223   :  { %3102 = vmatprep.subr.bf16.mxu1 %v1898_v24  ;;  %3121 = vmatprep.subr.bf16.mxu0 %v1986_v10  ;;  %v1945_v24 = vunpack.c.l.s8.bf16 %v1297_v0  ;;  %v2113_v10 = vunpack.c.h.s8.bf16 %v1377_v53  ;;  %v1938_v11 = vunpack.c.h.s8.bf16 %v1290_v23  ;;  %v2105_v36 = vunpack.c.l.s8.bf16 %v1377_v53 }
 0x225   :  { %v2827_v20 = vpop.f32.mrf.mxu0  ;;  %3072 = vmatmul.mubr.bf16.vlgmr.msra.gmra.mxu0 %v5343_v29 }
 0x226   :  { %v2828_v7 = vadd.f32 %v2827_v20, %v5495_v57  ;;  %3103 = vmatpush2.bf16.msra.mxu1 %v1897_v56  ;;  %3122 = vmatpush1.bf16.msra.mxu0 %v1985_v58  ;;  %v1969_v57 = vunpack.c.h.s8.bf16 %v1305_v19  ;;  %v2106_v56 = vunpack.c.l.s8.bf16 %v1378_v51  ;;  %v1370_v58 = vld [vmem:[#allocation7 + $0x698] sm:$0xff] }
 0x227   :  { %3153 = vmatprep.mubr.bf16.mxu0 %v5358_v44  ;;  %v2829_v18 = vpop.f32.mrf.mxu0  ;;  %3104 = vmatprep.subr.bf16.mxu1 %v1890_v59 }
 0x228   :  { %v2830_v32 = vadd.f32 %v2829_v18, %v5499_v28  ;;  %3123 = vmatprep.subr.bf16.mxu0 %v1978_v61  ;;  %v1866_v28 = vunpack.c.l.s8.bf16 %v1258_v50  ;;  %v1937_v61 = vunpack.c.h.s8.bf16 %v1289_v35  ;;  %v1369_v18 = vld [vmem:[#allocation7 + $0x690] sm:$0xff] }
 0x229   :  { %v2831_v2 = vpop.f32.mrf.mxu0  ;;  %v2097_v50 = vunpack.c.h.s8.bf16 %v1369_v18 }
 0x22a   :  { %3105 = vmatpush2.bf16.msra.mxu1 %v1889_v46  ;;  %3124 = vmatpush1.bf16.msra.mxu0 %v1977_v17  ;;  %v1930_v46 = vunpack.c.l.s8.bf16 %v1290_v23  ;;  %v2098_v17 = vunpack.c.h.s8.bf16 %v1370_v58 }
 0x22b   :  { %3106 = vmatprep.subr.bf16.mxu1 %v1882_v40  ;;  %3125 = vmatprep.subr.bf16.mxu0 %v1970_v8  ;;  %v2832_v31 = vpop.f32.mrf.mxu0  ;;  %v1346_v8 = vld [vmem:[#allocation7 + $0x5d8] sm:$0xff] }
 0x22c   :  { %v2089_v31 = vunpack.c.l.s8.bf16 %v1369_v18  ;;  %v1409_v18 = vld [vmem:[#allocation7 + $0x7d0] sm:$0xff] }
 0x22e   :  { %3107 = vmatpush2.bf16.msra.mxu1 %v1881_v3  ;;  %3126 = vmatpush1.bf16.msra.mxu0 %v1969_v57  ;;  %v2050_v3 = vunpack.c.h.s8.bf16 %v1346_v8  ;;  %v2090_v57 = vunpack.c.l.s8.bf16 %v1370_v58 }
 0x22f   :  { %3108 = vmatprep.subr.bf16.mxu1 %v1874_v63  ;;  %3127 = vmatprep.subr.bf16.mxu0 %v1962_v4  ;;  %v1345_v63 = vld [vmem:[#allocation7 + $0x5d0] sm:$0xff]  ;;  %v1362_v4 = vld [vmem:[#allocation7 + $0x658] sm:$0xff] }
 0x230   :  { %v2049_v34 = vunpack.c.h.s8.bf16 %v1345_v63  ;;  %v2082_v16 = vunpack.c.h.s8.bf16 %v1362_v4  ;;  %v2074_v51 = vunpack.c.l.s8.bf16 %v1362_v4  ;;  %v2169_v4 = vunpack.c.l.s8.bf16 %v1409_v18 }
 0x232   :  { %3109 = vmatpush2.bf16.msra.mxu1 %v1873_v39  ;;  %3128 = vmatpush1.bf16.msra.mxu0 %v1961_v26  ;;  %v1361_v39 = vld [vmem:[#allocation7 + $0x650] sm:$0xff]  ;;  %v1338_v26 = vld [vmem:[#allocation7 + $0x598] sm:$0xff] }
 0x233   :  { %3110 = vmatprep.subr.bf16.mxu1 %v1866_v28  ;;  %3129 = vmatprep.subr.bf16.mxu0 %v1954_v43  ;;  %v2041_v28 = vunpack.c.l.s8.bf16 %v1345_v63  ;;  %v2081_v43 = vunpack.c.h.s8.bf16 %v1361_v39  ;;  %v2034_v0 = vunpack.c.h.s8.bf16 %v1338_v26  ;;  %v2026_v53 = vunpack.c.l.s8.bf16 %v1338_v26 }
 0x236   :  { %3111 = vmatpush2.bf16.msra.mxu1 %v1865_v15  ;;  %3130 = vmatpush1.bf16.msra.mxu0 %v1953_v47  ;;  %v1337_v15 = vld [vmem:[#allocation7 + $0x590] sm:$0xff]  ;;  %v1354_v47 = vld [vmem:[#allocation7 + $0x618] sm:$0xff] }
 0x237   :  { %3131 = vmatprep.subr.bf16.mxu0 %v1946_v37  ;;  %3162 = vmatprep.subr.bf16.mxu1 %v2114_v48  ;;  %v2033_v37 = vunpack.c.h.s8.bf16 %v1337_v15  ;;  %v2073_v48 = vunpack.c.l.s8.bf16 %v1361_v39  ;;  %v2066_v23 = vunpack.c.h.s8.bf16 %v1354_v47  ;;  %v2058_v58 = vunpack.c.l.s8.bf16 %v1354_v47 }
 0x239   :  { %v2868_v59 = vpop.f32.mrf.mxu1  ;;  %3113 = vmatmul.mubr.bf16.vlgmr.msra.gmra.mxu1 %v5371_v6 }
 0x23a   :  { %v5506_v22 = vadd.f32 %v2868_v59, %v2828_v7  ;;  %3132 = vmatpush1.bf16.msra.mxu0 %v1945_v24  ;;  %3163 = vmatpush1.bf16.msra.mxu1 %v2113_v10  ;;  %v1929_v7 = vunpack.c.l.s8.bf16 %v1289_v35  ;;  %v1353_v24 = vld [vmem:[#allocation7 + $0x610] sm:$0xff]  ;;  %v1330_v10 = vld [vmem:[#allocation7 + $0x558] sm:$0xff] }
 0x23b   :  { %3194 = vmatprep.mubr.bf16.mxu1 %v5400_v9  ;;  %v2870_v20 = vpop.f32.mrf.mxu1  ;;  %3133 = vmatprep.subr.bf16.mxu0 %v1938_v11  ;;  %v2025_v11 = vunpack.c.l.s8.bf16 %v1337_v15  ;;  %v2065_v35 = vunpack.c.h.s8.bf16 %v1353_v24  ;;  %v1329_v59 = vld [vmem:[#allocation7 + $0x550] sm:$0xff] }
 0x23c   :  { %v5509_v40 = vadd.f32 %v2870_v20, %v2830_v32  ;;  %3164 = vmatprep.subr.bf16.mxu1 %v2106_v56  ;;  %v2042_v32 = vunpack.c.l.s8.bf16 %v1346_v8  ;;  %v2018_v56 = vunpack.c.h.s8.bf16 %v1330_v10  ;;  %v2057_v20 = vunpack.c.l.s8.bf16 %v1353_v24  ;;  %v1322_v8 = vld [vmem:[#allocation7 + $0x518] sm:$0xff] }
 0x23d   :  { %v2872_v19 = vpop.f32.mrf.mxu1 }
 0x23e   :  { %3134 = vmatpush1.bf16.msra.mxu0 %v1937_v61  ;;  %3165 = vmatpush1.bf16.msra.mxu1 %v2105_v36  ;;  %v1410_v61 = vld [vmem:[#allocation7 + $0x7d8] sm:$0xff]  ;;  %v2017_v36 = vunpack.c.h.s8.bf16 %v1329_v59  ;;  %v2009_v19 = vunpack.c.l.s8.bf16 %v1329_v59 }
 0x23f   :  { %v2873_v2 = vpop.f32.mrf.mxu1  ;;  %3135 = vmatprep.subr.bf16.mxu0 %v1930_v46  ;;  %3166 = vmatprep.subr.bf16.mxu1 %v2098_v17  ;;  %v2010_v46 = vunpack.c.l.s8.bf16 %v1330_v10  ;;  %v2178_v17 = vunpack.c.h.s8.bf16 %v1410_v61 }
 0x240   :  { %v2170_v2 = vunpack.c.l.s8.bf16 %v1410_v61  ;;  %v1433_v61 = vld [vmem:[#allocation7 + $0x890] sm:$0xff] }
 0x242   :  { %3136 = vmatpush1.bf16.msra.mxu0 %v1929_v7  ;;  %3167 = vmatpush1.bf16.msra.mxu1 %v2097_v50  ;;  %v2177_v7 = vunpack.c.h.s8.bf16 %v1409_v18  ;;  %v2002_v50 = vunpack.c.h.s8.bf16 %v1322_v8 }
 0x243   :  { %3137 = vmatprep.subr.bf16.mxu0 %v2050_v3  ;;  %3168 = vmatprep.subr.bf16.mxu1 %v2090_v57  ;;  %v1321_v3 = vld [vmem:[#allocation7 + $0x510] sm:$0xff]  ;;  %v1402_v57 = vld [vmem:[#allocation7 + $0x798] sm:$0xff] }
 0x244   :  { %v2001_v63 = vunpack.c.h.s8.bf16 %v1321_v3  ;;  %v1993_v39 = vunpack.c.l.s8.bf16 %v1321_v3  ;;  %v2217_v3 = vunpack.c.l.s8.bf16 %v1433_v61 }
 0x246   :  { %3138 = vmatpush2.bf16.msra.mxu0 %v2049_v34  ;;  %3169 = vmatpush1.bf16.msra.mxu1 %v2089_v31  ;;  %v1994_v34 = vunpack.c.l.s8.bf16 %v1322_v8  ;;  %v2162_v31 = vunpack.c.h.s8.bf16 %v1402_v57 }
 0x247   :  { %3139 = vmatprep.subr.bf16.mxu0 %v2042_v32  ;;  %3170 = vmatprep.subr.bf16.mxu1 %v2082_v16  ;;  %v1401_v32 = vld [vmem:[#allocation7 + $0x790] sm:$0xff]  ;;  %v1442_v16 = vld [vmem:[#allocation7 + $0x8d8] sm:$0xff] }
 0x248   :  { %v2161_v26 = vunpack.c.h.s8.bf16 %v1401_v32  ;;  %v2153_v15 = vunpack.c.l.s8.bf16 %v1401_v32 }
 0x24a   :  { %3140 = vmatpush2.bf16.msra.mxu0 %v2041_v28  ;;  %3171 = vmatpush1.bf16.msra.mxu1 %v2081_v43  ;;  %v2154_v28 = vunpack.c.l.s8.bf16 %v1402_v57  ;;  %v2242_v43 = vunpack.c.h.s8.bf16 %v1442_v16 }
 0x24b   :  { %3141 = vmatprep.subr.bf16.mxu0 %v2034_v0  ;;  %3172 = vmatprep.subr.bf16.mxu1 %v2074_v51  ;;  %v1441_v0 = vld [vmem:[#allocation7 + $0x8d0] sm:$0xff]  ;;  %v1394_v51 = vld [vmem:[#allocation7 + $0x758] sm:$0xff] }
 0x24c   :  { %v2241_v47 = vunpack.c.h.s8.bf16 %v1441_v0 }
 0x24e   :  { %3142 = vmatpush2.bf16.msra.mxu0 %v2033_v37  ;;  %3173 = vmatpush1.bf16.msra.mxu1 %v2073_v48  ;;  %v2146_v37 = vunpack.c.h.s8.bf16 %v1394_v51  ;;  %v1393_v48 = vld [vmem:[#allocation7 + $0x750] sm:$0xff] }
 0x24f   :  { %3143 = vmatprep.subr.bf16.mxu0 %v2026_v53  ;;  %3174 = vmatprep.subr.bf16.mxu1 %v2066_v23  ;;  %v2234_v53 = vunpack.c.l.s8.bf16 %v1442_v16  ;;  %v1434_v23 = vld [vmem:[#allocation7 + $0x898] sm:$0xff] }
 0x250   :  { %v2226_v59 = vunpack.c.h.s8.bf16 %v1434_v23 }
 0x252   :  { %3144 = vmatpush2.bf16.msra.mxu0 %v2025_v11  ;;  %3175 = vmatpush1.bf16.msra.mxu1 %v2065_v35  ;;  %v2145_v11 = vunpack.c.h.s8.bf16 %v1393_v48  ;;  %v2233_v35 = vunpack.c.l.s8.bf16 %v1441_v0 }
 0x253   :  { %3145 = vmatprep.subr.bf16.mxu0 %v2018_v56  ;;  %3176 = vmatprep.subr.bf16.mxu1 %v2058_v58  ;;  %v2138_v58 = vunpack.c.l.s8.bf16 %v1394_v51  ;;  %v1417_v51 = vld [vmem:[#allocation7 + $0x810] sm:$0xff] }
 0x256   :  { %3146 = vmatpush2.bf16.msra.mxu0 %v2017_v36  ;;  %3177 = vmatpush1.bf16.msra.mxu1 %v2057_v20  ;;  %v1386_v20 = vld [vmem:[#allocation7 + $0x718] sm:$0xff] }
 0x257   :  { %3147 = vmatprep.subr.bf16.mxu0 %v2010_v46  ;;  %3178 = vmatprep.subr.bf16.mxu1 %v2178_v17  ;;  %v2137_v17 = vunpack.c.l.s8.bf16 %v1393_v48  ;;  %v2130_v8 = vunpack.c.h.s8.bf16 %v1386_v20 }
 0x25a   :  { %3148 = vmatpush2.bf16.msra.mxu0 %v2009_v19  ;;  %3179 = vmatpush2.bf16.msra.mxu1 %v2177_v7  ;;  %v2218_v19 = vunpack.c.l.s8.bf16 %v1434_v23  ;;  %v1385_v7 = vld [vmem:[#allocation7 + $0x710] sm:$0xff] }
 0x25b   :  { %3149 = vmatprep.subr.bf16.mxu0 %v2002_v50  ;;  %3180 = vmatprep.subr.bf16.mxu1 %v2170_v2  ;;  %v1426_v50 = vld [vmem:[#allocation7 + $0x858] sm:$0xff]  ;;  %v2129_v2 = vunpack.c.h.s8.bf16 %v1385_v7 }
 0x25c   :  { %v2210_v57 = vunpack.c.h.s8.bf16 %v1426_v50  ;;  %v2202_v32 = vunpack.c.l.s8.bf16 %v1426_v50 }
 0x25e   :  { %3150 = vmatpush2.bf16.msra.mxu0 %v2001_v63  ;;  %3181 = vmatpush2.bf16.msra.mxu1 %v2169_v4  ;;  %v1425_v63 = vld [vmem:[#allocation7 + $0x850] sm:$0xff]  ;;  %v1506_v4 = vld [vmem:[#allocation7 + $0xad8] sm:$0xff] }
 0x25f   :  { %3151 = vmatprep.subr.bf16.mxu0 %v1994_v34  ;;  %3182 = vmatprep.subr.bf16.mxu1 %v2162_v31  ;;  %v2121_v34 = vunpack.c.l.s8.bf16 %v1385_v7  ;;  %v2209_v31 = vunpack.c.h.s8.bf16 %v1425_v63  ;;  %v2370_v16 = vunpack.c.h.s8.bf16 %v1506_v4 }
 0x262   :  { %3152 = vmatpush2.bf16.msra.mxu0 %v1993_v39  ;;  %3183 = vmatpush2.bf16.msra.mxu1 %v2161_v26  ;;  %v1505_v39 = vld [vmem:[#allocation7 + $0xad0] sm:$0xff]  ;;  %v1418_v26 = vld [vmem:[#allocation7 + $0x818] sm:$0xff] }
 0x263   :  { %3184 = vmatprep.subr.bf16.mxu1 %v2154_v28  ;;  %3203 = vmatprep.subr.bf16.mxu0 %v2242_v43  ;;  %v2201_v28 = vunpack.c.l.s8.bf16 %v1425_v63  ;;  %v2369_v43 = vunpack.c.h.s8.bf16 %v1505_v39  ;;  %v2194_v0 = vunpack.c.h.s8.bf16 %v1418_v26  ;;  %v2361_v23 = vunpack.c.l.s8.bf16 %v1505_v39 }
 0x265   :  { %v2909_v24 = vpop.f32.mrf.mxu0  ;;  %3154 = vmatmul.mubr.bf16.vlgmr.msra.gmra.mxu0 %v5427_v42 }
 0x266   :  { %v2910_v10 = vadd.f32 %v2909_v24, %v5506_v22  ;;  %3185 = vmatpush2.bf16.msra.mxu1 %v2153_v15  ;;  %3204 = vmatpush1.bf16.msra.mxu0 %v2241_v47  ;;  %v2225_v22 = vunpack.c.h.s8.bf16 %v1433_v61  ;;  %v2362_v15 = vunpack.c.l.s8.bf16 %v1506_v4  ;;  %v1498_v47 = vld [vmem:[#allocation7 + $0xa98] sm:$0xff] }
 0x267   :  { %3235 = vmatprep.mubr.bf16.mxu0 %v5432_v52  ;;  %v2911_v56 = vpop.f32.mrf.mxu0  ;;  %3186 = vmatprep.subr.bf16.mxu1 %v2146_v37 }
 0x268   :  { %v2912_v36 = vadd.f32 %v2911_v56, %v5509_v40  ;;  %3205 = vmatprep.subr.bf16.mxu0 %v2234_v53  ;;  %v2122_v40 = vunpack.c.l.s8.bf16 %v1386_v20  ;;  %v2193_v53 = vunpack.c.h.s8.bf16 %v1417_v51  ;;  %v1497_v56 = vld [vmem:[#allocation7 + $0xa90] sm:$0xff] }
 0x269   :  { %v2913_v46 = vpop.f32.mrf.mxu0  ;;  %v2353_v20 = vunpack.c.h.s8.bf16 %v1497_v56  ;;  %v2345_v7 = vunpack.c.l.s8.bf16 %v1497_v56  ;;  %v1537_v56 = vld [vmem:[#allocation7 + $0xbd0] sm:$0xff] }
 0x26a   :  { %3187 = vmatpush2.bf16.msra.mxu1 %v2145_v11  ;;  %3206 = vmatpush1.bf16.msra.mxu0 %v2233_v35  ;;  %v2186_v11 = vunpack.c.l.s8.bf16 %v1418_v26  ;;  %v2354_v35 = vunpack.c.h.s8.bf16 %v1498_v47 }
 0x26b   :  { %v2914_v18 = vpop.f32.mrf.mxu0  ;;  %3188 = vmatprep.subr.bf16.mxu1 %v2138_v58  ;;  %3207 = vmatprep.subr.bf16.mxu0 %v2226_v59  ;;  %v1474_v59 = vld [vmem:[#allocation7 + $0x9d8] sm:$0xff] }
 0x26c   :  { %v1473_v18 = vld [vmem:[#allocation7 + $0x9d0] sm:$0xff] }
 0x26e   :  { %3189 = vmatpush2.bf16.msra.mxu1 %v2137_v17  ;;  %3208 = vmatpush1.bf16.msra.mxu0 %v2225_v22  ;;  %v2306_v17 = vunpack.c.h.s8.bf16 %v1474_v59  ;;  %v2346_v22 = vunpack.c.l.s8.bf16 %v1498_v47 }
 0x26f   :  { %3190 = vmatprep.subr.bf16.mxu1 %v2130_v8  ;;  %3209 = vmatprep.subr.bf16.mxu0 %v2218_v19  ;;  %v1490_v8 = vld [vmem:[#allocation7 + $0xa58] sm:$0xff]  ;;  %v2305_v19 = vunpack.c.h.s8.bf16 %v1473_v18 }
 0x270   :  { %v2338_v50 = vunpack.c.h.s8.bf16 %v1490_v8  ;;  %v2330_v4 = vunpack.c.l.s8.bf16 %v1490_v8  ;;  %v2425_v8 = vunpack.c.l.s8.bf16 %v1537_v56 }
 0x272   :  { %3191 = vmatpush2.bf16.msra.mxu1 %v2129_v2  ;;  %3210 = vmatpush1.bf16.msra.mxu0 %v2217_v3  ;;  %v1489_v2 = vld [vmem:[#allocation7 + $0xa50] sm:$0xff]  ;;  %v1466_v3 = vld [vmem:[#allocation7 + $0x998] sm:$0xff] }
 0x273   :  { %3192 = vmatprep.subr.bf16.mxu1 %v2122_v40  ;;  %3211 = vmatprep.subr.bf16.mxu0 %v2210_v57  ;;  %v2297_v40 = vunpack.c.l.s8.bf16 %v1473_v18  ;;  %v2337_v57 = vunpack.c.h.s8.bf16 %v1489_v2  ;;  %v2290_v63 = vunpack.c.h.s8.bf16 %v1466_v3  ;;  %v2282_v39 = vunpack.c.l.s8.bf16 %v1466_v3 }
 0x276   :  { %3193 = vmatpush2.bf16.msra.mxu1 %v2121_v34  ;;  %3212 = vmatpush1.bf16.msra.mxu0 %v2209_v31  ;;  %v1465_v34 = vld [vmem:[#allocation7 + $0x990] sm:$0xff]  ;;  %v1482_v31 = vld [vmem:[#allocation7 + $0xa18] sm:$0xff] }
 0x277   :  { %3213 = vmatprep.subr.bf16.mxu0 %v2202_v32  ;;  %3244 = vmatprep.subr.bf16.mxu1 %v2370_v16  ;;  %v2289_v32 = vunpack.c.h.s8.bf16 %v1465_v34  ;;  %v2329_v16 = vunpack.c.l.s8.bf16 %v1489_v2  ;;  %v2322_v26 = vunpack.c.h.s8.bf16 %v1482_v31  ;;  %v2314_v47 = vunpack.c.l.s8.bf16 %v1482_v31 }
 0x279   :  { %v2950_v37 = vpop.f32.mrf.mxu1  ;;  %3195 = vmatmul.mubr.bf16.vlgmr.msra.gmra.mxu1 %v5458_v55 }
 0x27a   :  { %v5516_v48 = vadd.f32 %v2950_v37, %v2910_v10  ;;  %3214 = vmatpush1.bf16.msra.mxu0 %v2201_v28  ;;  %3245 = vmatpush1.bf16.msra.mxu1 %v2369_v43  ;;  %v2185_v10 = vunpack.c.l.s8.bf16 %v1417_v51  ;;  %v1481_v28 = vld [vmem:[#allocation7 + $0xa10] sm:$0xff]  ;;  %v1458_v43 = vld [vmem:[#allocation7 + $0x958] sm:$0xff] }
 0x27b   :  { %3276 = vmatprep.mubr.bf16.mxu1 %v5460_v30  ;;  %v2952_v24 = vpop.f32.mrf.mxu1  ;;  %3215 = vmatprep.subr.bf16.mxu0 %v2194_v0  ;;  %v2281_v0 = vunpack.c.l.s8.bf16 %v1465_v34  ;;  %v2321_v51 = vunpack.c.h.s8.bf16 %v1481_v28  ;;  %v1457_v37 = vld [vmem:[#allocation7 + $0x950] sm:$0xff] }
 0x27c   :  { %v5519_v58 = vadd.f32 %v2952_v24, %v2912_v36  ;;  %3246 = vmatprep.subr.bf16.mxu1 %v2362_v15  ;;  %v2298_v36 = vunpack.c.l.s8.bf16 %v1474_v59  ;;  %v2274_v15 = vunpack.c.h.s8.bf16 %v1458_v43  ;;  %v2313_v24 = vunpack.c.l.s8.bf16 %v1481_v28  ;;  %v1450_v59 = vld [vmem:[#allocation7 + $0x918] sm:$0xff] }
 0x27d   :  { %v2954_v61 = vpop.f32.mrf.mxu1 }
 0x27e   :  { %3216 = vmatpush1.bf16.msra.mxu0 %v2193_v53  ;;  %3247 = vmatpush1.bf16.msra.mxu1 %v2361_v23  ;;  %v1538_v53 = vld [vmem:[#allocation7 + $0xbd8] sm:$0xff]  ;;  %v2273_v23 = vunpack.c.h.s8.bf16 %v1457_v37  ;;  %v2265_v61 = vunpack.c.l.s8.bf16 %v1457_v37 }
 0x27f   :  { %v2955_v46 = vpop.f32.mrf.mxu1  ;;  %3217 = vmatprep.subr.bf16.mxu0 %v2186_v11  ;;  %3248 = vmatprep.subr.bf16.mxu1 %v2354_v35  ;;  %v2266_v11 = vunpack.c.l.s8.bf16 %v1458_v43  ;;  %v2434_v35 = vunpack.c.h.s8.bf16 %v1538_v53 }
 0x280   :  { %v2426_v46 = vunpack.c.l.s8.bf16 %v1538_v53  ;;  %v1561_v53 = vld [vmem:[#allocation7 + $0xc90] sm:$0xff] }
 0x282   :  { %3218 = vmatpush1.bf16.msra.mxu0 %v2185_v10  ;;  %3249 = vmatpush1.bf16.msra.mxu1 %v2353_v20  ;;  %v2433_v10 = vunpack.c.h.s8.bf16 %v1537_v56  ;;  %v2258_v20 = vunpack.c.h.s8.bf16 %v1450_v59 }
 0x283   :  { %3219 = vmatprep.subr.bf16.mxu0 %v2306_v17  ;;  %3250 = vmatprep.subr.bf16.mxu1 %v2346_v22  ;;  %v1449_v17 = vld [vmem:[#allocation7 + $0x910] sm:$0xff]  ;;  %v1530_v22 = vld [vmem:[#allocation7 + $0xb98] sm:$0xff] }
 0x284   :  { %v2257_v18 = vunpack.c.h.s8.bf16 %v1449_v17  ;;  %v2249_v2 = vunpack.c.l.s8.bf16 %v1449_v17  ;;  %v2473_v17 = vunpack.c.l.s8.bf16 %v1561_v53 }
 0x286   :  { %3220 = vmatpush2.bf16.msra.mxu0 %v2305_v19  ;;  %3251 = vmatpush1.bf16.msra.mxu1 %v2345_v7  ;;  %v2250_v19 = vunpack.c.l.s8.bf16 %v1450_v59  ;;  %v2418_v7 = vunpack.c.h.s8.bf16 %v1530_v22 }
 0x287   :  { %3221 = vmatprep.subr.bf16.mxu0 %v2298_v36  ;;  %3252 = vmatprep.subr.bf16.mxu1 %v2338_v50  ;;  %v1529_v36 = vld [vmem:[#allocation7 + $0xb90] sm:$0xff]  ;;  %v1570_v50 = vld [vmem:[#allocation7 + $0xcd8] sm:$0xff] }
 0x288   :  { %v2417_v3 = vunpack.c.h.s8.bf16 %v1529_v36  ;;  %v2409_v34 = vunpack.c.l.s8.bf16 %v1529_v36 }
 0x28a   :  { %3222 = vmatpush2.bf16.msra.mxu0 %v2297_v40  ;;  %3253 = vmatpush1.bf16.msra.mxu1 %v2337_v57  ;;  %v2410_v40 = vunpack.c.l.s8.bf16 %v1530_v22  ;;  %v2498_v57 = vunpack.c.h.s8.bf16 %v1570_v50 }
 0x28b   :  { %3223 = vmatprep.subr.bf16.mxu0 %v2290_v63  ;;  %3254 = vmatprep.subr.bf16.mxu1 %v2330_v4  ;;  %v1569_v63 = vld [vmem:[#allocation7 + $0xcd0] sm:$0xff]  ;;  %v1522_v4 = vld [vmem:[#allocation7 + $0xb58] sm:$0xff] }
 0x28c   :  { %v2497_v31 = vunpack.c.h.s8.bf16 %v1569_v63 }
 0x28e   :  { %3224 = vmatpush2.bf16.msra.mxu0 %v2289_v32  ;;  %3255 = vmatpush1.bf16.msra.mxu1 %v2329_v16  ;;  %v2402_v32 = vunpack.c.h.s8.bf16 %v1522_v4  ;;  %v1521_v16 = vld [vmem:[#allocation7 + $0xb50] sm:$0xff] }
 0x28f   :  { %3225 = vmatprep.subr.bf16.mxu0 %v2282_v39  ;;  %3256 = vmatprep.subr.bf16.mxu1 %v2322_v26  ;;  %v2490_v39 = vunpack.c.l.s8.bf16 %v1570_v50  ;;  %v1562_v26 = vld [vmem:[#allocation7 + $0xc98] sm:$0xff] }
 0x290   :  { %v2482_v37 = vunpack.c.h.s8.bf16 %v1562_v26 }
 0x292   :  { %3226 = vmatpush2.bf16.msra.mxu0 %v2281_v0  ;;  %3257 = vmatpush1.bf16.msra.mxu1 %v2321_v51  ;;  %v2401_v0 = vunpack.c.h.s8.bf16 %v1521_v16  ;;  %v2489_v51 = vunpack.c.l.s8.bf16 %v1569_v63 }
 0x293   :  { %3227 = vmatprep.subr.bf16.mxu0 %v2274_v15  ;;  %3258 = vmatprep.subr.bf16.mxu1 %v2314_v47  ;;  %v2394_v47 = vunpack.c.l.s8.bf16 %v1522_v4  ;;  %v1545_v4 = vld [vmem:[#allocation7 + $0xc10] sm:$0xff] }
 0x296   :  { %3228 = vmatpush2.bf16.msra.mxu0 %v2273_v23  ;;  %3259 = vmatpush1.bf16.msra.mxu1 %v2313_v24  ;;  %v1514_v24 = vld [vmem:[#allocation7 + $0xb18] sm:$0xff] }
 0x297   :  { %3229 = vmatprep.subr.bf16.mxu0 %v2266_v11  ;;  %3260 = vmatprep.subr.bf16.mxu1 %v2434_v35  ;;  %v2393_v35 = vunpack.c.l.s8.bf16 %v1521_v16  ;;  %v2386_v59 = vunpack.c.h.s8.bf16 %v1514_v24 }
 0x29a   :  { %3230 = vmatpush2.bf16.msra.mxu0 %v2265_v61  ;;  %3261 = vmatpush2.bf16.msra.mxu1 %v2433_v10  ;;  %v2474_v61 = vunpack.c.l.s8.bf16 %v1562_v26  ;;  %v1513_v10 = vld [vmem:[#allocation7 + $0xb10] sm:$0xff] }
 0x29b   :  { %3231 = vmatprep.subr.bf16.mxu0 %v2258_v20  ;;  %3262 = vmatprep.subr.bf16.mxu1 %v2426_v46  ;;  %v1554_v20 = vld [vmem:[#allocation7 + $0xc58] sm:$0xff]  ;;  %v2385_v46 = vunpack.c.h.s8.bf16 %v1513_v10 }
 0x29c   :  { %v2466_v22 = vunpack.c.h.s8.bf16 %v1554_v20  ;;  %v2458_v36 = vunpack.c.l.s8.bf16 %v1554_v20 }
 0x29e   :  { %3232 = vmatpush2.bf16.msra.mxu0 %v2257_v18  ;;  %3263 = vmatpush2.bf16.msra.mxu1 %v2425_v8  ;;  %v1553_v18 = vld [vmem:[#allocation7 + $0xc50] sm:$0xff]  ;;  %v1634_v8 = vld [vmem:[#allocation7 + $0xed8] sm:$0xff] }
 0x29f   :  { %3233 = vmatprep.subr.bf16.mxu0 %v2250_v19  ;;  %3264 = vmatprep.subr.bf16.mxu1 %v2418_v7  ;;  %v2377_v19 = vunpack.c.l.s8.bf16 %v1513_v10  ;;  %v2465_v7 = vunpack.c.h.s8.bf16 %v1553_v18  ;;  %v2626_v50 = vunpack.c.h.s8.bf16 %v1634_v8 }
 0x2a2   :  { %3234 = vmatpush2.bf16.msra.mxu0 %v2249_v2  ;;  %3265 = vmatpush2.bf16.msra.mxu1 %v2417_v3  ;;  %v1633_v2 = vld [vmem:[#allocation7 + $0xed0] sm:$0xff]  ;;  %v1546_v3 = vld [vmem:[#allocation7 + $0xc18] sm:$0xff] }
 0x2a3   :  { %3266 = vmatprep.subr.bf16.mxu1 %v2410_v40  ;;  %3285 = vmatprep.subr.bf16.mxu0 %v2498_v57  ;;  %v2457_v40 = vunpack.c.l.s8.bf16 %v1553_v18  ;;  %v2625_v57 = vunpack.c.h.s8.bf16 %v1633_v2  ;;  %v2450_v63 = vunpack.c.h.s8.bf16 %v1546_v3  ;;  %v2617_v26 = vunpack.c.l.s8.bf16 %v1633_v2 }
 0x2a5   :  { %v2991_v28 = vpop.f32.mrf.mxu0  ;;  %3236 = vmatmul.mubr.bf16.vlgmr.msra.gmra.mxu0 %v5470_v21 }
 0x2a6   :  { %v2992_v43 = vadd.f32 %v2991_v28, %v5516_v48  ;;  %3267 = vmatpush2.bf16.msra.mxu1 %v2409_v34  ;;  %3286 = vmatpush1.bf16.msra.mxu0 %v2497_v31  ;;  %v2481_v48 = vunpack.c.h.s8.bf16 %v1561_v53  ;;  %v2618_v34 = vunpack.c.l.s8.bf16 %v1634_v8  ;;  %v1626_v31 = vld [vmem:[#allocation7 + $0xe98] sm:$0xff] }
 0x2a7   :  { %3317 = vmatprep.mubr.bf16.mxu0 %v5472_v25  ;;  %v2993_v15 = vpop.f32.mrf.mxu0  ;;  %3268 = vmatprep.subr.bf16.mxu1 %v2402_v32 }
 0x2a8   :  { %v2994_v23 = vadd.f32 %v2993_v15, %v5519_v58  ;;  %3287 = vmatprep.subr.bf16.mxu0 %v2490_v39  ;;  %v2378_v58 = vunpack.c.l.s8.bf16 %v1514_v24  ;;  %v2449_v39 = vunpack.c.h.s8.bf16 %v1545_v4  ;;  %v1625_v15 = vld [vmem:[#allocation7 + $0xe90] sm:$0xff] }
 0x2a9   :  { %v2995_v11 = vpop.f32.mrf.mxu0  ;;  %v2609_v24 = vunpack.c.h.s8.bf16 %v1625_v15  ;;  %v2601_v10 = vunpack.c.l.s8.bf16 %v1625_v15  ;;  %v1665_v15 = vld [vmem:[#allocation7 + $0xfd0] sm:$0xff] }
 0x2aa   :  { %3269 = vmatpush2.bf16.msra.mxu1 %v2401_v0  ;;  %3288 = vmatpush1.bf16.msra.mxu0 %v2489_v51  ;;  %v2442_v0 = vunpack.c.l.s8.bf16 %v1546_v3  ;;  %v2610_v51 = vunpack.c.h.s8.bf16 %v1626_v31 }
 0x2ab   :  { %v2996_v56 = vpop.f32.mrf.mxu0  ;;  %3270 = vmatprep.subr.bf16.mxu1 %v2394_v47  ;;  %3289 = vmatprep.subr.bf16.mxu0 %v2482_v37  ;;  %v1602_v37 = vld [vmem:[#allocation7 + $0xdd8] sm:$0xff] }
 0x2ac   :  { %v1601_v56 = vld [vmem:[#allocation7 + $0xdd0] sm:$0xff] }
 0x2ae   :  { %3271 = vmatpush2.bf16.msra.mxu1 %v2393_v35  ;;  %3290 = vmatpush1.bf16.msra.mxu0 %v2481_v48  ;;  %v2562_v35 = vunpack.c.h.s8.bf16 %v1602_v37  ;;  %v2602_v48 = vunpack.c.l.s8.bf16 %v1626_v31 }
 0x2af   :  { %3272 = vmatprep.subr.bf16.mxu1 %v2386_v59  ;;  %3291 = vmatprep.subr.bf16.mxu0 %v2474_v61  ;;  %v1618_v59 = vld [vmem:[#allocation7 + $0xe58] sm:$0xff]  ;;  %v2561_v61 = vunpack.c.h.s8.bf16 %v1601_v56 }
 0x2b0   :  { %v2594_v20 = vunpack.c.h.s8.bf16 %v1618_v59  ;;  %v2586_v8 = vunpack.c.l.s8.bf16 %v1618_v59  ;;  %v2681_v59 = vunpack.c.l.s8.bf16 %v1665_v15 }
 0x2b2   :  { %3273 = vmatpush2.bf16.msra.mxu1 %v2385_v46  ;;  %3292 = vmatpush1.bf16.msra.mxu0 %v2473_v17  ;;  %v1617_v46 = vld [vmem:[#allocation7 + $0xe50] sm:$0xff]  ;;  %v1594_v17 = vld [vmem:[#allocation7 + $0xd98] sm:$0xff] }
 0x2b3   :  { %3274 = vmatprep.subr.bf16.mxu1 %v2378_v58  ;;  %3293 = vmatprep.subr.bf16.mxu0 %v2466_v22  ;;  %v2553_v58 = vunpack.c.l.s8.bf16 %v1601_v56  ;;  %v2593_v22 = vunpack.c.h.s8.bf16 %v1617_v46  ;;  %v2546_v18 = vunpack.c.h.s8.bf16 %v1594_v17  ;;  %v2538_v2 = vunpack.c.l.s8.bf16 %v1594_v17 }
 0x2b6   :  { %3275 = vmatpush2.bf16.msra.mxu1 %v2377_v19  ;;  %3294 = vmatpush1.bf16.msra.mxu0 %v2465_v7  ;;  %v1593_v19 = vld [vmem:[#allocation7 + $0xd90] sm:$0xff]  ;;  %v1610_v7 = vld [vmem:[#allocation7 + $0xe18] sm:$0xff] }
 0x2b7   :  { %3295 = vmatprep.subr.bf16.mxu0 %v2458_v36  ;;  %3326 = vmatprep.subr.bf16.mxu1 %v2626_v50  ;;  %v2545_v36 = vunpack.c.h.s8.bf16 %v1593_v19  ;;  %v2585_v50 = vunpack.c.l.s8.bf16 %v1617_v46  ;;  %v2578_v3 = vunpack.c.h.s8.bf16 %v1610_v7  ;;  %v2570_v31 = vunpack.c.l.s8.bf16 %v1610_v7 }
 0x2b9   :  { %v3032_v32 = vpop.f32.mrf.mxu1  ;;  %3277 = vmatmul.mubr.bf16.vlgmr.msra.gmra.mxu1 %v5478_v13 }
 0x2ba   :  { %v5526_v16 = vadd.f32 %v3032_v32, %v2992_v43  ;;  %3296 = vmatpush1.bf16.msra.mxu0 %v2457_v40  ;;  %3327 = vmatpush1.bf16.msra.mxu1 %v2625_v57  ;;  %v2441_v43 = vunpack.c.l.s8.bf16 %v1545_v4  ;;  %v1609_v40 = vld [vmem:[#allocation7 + $0xe10] sm:$0xff]  ;;  %v1586_v57 = vld [vmem:[#allocation7 + $0xd58] sm:$0xff] }
 0x2bb   :  { %3358 = vmatprep.mubr.bf16.mxu1 %v5480_v62  ;;  %v3034_v28 = vpop.f32.mrf.mxu1  ;;  %3297 = vmatprep.subr.bf16.mxu0 %v2450_v63  ;;  %v2537_v63 = vunpack.c.l.s8.bf16 %v1593_v19  ;;  %v2577_v4 = vunpack.c.h.s8.bf16 %v1609_v40  ;;  %v1585_v32 = vld [vmem:[#allocation7 + $0xd50] sm:$0xff] }
 0x2bc   :  { %v5529_v47 = vadd.f32 %v3034_v28, %v2994_v23  ;;  %3328 = vmatprep.subr.bf16.mxu1 %v2618_v34  ;;  %v2554_v23 = vunpack.c.l.s8.bf16 %v1602_v37  ;;  %v2530_v34 = vunpack.c.h.s8.bf16 %v1586_v57  ;;  %v2569_v28 = vunpack.c.l.s8.bf16 %v1609_v40  ;;  %v1578_v37 = vld [vmem:[#allocation7 + $0xd18] sm:$0xff] }
 0x2bd   :  { %v3036_v53 = vpop.f32.mrf.mxu1 }
 0x2be   :  { %3298 = vmatpush1.bf16.msra.mxu0 %v2449_v39  ;;  %3329 = vmatpush1.bf16.msra.mxu1 %v2617_v26  ;;  %v1666_v39 = vld [vmem:[#allocation7 + $0xfd8] sm:$0xff]  ;;  %v2529_v26 = vunpack.c.h.s8.bf16 %v1585_v32  ;;  %v2521_v53 = vunpack.c.l.s8.bf16 %v1585_v32  ;;  %v1179_v32 = vld [vmem:[#allocation7 + $0xa0] sm:$0xff] }
 0x2bf   :  { %v3037_v11 = vpop.f32.mrf.mxu1  ;;  %3299 = vmatprep.subr.bf16.mxu0 %v2442_v0  ;;  %3330 = vmatprep.subr.bf16.mxu1 %v2610_v51  ;;  %v2522_v0 = vunpack.c.l.s8.bf16 %v1586_v57  ;;  %v2690_v51 = vunpack.c.h.s8.bf16 %v1666_v39 }
 0x2c0   :  { %v2682_v11 = vunpack.c.l.s8.bf16 %v1666_v39  ;;  %v1642_v39 = vld [vmem:[#allocation7 + $0xf18] sm:$0xff] }
 0x2c2   :  { %3300 = vmatpush1.bf16.msra.mxu0 %v2441_v43  ;;  %3331 = vmatpush1.bf16.msra.mxu1 %v2609_v24  ;;  %v2689_v43 = vunpack.c.h.s8.bf16 %v1665_v15  ;;  %v2514_v24 = vunpack.c.h.s8.bf16 %v1578_v37  ;;  %v2642_v15 = vunpack.c.h.s8.bf16 %v1642_v39 }
 0x2c3   :  { %3301 = vmatprep.subr.bf16.mxu0 %v2562_v35  ;;  %3332 = vmatprep.subr.bf16.mxu1 %v2602_v48  ;;  %v1577_v35 = vld [vmem:[#allocation7 + $0xd10] sm:$0xff]  ;;  %v1658_v48 = vld [vmem:[#allocation7 + $0xf98] sm:$0xff] }
 0x2c4   :  { %v2513_v56 = vunpack.c.h.s8.bf16 %v1577_v35  ;;  %v2505_v46 = vunpack.c.l.s8.bf16 %v1577_v35  ;;  %v2634_v35 = vunpack.c.l.s8.bf16 %v1642_v39  ;;  %v1220_v39 = vld [vmem:[#allocation7 + $0x1e8] sm:$0xff] }
 0x2c6   :  { %3302 = vmatpush2.bf16.msra.mxu0 %v2561_v61  ;;  %3333 = vmatpush1.bf16.msra.mxu1 %v2601_v10  ;;  %v2506_v61 = vunpack.c.l.s8.bf16 %v1578_v37  ;;  %v2674_v10 = vunpack.c.h.s8.bf16 %v1658_v48 }
 0x2c7   :  { %3303 = vmatprep.subr.bf16.mxu0 %v2554_v23  ;;  %3334 = vmatprep.subr.bf16.mxu1 %v2594_v20  ;;  %v1657_v23 = vld [vmem:[#allocation7 + $0xf90] sm:$0xff]  ;;  %v1188_v20 = vld [vmem:[#allocation7 + $0xe8] sm:$0xff] }
 0x2c8   :  { %v2673_v17 = vunpack.c.h.s8.bf16 %v1657_v23  ;;  %v2665_v19 = vunpack.c.l.s8.bf16 %v1657_v23 }
 0x2ca   :  { %3304 = vmatpush2.bf16.msra.mxu0 %v2553_v58  ;;  %3335 = vmatpush1.bf16.msra.mxu1 %v2593_v22  ;;  %v2666_v58 = vunpack.c.l.s8.bf16 %v1658_v48  ;;  %v1732_v22 = vunpack.c.h.s8.bf16 %v1188_v20 }
 0x2cb   :  { %3305 = vmatprep.subr.bf16.mxu0 %v2546_v18  ;;  %3336 = vmatprep.subr.bf16.mxu1 %v2586_v8  ;;  %v1187_v18 = vld [vmem:[#allocation7 + $0xe0] sm:$0xff]  ;;  %v1650_v8 = vld [vmem:[#allocation7 + $0xf58] sm:$0xff] }
 0x2cc   :  { %v1731_v7 = vunpack.c.h.s8.bf16 %v1187_v18 }
 0x2ce   :  { %3306 = vmatpush2.bf16.msra.mxu0 %v2545_v36  ;;  %3337 = vmatpush1.bf16.msra.mxu1 %v2585_v50  ;;  %v2658_v36 = vunpack.c.h.s8.bf16 %v1650_v8  ;;  %v1649_v50 = vld [vmem:[#allocation7 + $0xf50] sm:$0xff] }
 0x2cf   :  { %3307 = vmatprep.subr.bf16.mxu0 %v2538_v2  ;;  %3338 = vmatprep.subr.bf16.mxu1 %v2578_v3  ;;  %v1724_v2 = vunpack.c.l.s8.bf16 %v1188_v20  ;;  %v1180_v3 = vld [vmem:[#allocation7 + $0xa8] sm:$0xff]  ;;  %v2657_v57 = vunpack.c.h.s8.bf16 %v1649_v50 }
 0x2d0   :  { %v1708_v37 = vunpack.c.l.s8.bf16 %v1180_v3 }
 0x2d2   :  { %3308 = vmatpush2.bf16.msra.mxu0 %v2537_v63  ;;  %3339 = vmatpush1.bf16.msra.mxu1 %v2577_v4  ;;  %v1723_v63 = vunpack.c.l.s8.bf16 %v1187_v18 }
 0x2d3   :  { %3309 = vmatprep.subr.bf16.mxu0 %v2530_v34  ;;  %3340 = vmatprep.subr.bf16.mxu1 %v2570_v31  ;;  %v2650_v34 = vunpack.c.l.s8.bf16 %v1650_v8  ;;  %v1716_v31 = vunpack.c.h.s8.bf16 %v1180_v3  ;;  %v1163_v8 = vld [vmem:[#allocation7 + $0x20] sm:$0xff] }
 0x2d6   :  { %3310 = vmatpush2.bf16.msra.mxu0 %v2529_v26  ;;  %3341 = vmatpush1.bf16.msra.mxu1 %v2569_v28  ;;  %v2649_v28 = vunpack.c.l.s8.bf16 %v1649_v50 }
 0x2d7   :  { %3311 = vmatprep.subr.bf16.mxu0 %v2522_v0  ;;  %3342 = vmatprep.subr.bf16.mxu1 %v2690_v51  ;;  %v1715_v0 = vunpack.c.h.s8.bf16 %v1179_v32 }
 0x2da   :  { %3312 = vmatpush2.bf16.msra.mxu0 %v2521_v53  ;;  %3343 = vmatpush2.bf16.msra.mxu1 %v2689_v43  ;;  %v1641_v53 = vld [vmem:[#allocation7 + $0xf10] sm:$0xff]  ;;  %v1172_v43 = vld [vmem:[#allocation7 + $0x68] sm:$0xff] }
 0x2db   :  { %3313 = vmatprep.subr.bf16.mxu0 %v2514_v24  ;;  %3344 = vmatprep.subr.bf16.mxu1 %v2682_v11  ;;  %v2641_v24 = vunpack.c.h.s8.bf16 %v1641_v53  ;;  %v1707_v11 = vunpack.c.l.s8.bf16 %v1179_v32  ;;  %v1700_v48 = vunpack.c.h.s8.bf16 %v1172_v43  ;;  %v1692_v23 = vunpack.c.l.s8.bf16 %v1172_v43 }
 0x2de   :  { %3314 = vmatpush2.bf16.msra.mxu0 %v2513_v56  ;;  %3345 = vmatpush2.bf16.msra.mxu1 %v2681_v59  ;;  %v1171_v56 = vld [vmem:[#allocation7 + $0x60] sm:$0xff]  ;;  %v1252_v59 = vld [vmem:[#allocation7 + $0x2e8] sm:$0xff] }
 0x2df   :  { %3315 = vmatprep.subr.bf16.mxu0 %v2506_v61  ;;  %3346 = vmatprep.subr.bf16.mxu1 %v2674_v10  ;;  %v2633_v61 = vunpack.c.l.s8.bf16 %v1641_v53  ;;  %v1699_v10 = vunpack.c.h.s8.bf16 %v1171_v56  ;;  %v1860_v20 = vunpack.c.h.s8.bf16 %v1252_v59  ;;  %v1236_v53 = vld [vmem:[#allocation7 + $0x268] sm:$0xff] }
 0x2e2   :  { %3316 = vmatpush2.bf16.msra.mxu0 %v2505_v46  ;;  %3347 = vmatpush2.bf16.msra.mxu1 %v2673_v17  ;;  %v1251_v46 = vld [vmem:[#allocation7 + $0x2e0] sm:$0xff]  ;;  %v1164_v17 = vld [vmem:[#allocation7 + $0x28] sm:$0xff] }
 0x2e3   :  { %3348 = vmatprep.subr.bf16.mxu1 %v2666_v58  ;;  %3367 = vmatprep.subr.bf16.mxu0 %v1732_v22  ;;  %v1691_v58 = vunpack.c.l.s8.bf16 %v1171_v56  ;;  %v1859_v22 = vunpack.c.h.s8.bf16 %v1251_v46  ;;  %v1684_v18 = vunpack.c.h.s8.bf16 %v1164_v17  ;;  %v1851_v3 = vunpack.c.l.s8.bf16 %v1251_v46 }
 0x2e5   :  { %v3073_v40 = vpop.f32.mrf.mxu0  ;;  %3318 = vmatmul.mubr.bf16.vlgmr.msra.gmra.mxu0 %v5485_v54 }
 0x2e6   :  { %3349 = vmatpush2.bf16.msra.mxu1 %v2665_v19  ;;  %3368 = vmatpush1.bf16.msra.mxu0 %v1731_v7  ;;  %v1852_v19 = vunpack.c.l.s8.bf16 %v1252_v59  ;;  %v1244_v7 = vld [vmem:[#allocation7 + $0x2a8] sm:$0xff] }
 0x2e7   :  { %3399 = vmatprep.mubr.bf16.mxu0 %v5339_v41  ;;  %v3075_v4 = vpop.f32.mrf.mxu0  ;;  %3350 = vmatprep.subr.bf16.mxu1 %v2658_v36 }
 0x2e8   :  { %3369 = vmatprep.subr.bf16.mxu0 %v1724_v2  ;;  %v1683_v2 = vunpack.c.h.s8.bf16 %v1163_v8 }
 0x2e9   :  { %v3077_v26 = vpop.f32.mrf.mxu0 }
 0x2ea   :  { %3351 = vmatpush2.bf16.msra.mxu1 %v2657_v57  ;;  %3370 = vmatpush1.bf16.msra.mxu0 %v1723_v63  ;;  %v1676_v63 = vunpack.c.l.s8.bf16 %v1164_v17 }
 0x2eb   :  { %v3078_v51 = vpop.f32.mrf.mxu0  ;;  %3352 = vmatprep.subr.bf16.mxu1 %v2650_v34  ;;  %3371 = vmatprep.subr.bf16.mxu0 %v1716_v31  ;;  %v1844_v34 = vunpack.c.h.s8.bf16 %v1244_v7  ;;  %v1243_v31 = vld [vmem:[#allocation7 + $0x2a0] sm:$0xff] }
 0x2ec   :  { %v1796_v51 = vunpack.c.h.s8.bf16 %v1220_v39 }
 0x2ee   :  { %3353 = vmatpush2.bf16.msra.mxu1 %v2649_v28  ;;  %3372 = vmatpush1.bf16.msra.mxu0 %v1715_v0  ;;  %v1843_v28 = vunpack.c.h.s8.bf16 %v1243_v31 }
 0x2ef   :  { %3354 = vmatprep.subr.bf16.mxu1 %v2642_v15  ;;  %3373 = vmatprep.subr.bf16.mxu0 %v1708_v37  ;;  %v1836_v15 = vunpack.c.l.s8.bf16 %v1244_v7  ;;  %v1219_v37 = vld [vmem:[#allocation7 + $0x1e0] sm:$0xff] }
 0x2f0   :  { %v1795_v43 = vunpack.c.h.s8.bf16 %v1219_v37  ;;  %v1787_v56 = vunpack.c.l.s8.bf16 %v1219_v37  ;;  %v1195_v37 = vld [vmem:[#allocation7 + $0x120] sm:$0xff] }
 0x2f2   :  { %3355 = vmatpush2.bf16.msra.mxu1 %v2641_v24  ;;  %3374 = vmatpush1.bf16.msra.mxu0 %v1707_v11  ;;  %v1835_v24 = vunpack.c.l.s8.bf16 %v1243_v31  ;;  %v1828_v11 = vunpack.c.h.s8.bf16 %v1236_v53 }
 0x2f3   :  { %3356 = vmatprep.subr.bf16.mxu1 %v2634_v35  ;;  %3375 = vmatprep.subr.bf16.mxu0 %v1700_v48  ;;  %v1235_v35 = vld [vmem:[#allocation7 + $0x260] sm:$0xff]  ;;  %v1212_v48 = vld [vmem:[#allocation7 + $0x1a8] sm:$0xff] }
 0x2f4   :  { %v1827_v59 = vunpack.c.h.s8.bf16 %v1235_v35  ;;  %v1819_v17 = vunpack.c.l.s8.bf16 %v1235_v35  ;;  %v1275_v35 = vld [vmem:[#allocation7 + $0x3a0] sm:$0xff] }
 0x2f6   :  { %3357 = vmatpush2.bf16.msra.mxu1 %v2633_v61  ;;  %3376 = vmatpush1.bf16.msra.mxu0 %v1699_v10  ;;  %v1780_v61 = vunpack.c.h.s8.bf16 %v1212_v48  ;;  %v1820_v10 = vunpack.c.l.s8.bf16 %v1236_v53  ;;  %v1276_v53 = vld [vmem:[#allocation7 + $0x3a8] sm:$0xff] }
 0x2f7   :  { %3377 = vmatprep.subr.bf16.mxu0 %v1692_v23  ;;  %3408 = vmatprep.subr.bf16.mxu1 %v1860_v20  ;;  %v1211_v23 = vld [vmem:[#allocation7 + $0x1a0] sm:$0xff]  ;;  %v1228_v20 = vld [vmem:[#allocation7 + $0x228] sm:$0xff] }
 0x2f8   :  { %v1779_v46 = vunpack.c.h.s8.bf16 %v1211_v23 }
 0x2f9   :  { %v3114_v36 = vpop.f32.mrf.mxu1  ;;  %3359 = vmatmul.mubr.bf16.vlgmr.msra.gmra.mxu1 %v5492_v45 }
 0x2fa   :  { %v5534_v50 = vadd.f32 %v3114_v36, %v3073_v40  ;;  %3378 = vmatpush1.bf16.msra.mxu0 %v1691_v58  ;;  %3409 = vmatpush1.bf16.msra.mxu1 %v1859_v22  ;;  %v1675_v40 = vunpack.c.l.s8.bf16 %v1163_v8  ;;  %v1772_v58 = vunpack.c.l.s8.bf16 %v1212_v48  ;;  %v1812_v22 = vunpack.c.h.s8.bf16 %v1228_v20  ;;  %v1204_v8 = vld [vmem:[#allocation7 + $0x168] sm:$0xff] }
 0x2fb   :  { %3440 = vmatprep.mubr.bf16.mxu1 %v5367_v5  ;;  %v3116_v57 = vpop.f32.mrf.mxu1  ;;  %3379 = vmatprep.subr.bf16.mxu0 %v1684_v18  ;;  %v1227_v18 = vld [vmem:[#allocation7 + $0x220] sm:$0xff]  ;;  %v1764_v36 = vunpack.c.h.s8.bf16 %v1204_v8  ;;  %v1756_v31 = vunpack.c.l.s8.bf16 %v1204_v8  ;;  %v1316_v48 = vld [vmem:[#allocation7 + $0x4e8] sm:$0xff] }
 0x2fc   :  { %v5537_v32 = vadd.f32 %v3116_v57, %v3075_v4  ;;  %3410 = vmatprep.subr.bf16.mxu1 %v1852_v19  ;;  %v1788_v4 = vunpack.c.l.s8.bf16 %v1220_v39  ;;  %v1771_v19 = vunpack.c.l.s8.bf16 %v1211_v23  ;;  %v1811_v7 = vunpack.c.h.s8.bf16 %v1227_v18  ;;  %v1284_v57 = vld [vmem:[#allocation7 + $0x3e8] sm:$0xff]  ;;  %v1315_v23 = vld [vmem:[#allocation7 + $0x4e0] sm:$0xff] }
 0x2fd   :  { %v3118_v26 = vpop.f32.mrf.mxu1  ;;  %v1924_v39 = vunpack.c.h.s8.bf16 %v1284_v57  ;;  %v1308_v8 = vld [vmem:[#allocation7 + $0x4a8] sm:$0xff] }
 0x2fe   :  { %3380 = vmatpush1.bf16.msra.mxu0 %v1683_v2  ;;  %3411 = vmatpush1.bf16.msra.mxu1 %v1851_v3  ;;  %v1804_v2 = vunpack.c.l.s8.bf16 %v1228_v20  ;;  %v1203_v3 = vld [vmem:[#allocation7 + $0x160] sm:$0xff]  ;;  %v1268_v20 = vld [vmem:[#allocation7 + $0x368] sm:$0xff] }
 0x2ff   :  { %v3119_v0 = vpop.f32.mrf.mxu1  ;;  %3381 = vmatprep.subr.bf16.mxu0 %v1676_v63  ;;  %3412 = vmatprep.subr.bf16.mxu1 %v1844_v34  ;;  %v1763_v63 = vunpack.c.h.s8.bf16 %v1203_v3  ;;  %v1803_v34 = vunpack.c.l.s8.bf16 %v1227_v18  ;;  %v1283_v26 = vld [vmem:[#allocation7 + $0x3e0] sm:$0xff]  ;;  %v1980_v18 = vunpack.c.l.s8.bf16 %v1316_v48 }
 0x300   :  { %v1923_v0 = vunpack.c.h.s8.bf16 %v1283_v26 }
 0x302   :  { %3382 = vmatpush1.bf16.msra.mxu0 %v1675_v40  ;;  %3413 = vmatpush1.bf16.msra.mxu1 %v1843_v28  ;;  %v1196_v40 = vld [vmem:[#allocation7 + $0x128] sm:$0xff]  ;;  %v1755_v28 = vunpack.c.l.s8.bf16 %v1203_v3 }
 0x303   :  { %3383 = vmatprep.subr.bf16.mxu0 %v1796_v51  ;;  %3414 = vmatprep.subr.bf16.mxu1 %v1836_v15  ;;  %v1748_v51 = vunpack.c.h.s8.bf16 %v1196_v40  ;;  %v1916_v15 = vunpack.c.l.s8.bf16 %v1284_v57  ;;  %v1884_v57 = vunpack.c.l.s8.bf16 %v1268_v20 }
 0x306   :  { %3384 = vmatpush2.bf16.msra.mxu0 %v1795_v43  ;;  %3415 = vmatpush1.bf16.msra.mxu1 %v1835_v24  ;;  %v1747_v43 = vunpack.c.h.s8.bf16 %v1195_v37  ;;  %v1915_v24 = vunpack.c.l.s8.bf16 %v1283_v26 }
 0x307   :  { %3385 = vmatprep.subr.bf16.mxu0 %v1788_v4  ;;  %3416 = vmatprep.subr.bf16.mxu1 %v1828_v11  ;;  %v1740_v4 = vunpack.c.l.s8.bf16 %v1196_v40  ;;  %v1908_v11 = vunpack.c.h.s8.bf16 %v1276_v53 }
 0x30a   :  { %3386 = vmatpush2.bf16.msra.mxu0 %v1787_v56  ;;  %3417 = vmatpush1.bf16.msra.mxu1 %v1827_v59  ;;  %v1739_v56 = vunpack.c.l.s8.bf16 %v1195_v37  ;;  %v1907_v59 = vunpack.c.h.s8.bf16 %v1275_v35  ;;  %v1300_v37 = vld [vmem:[#allocation7 + $0x468] sm:$0xff] }
 0x30b   :  { %3387 = vmatprep.subr.bf16.mxu0 %v1780_v61  ;;  %3418 = vmatprep.subr.bf16.mxu1 %v1820_v10  ;;  %v1900_v61 = vunpack.c.l.s8.bf16 %v1276_v53  ;;  %v1988_v10 = vunpack.c.h.s8.bf16 %v1316_v48 }
 0x30e   :  { %3388 = vmatpush2.bf16.msra.mxu0 %v1779_v46  ;;  %3419 = vmatpush1.bf16.msra.mxu1 %v1819_v17  ;;  %v1899_v46 = vunpack.c.l.s8.bf16 %v1275_v35  ;;  %v1987_v17 = vunpack.c.h.s8.bf16 %v1315_v23 }
 0x30f   :  { %3389 = vmatprep.subr.bf16.mxu0 %v1772_v58  ;;  %3420 = vmatprep.subr.bf16.mxu1 %v1812_v22  ;;  %v1892_v58 = vunpack.c.h.s8.bf16 %v1268_v20  ;;  %v1267_v22 = vld [vmem:[#allocation7 + $0x360] sm:$0xff] }
 0x310   :  { %v1883_v40 = vunpack.c.l.s8.bf16 %v1267_v22 }
 0x312   :  { %3390 = vmatpush2.bf16.msra.mxu0 %v1771_v19  ;;  %3421 = vmatpush1.bf16.msra.mxu1 %v1811_v7 }
 0x313   :  { %3391 = vmatprep.subr.bf16.mxu0 %v1764_v36  ;;  %3422 = vmatprep.subr.bf16.mxu1 %v1804_v2  ;;  %v1891_v36 = vunpack.c.h.s8.bf16 %v1267_v22  ;;  %v1979_v2 = vunpack.c.l.s8.bf16 %v1315_v23  ;;  %v1372_v22 = vld [vmem:[#allocation7 + $0x6a8] sm:$0xff] }
 0x316   :  { %3392 = vmatpush2.bf16.msra.mxu0 %v1763_v63  ;;  %3423 = vmatpush1.bf16.msra.mxu1 %v1803_v34  ;;  %v1972_v63 = vunpack.c.h.s8.bf16 %v1308_v8  ;;  %v1307_v34 = vld [vmem:[#allocation7 + $0x4a0] sm:$0xff] }
 0x317   :  { %3393 = vmatprep.subr.bf16.mxu0 %v1756_v31  ;;  %3424 = vmatprep.subr.bf16.mxu1 %v1924_v39  ;;  %v1260_v39 = vld [vmem:[#allocation7 + $0x328] sm:$0xff] }
 0x31a   :  { %3394 = vmatpush2.bf16.msra.mxu0 %v1755_v28  ;;  %3425 = vmatpush2.bf16.msra.mxu1 %v1923_v0  ;;  %v1876_v0 = vunpack.c.h.s8.bf16 %v1260_v39 }
 0x31b   :  { %3395 = vmatprep.subr.bf16.mxu0 %v1748_v51  ;;  %3426 = vmatprep.subr.bf16.mxu1 %v1916_v15  ;;  %v1964_v51 = vunpack.c.l.s8.bf16 %v1308_v8  ;;  %v1259_v15 = vld [vmem:[#allocation7 + $0x320] sm:$0xff] }
 0x31c   :  { %v1875_v53 = vunpack.c.h.s8.bf16 %v1259_v15  ;;  %v1867_v35 = vunpack.c.l.s8.bf16 %v1259_v15  ;;  %v1364_v15 = vld [vmem:[#allocation7 + $0x668] sm:$0xff] }
 0x31e   :  { %3396 = vmatpush2.bf16.msra.mxu0 %v1747_v43  ;;  %3427 = vmatpush2.bf16.msra.mxu1 %v1915_v24  ;;  %v1963_v43 = vunpack.c.l.s8.bf16 %v1307_v34  ;;  %v1956_v24 = vunpack.c.h.s8.bf16 %v1300_v37 }
 0x31f   :  { %3397 = vmatprep.subr.bf16.mxu0 %v1740_v4  ;;  %3428 = vmatprep.subr.bf16.mxu1 %v1908_v11  ;;  %v1299_v4 = vld [vmem:[#allocation7 + $0x460] sm:$0xff]  ;;  %v1380_v11 = vld [vmem:[#allocation7 + $0x6e8] sm:$0xff] }
 0x320   :  { %v1955_v48 = vunpack.c.h.s8.bf16 %v1299_v4  ;;  %v1947_v23 = vunpack.c.l.s8.bf16 %v1299_v4 }
 0x322   :  { %3398 = vmatpush2.bf16.msra.mxu0 %v1739_v56  ;;  %3429 = vmatpush2.bf16.msra.mxu1 %v1907_v59  ;;  %v1948_v56 = vunpack.c.l.s8.bf16 %v1300_v37  ;;  %v2116_v59 = vunpack.c.h.s8.bf16 %v1380_v11 }
 0x323   :  { %3430 = vmatprep.subr.bf16.mxu1 %v1900_v61  ;;  %3449 = vmatprep.subr.bf16.mxu0 %v1988_v10  ;;  %v1379_v61 = vld [vmem:[#allocation7 + $0x6e0] sm:$0xff]  ;;  %v1292_v10 = vld [vmem:[#allocation7 + $0x428] sm:$0xff] }
 0x324   :  { %v2115_v20 = vunpack.c.h.s8.bf16 %v1379_v61 }
 0x325   :  { %v3155_v19 = vpop.f32.mrf.mxu0  ;;  %3400 = vmatmul.mubr.bf16.vlgmr.msra.gmra.mxu0 %v5343_v29 }
 0x326   :  { %v3156_v7 = vadd.f32 %v3155_v19, %v5534_v50  ;;  %3431 = vmatpush2.bf16.msra.mxu1 %v1899_v46  ;;  %3450 = vmatpush1.bf16.msra.mxu0 %v1987_v17  ;;  %v1971_v50 = vunpack.c.h.s8.bf16 %v1307_v34  ;;  %v1940_v46 = vunpack.c.h.s8.bf16 %v1292_v10  ;;  %v1291_v17 = vld [vmem:[#allocation7 + $0x420] sm:$0xff] }
 0x327   :  { %3481 = vmatprep.mubr.bf16.mxu0 %v5358_v44  ;;  %v3157_v3 = vpop.f32.mrf.mxu0  ;;  %3432 = vmatprep.subr.bf16.mxu1 %v1892_v58  ;;  %v2108_v58 = vunpack.c.l.s8.bf16 %v1380_v11  ;;  %v1939_v19 = vunpack.c.h.s8.bf16 %v1291_v17 }
 0x328   :  { %v3158_v31 = vadd.f32 %v3157_v3, %v5537_v32  ;;  %3451 = vmatprep.subr.bf16.mxu0 %v1980_v18  ;;  %v1868_v32 = vunpack.c.l.s8.bf16 %v1260_v39  ;;  %v1932_v3 = vunpack.c.l.s8.bf16 %v1292_v10  ;;  %v1348_v39 = vld [vmem:[#allocation7 + $0x5e8] sm:$0xff] }
 0x329   :  { %v3159_v26 = vpop.f32.mrf.mxu0 }
 0x32a   :  { %3433 = vmatpush2.bf16.msra.mxu1 %v1891_v36  ;;  %3452 = vmatpush1.bf16.msra.mxu0 %v1979_v2  ;;  %v2107_v36 = vunpack.c.l.s8.bf16 %v1379_v61 }
 0x32b   :  { %v3160_v28 = vpop.f32.mrf.mxu0  ;;  %3434 = vmatprep.subr.bf16.mxu1 %v1884_v57  ;;  %3453 = vmatprep.subr.bf16.mxu0 %v1972_v63  ;;  %v2100_v57 = vunpack.c.h.s8.bf16 %v1372_v22  ;;  %v1371_v63 = vld [vmem:[#allocation7 + $0x6a0] sm:$0xff] }
 0x32c   :  { %v2052_v28 = vunpack.c.h.s8.bf16 %v1348_v39 }
 0x32e   :  { %3435 = vmatpush2.bf16.msra.mxu1 %v1883_v40  ;;  %3454 = vmatpush1.bf16.msra.mxu0 %v1971_v50  ;;  %v2099_v40 = vunpack.c.h.s8.bf16 %v1371_v63 }
 0x32f   :  { %3436 = vmatprep.subr.bf16.mxu1 %v1876_v0  ;;  %3455 = vmatprep.subr.bf16.mxu0 %v1964_v51  ;;  %v2092_v0 = vunpack.c.l.s8.bf16 %v1372_v22  ;;  %v1347_v51 = vld [vmem:[#allocation7 + $0x5e0] sm:$0xff] }
 0x330   :  { %v2051_v37 = vunpack.c.h.s8.bf16 %v1347_v51  ;;  %v2043_v4 = vunpack.c.l.s8.bf16 %v1347_v51  ;;  %v1323_v51 = vld [vmem:[#allocation7 + $0x520] sm:$0xff] }
 0x332   :  { %3437 = vmatpush2.bf16.msra.mxu1 %v1875_v53  ;;  %3456 = vmatpush1.bf16.msra.mxu0 %v1963_v43  ;;  %v2091_v53 = vunpack.c.l.s8.bf16 %v1371_v63  ;;  %v2084_v43 = vunpack.c.h.s8.bf16 %v1364_v15 }
 0x333   :  { %3438 = vmatprep.subr.bf16.mxu1 %v1868_v32  ;;  %3457 = vmatprep.subr.bf16.mxu0 %v1956_v24  ;;  %v1363_v32 = vld [vmem:[#allocation7 + $0x660] sm:$0xff]  ;;  %v1340_v24 = vld [vmem:[#allocation7 + $0x5a8] sm:$0xff] }
 0x334   :  { %v2083_v11 = vunpack.c.h.s8.bf16 %v1363_v32  ;;  %v2075_v10 = vunpack.c.l.s8.bf16 %v1363_v32  ;;  %v1403_v32 = vld [vmem:[#allocation7 + $0x7a0] sm:$0xff] }
 0x336   :  { %3439 = vmatpush2.bf16.msra.mxu1 %v1867_v35  ;;  %3458 = vmatpush1.bf16.msra.mxu0 %v1955_v48  ;;  %v2036_v35 = vunpack.c.h.s8.bf16 %v1340_v24  ;;  %v2076_v48 = vunpack.c.l.s8.bf16 %v1364_v15  ;;  %v1404_v15 = vld [vmem:[#allocation7 + $0x7a8] sm:$0xff] }
 0x337   :  { %3459 = vmatprep.subr.bf16.mxu0 %v1948_v56  ;;  %3490 = vmatprep.subr.bf16.mxu1 %v2116_v59  ;;  %v1339_v56 = vld [vmem:[#allocation7 + $0x5a0] sm:$0xff]  ;;  %v1356_v59 = vld [vmem:[#allocation7 + $0x628] sm:$0xff] }
 0x338   :  { %v2035_v61 = vunpack.c.h.s8.bf16 %v1339_v56 }
 0x339   :  { %v3196_v18 = vpop.f32.mrf.mxu1  ;;  %3441 = vmatmul.mubr.bf16.vlgmr.msra.gmra.mxu1 %v5371_v6 }
 0x33a   :  { %v5544_v8 = vadd.f32 %v3196_v18, %v3156_v7  ;;  %3460 = vmatpush1.bf16.msra.mxu0 %v1947_v23  ;;  %3491 = vmatpush1.bf16.msra.mxu1 %v2115_v20  ;;  %v1931_v7 = vunpack.c.l.s8.bf16 %v1291_v17  ;;  %v2028_v23 = vunpack.c.l.s8.bf16 %v1340_v24  ;;  %v2068_v20 = vunpack.c.h.s8.bf16 %v1356_v59  ;;  %v1332_v17 = vld [vmem:[#allocation7 + $0x568] sm:$0xff] }
 0x33b   :  { %3522 = vmatprep.mubr.bf16.mxu1 %v5400_v9  ;;  %v3198_v2 = vpop.f32.mrf.mxu1  ;;  %3461 = vmatprep.subr.bf16.mxu0 %v1940_v46  ;;  %v1355_v46 = vld [vmem:[#allocation7 + $0x620] sm:$0xff]  ;;  %v2020_v18 = vunpack.c.h.s8.bf16 %v1332_v17  ;;  %v2012_v63 = vunpack.c.l.s8.bf16 %v1332_v17  ;;  %v1444_v24 = vld [vmem:[#allocation7 + $0x8e8] sm:$0xff] }
 0x33c   :  { %v5547_v34 = vadd.f32 %v3198_v2, %v3158_v31  ;;  %3492 = vmatprep.subr.bf16.mxu1 %v2108_v58  ;;  %v2044_v31 = vunpack.c.l.s8.bf16 %v1348_v39  ;;  %v2027_v58 = vunpack.c.l.s8.bf16 %v1339_v56  ;;  %v2067_v22 = vunpack.c.h.s8.bf16 %v1355_v46  ;;  %v1412_v2 = vld [vmem:[#allocation7 + $0x7e8] sm:$0xff]  ;;  %v1443_v56 = vld [vmem:[#allocation7 + $0x8e0] sm:$0xff] }
 0x33d   :  { %v3200_v26 = vpop.f32.mrf.mxu1  ;;  %v2180_v39 = vunpack.c.h.s8.bf16 %v1412_v2  ;;  %v1436_v17 = vld [vmem:[#allocation7 + $0x8a8] sm:$0xff] }
 0x33e   :  { %3462 = vmatpush1.bf16.msra.mxu0 %v1939_v19  ;;  %3493 = vmatpush1.bf16.msra.mxu1 %v2107_v36  ;;  %v2060_v19 = vunpack.c.l.s8.bf16 %v1356_v59  ;;  %v1331_v36 = vld [vmem:[#allocation7 + $0x560] sm:$0xff]  ;;  %v1396_v59 = vld [vmem:[#allocation7 + $0x768] sm:$0xff] }
 0x33f   :  { %v3201_v50 = vpop.f32.mrf.mxu1  ;;  %3463 = vmatprep.subr.bf16.mxu0 %v1932_v3  ;;  %3494 = vmatprep.subr.bf16.mxu1 %v2100_v57  ;;  %v2019_v3 = vunpack.c.h.s8.bf16 %v1331_v36  ;;  %v2059_v57 = vunpack.c.l.s8.bf16 %v1355_v46  ;;  %v1411_v26 = vld [vmem:[#allocation7 + $0x7e0] sm:$0xff]  ;;  %v2236_v46 = vunpack.c.l.s8.bf16 %v1444_v24 }
 0x340   :  { %v2179_v50 = vunpack.c.h.s8.bf16 %v1411_v26 }
 0x342   :  { %3464 = vmatpush1.bf16.msra.mxu0 %v1931_v7  ;;  %3495 = vmatpush1.bf16.msra.mxu1 %v2099_v40  ;;  %v1324_v7 = vld [vmem:[#allocation7 + $0x528] sm:$0xff]  ;;  %v2011_v40 = vunpack.c.l.s8.bf16 %v1331_v36 }
 0x343   :  { %3465 = vmatprep.subr.bf16.mxu0 %v2052_v28  ;;  %3496 = vmatprep.subr.bf16.mxu1 %v2092_v0  ;;  %v2004_v28 = vunpack.c.h.s8.bf16 %v1324_v7  ;;  %v2172_v0 = vunpack.c.l.s8.bf16 %v1412_v2  ;;  %v2140_v2 = vunpack.c.l.s8.bf16 %v1396_v59 }
 0x346   :  { %3466 = vmatpush2.bf16.msra.mxu0 %v2051_v37  ;;  %3497 = vmatpush1.bf16.msra.mxu1 %v2091_v53  ;;  %v2003_v37 = vunpack.c.h.s8.bf16 %v1323_v51  ;;  %v2171_v53 = vunpack.c.l.s8.bf16 %v1411_v26 }
 0x347   :  { %3467 = vmatprep.subr.bf16.mxu0 %v2044_v31  ;;  %3498 = vmatprep.subr.bf16.mxu1 %v2084_v43  ;;  %v1996_v31 = vunpack.c.l.s8.bf16 %v1324_v7  ;;  %v2164_v43 = vunpack.c.h.s8.bf16 %v1404_v15 }
 0x34a   :  { %3468 = vmatpush2.bf16.msra.mxu0 %v2043_v4  ;;  %3499 = vmatpush1.bf16.msra.mxu1 %v2083_v11  ;;  %v1995_v4 = vunpack.c.l.s8.bf16 %v1323_v51  ;;  %v2163_v11 = vunpack.c.h.s8.bf16 %v1403_v32  ;;  %v1428_v51 = vld [vmem:[#allocation7 + $0x868] sm:$0xff] }
 0x34b   :  { %3469 = vmatprep.subr.bf16.mxu0 %v2036_v35  ;;  %3500 = vmatprep.subr.bf16.mxu1 %v2076_v48  ;;  %v2156_v35 = vunpack.c.l.s8.bf16 %v1404_v15  ;;  %v2244_v48 = vunpack.c.h.s8.bf16 %v1444_v24 }
 0x34e   :  { %3470 = vmatpush2.bf16.msra.mxu0 %v2035_v61  ;;  %3501 = vmatpush1.bf16.msra.mxu1 %v2075_v10  ;;  %v2155_v61 = vunpack.c.l.s8.bf16 %v1403_v32  ;;  %v2243_v10 = vunpack.c.h.s8.bf16 %v1443_v56 }
 0x34f   :  { %3471 = vmatprep.subr.bf16.mxu0 %v2028_v23  ;;  %3502 = vmatprep.subr.bf16.mxu1 %v2068_v20  ;;  %v2148_v23 = vunpack.c.h.s8.bf16 %v1396_v59  ;;  %v1395_v20 = vld [vmem:[#allocation7 + $0x760] sm:$0xff] }
 0x350   :  { %v2139_v7 = vunpack.c.l.s8.bf16 %v1395_v20 }
 0x352   :  { %3472 = vmatpush2.bf16.msra.mxu0 %v2027_v58  ;;  %3503 = vmatpush1.bf16.msra.mxu1 %v2067_v22 }
 0x353   :  { %3473 = vmatprep.subr.bf16.mxu0 %v2020_v18  ;;  %3504 = vmatprep.subr.bf16.mxu1 %v2060_v19  ;;  %v2147_v18 = vunpack.c.h.s8.bf16 %v1395_v20  ;;  %v2235_v19 = vunpack.c.l.s8.bf16 %v1443_v56  ;;  %v1500_v20 = vld [vmem:[#allocation7 + $0xaa8] sm:$0xff] }
 0x356   :  { %3474 = vmatpush2.bf16.msra.mxu0 %v2019_v3  ;;  %3505 = vmatpush1.bf16.msra.mxu1 %v2059_v57  ;;  %v2228_v3 = vunpack.c.h.s8.bf16 %v1436_v17  ;;  %v1435_v57 = vld [vmem:[#allocation7 + $0x8a0] sm:$0xff] }
 0x357   :  { %3475 = vmatprep.subr.bf16.mxu0 %v2012_v63  ;;  %3506 = vmatprep.subr.bf16.mxu1 %v2180_v39  ;;  %v1388_v39 = vld [vmem:[#allocation7 + $0x728] sm:$0xff] }
 0x35a   :  { %3476 = vmatpush2.bf16.msra.mxu0 %v2011_v40  ;;  %3507 = vmatpush2.bf16.msra.mxu1 %v2179_v50  ;;  %v2132_v50 = vunpack.c.h.s8.bf16 %v1388_v39 }
 0x35b   :  { %3477 = vmatprep.subr.bf16.mxu0 %v2004_v28  ;;  %3508 = vmatprep.subr.bf16.mxu1 %v2172_v0  ;;  %v2220_v28 = vunpack.c.l.s8.bf16 %v1436_v17  ;;  %v1387_v0 = vld [vmem:[#allocation7 + $0x720] sm:$0xff] }
 0x35c   :  { %v2131_v15 = vunpack.c.h.s8.bf16 %v1387_v0  ;;  %v2123_v32 = vunpack.c.l.s8.bf16 %v1387_v0  ;;  %v1492_v0 = vld [vmem:[#allocation7 + $0xa68] sm:$0xff] }
 0x35e   :  { %3478 = vmatpush2.bf16.msra.mxu0 %v2003_v37  ;;  %3509 = vmatpush2.bf16.msra.mxu1 %v2171_v53  ;;  %v2219_v37 = vunpack.c.l.s8.bf16 %v1435_v57  ;;  %v2212_v53 = vunpack.c.h.s8.bf16 %v1428_v51 }
 0x35f   :  { %3479 = vmatprep.subr.bf16.mxu0 %v1996_v31  ;;  %3510 = vmatprep.subr.bf16.mxu1 %v2164_v43  ;;  %v1427_v31 = vld [vmem:[#allocation7 + $0x860] sm:$0xff]  ;;  %v1508_v43 = vld [vmem:[#allocation7 + $0xae8] sm:$0xff] }
 0x360   :  { %v2211_v24 = vunpack.c.h.s8.bf16 %v1427_v31  ;;  %v2203_v56 = vunpack.c.l.s8.bf16 %v1427_v31 }
 0x362   :  { %3480 = vmatpush2.bf16.msra.mxu0 %v1995_v4  ;;  %3511 = vmatpush2.bf16.msra.mxu1 %v2163_v11  ;;  %v2204_v4 = vunpack.c.l.s8.bf16 %v1428_v51  ;;  %v2372_v11 = vunpack.c.h.s8.bf16 %v1508_v43 }
 0x363   :  { %3512 = vmatprep.subr.bf16.mxu1 %v2156_v35  ;;  %3531 = vmatprep.subr.bf16.mxu0 %v2244_v48  ;;  %v1507_v35 = vld [vmem:[#allocation7 + $0xae0] sm:$0xff]  ;;  %v1420_v48 = vld [vmem:[#allocation7 + $0x828] sm:$0xff] }
 0x364   :  { %v2371_v59 = vunpack.c.h.s8.bf16 %v1507_v35 }
 0x365   :  { %v3237_v58 = vpop.f32.mrf.mxu0  ;;  %3482 = vmatmul.mubr.bf16.vlgmr.msra.gmra.mxu0 %v5427_v42 }
 0x366   :  { %v3238_v22 = vadd.f32 %v3237_v58, %v5544_v8  ;;  %3513 = vmatpush2.bf16.msra.mxu1 %v2155_v61  ;;  %3532 = vmatpush1.bf16.msra.mxu0 %v2243_v10  ;;  %v2227_v8 = vunpack.c.h.s8.bf16 %v1435_v57  ;;  %v2196_v61 = vunpack.c.h.s8.bf16 %v1420_v48  ;;  %v1419_v10 = vld [vmem:[#allocation7 + $0x820] sm:$0xff] }
 0x367   :  { %3563 = vmatprep.mubr.bf16.mxu0 %v5432_v52  ;;  %v3239_v36 = vpop.f32.mrf.mxu0  ;;  %3514 = vmatprep.subr.bf16.mxu1 %v2148_v23  ;;  %v2364_v23 = vunpack.c.l.s8.bf16 %v1508_v43  ;;  %v2195_v58 = vunpack.c.h.s8.bf16 %v1419_v10 }
 0x368   :  { %v3240_v63 = vadd.f32 %v3239_v36, %v5547_v34  ;;  %3533 = vmatprep.subr.bf16.mxu0 %v2236_v46  ;;  %v2124_v34 = vunpack.c.l.s8.bf16 %v1388_v39  ;;  %v2188_v36 = vunpack.c.l.s8.bf16 %v1420_v48  ;;  %v1476_v39 = vld [vmem:[#allocation7 + $0x9e8] sm:$0xff] }
 0x369   :  { %v3241_v26 = vpop.f32.mrf.mxu0 }
 0x36a   :  { %3515 = vmatpush2.bf16.msra.mxu1 %v2147_v18  ;;  %3534 = vmatpush1.bf16.msra.mxu0 %v2235_v19  ;;  %v2363_v18 = vunpack.c.l.s8.bf16 %v1507_v35 }
 0x36b   :  { %v3242_v40 = vpop.f32.mrf.mxu0  ;;  %3516 = vmatprep.subr.bf16.mxu1 %v2140_v2  ;;  %3535 = vmatprep.subr.bf16.mxu0 %v2228_v3  ;;  %v2356_v2 = vunpack.c.h.s8.bf16 %v1500_v20  ;;  %v1499_v3 = vld [vmem:[#allocation7 + $0xaa0] sm:$0xff] }
 0x36c   :  { %v2308_v40 = vunpack.c.h.s8.bf16 %v1476_v39 }
 0x36e   :  { %3517 = vmatpush2.bf16.msra.mxu1 %v2139_v7  ;;  %3536 = vmatpush1.bf16.msra.mxu0 %v2227_v8  ;;  %v2355_v7 = vunpack.c.h.s8.bf16 %v1499_v3 }
 0x36f   :  { %3518 = vmatprep.subr.bf16.mxu1 %v2132_v50  ;;  %3537 = vmatprep.subr.bf16.mxu0 %v2220_v28  ;;  %v2348_v50 = vunpack.c.l.s8.bf16 %v1500_v20  ;;  %v1475_v28 = vld [vmem:[#allocation7 + $0x9e0] sm:$0xff] }
 0x370   :  { %v2307_v51 = vunpack.c.h.s8.bf16 %v1475_v28  ;;  %v2299_v31 = vunpack.c.l.s8.bf16 %v1475_v28  ;;  %v1451_v28 = vld [vmem:[#allocation7 + $0x920] sm:$0xff] }
 0x372   :  { %3519 = vmatpush2.bf16.msra.mxu1 %v2131_v15  ;;  %3538 = vmatpush1.bf16.msra.mxu0 %v2219_v37  ;;  %v2347_v15 = vunpack.c.l.s8.bf16 %v1499_v3  ;;  %v2340_v37 = vunpack.c.h.s8.bf16 %v1492_v0 }
 0x373   :  { %3520 = vmatprep.subr.bf16.mxu1 %v2124_v34  ;;  %3539 = vmatprep.subr.bf16.mxu0 %v2212_v53  ;;  %v1491_v34 = vld [vmem:[#allocation7 + $0xa60] sm:$0xff]  ;;  %v1468_v53 = vld [vmem:[#allocation7 + $0x9a8] sm:$0xff] }
 0x374   :  { %v2339_v43 = vunpack.c.h.s8.bf16 %v1491_v34  ;;  %v2331_v48 = vunpack.c.l.s8.bf16 %v1491_v34  ;;  %v1531_v34 = vld [vmem:[#allocation7 + $0xba0] sm:$0xff] }
 0x376   :  { %3521 = vmatpush2.bf16.msra.mxu1 %v2123_v32  ;;  %3540 = vmatpush1.bf16.msra.mxu0 %v2211_v24  ;;  %v2292_v32 = vunpack.c.h.s8.bf16 %v1468_v53  ;;  %v2332_v24 = vunpack.c.l.s8.bf16 %v1492_v0  ;;  %v1532_v0 = vld [vmem:[#allocation7 + $0xba8] sm:$0xff] }
 0x377   :  { %3541 = vmatprep.subr.bf16.mxu0 %v2204_v4  ;;  %3572 = vmatprep.subr.bf16.mxu1 %v2372_v11  ;;  %v1467_v4 = vld [vmem:[#allocation7 + $0x9a0] sm:$0xff]  ;;  %v1484_v11 = vld [vmem:[#allocation7 + $0xa28] sm:$0xff] }
 0x378   :  { %v2291_v35 = vunpack.c.h.s8.bf16 %v1467_v4 }
 0x379   :  { %v3278_v46 = vpop.f32.mrf.mxu1  ;;  %3523 = vmatmul.mubr.bf16.vlgmr.msra.gmra.mxu1 %v5458_v55 }
 0x37a   :  { %v5554_v17 = vadd.f32 %v3278_v46, %v3238_v22  ;;  %3542 = vmatpush1.bf16.msra.mxu0 %v2203_v56  ;;  %3573 = vmatpush1.bf16.msra.mxu1 %v2371_v59  ;;  %v2187_v22 = vunpack.c.l.s8.bf16 %v1419_v10  ;;  %v2284_v56 = vunpack.c.l.s8.bf16 %v1468_v53  ;;  %v2324_v59 = vunpack.c.h.s8.bf16 %v1484_v11  ;;  %v1460_v10 = vld [vmem:[#allocation7 + $0x968] sm:$0xff] }
 0x37b   :  { %3604 = vmatprep.mubr.bf16.mxu1 %v5460_v30  ;;  %v3280_v19 = vpop.f32.mrf.mxu1  ;;  %3543 = vmatprep.subr.bf16.mxu0 %v2196_v61  ;;  %v1483_v61 = vld [vmem:[#allocation7 + $0xa20] sm:$0xff]  ;;  %v2276_v46 = vunpack.c.h.s8.bf16 %v1460_v10  ;;  %v2268_v3 = vunpack.c.l.s8.bf16 %v1460_v10  ;;  %v1572_v53 = vld [vmem:[#allocation7 + $0xce8] sm:$0xff] }
 0x37c   :  { %v5557_v57 = vadd.f32 %v3280_v19, %v3240_v63  ;;  %3574 = vmatprep.subr.bf16.mxu1 %v2364_v23  ;;  %v2300_v63 = vunpack.c.l.s8.bf16 %v1476_v39  ;;  %v2283_v23 = vunpack.c.l.s8.bf16 %v1467_v4  ;;  %v2323_v20 = vunpack.c.h.s8.bf16 %v1483_v61  ;;  %v1540_v19 = vld [vmem:[#allocation7 + $0xbe8] sm:$0xff]  ;;  %v1571_v4 = vld [vmem:[#allocation7 + $0xce0] sm:$0xff] }
 0x37d   :  { %v3282_v26 = vpop.f32.mrf.mxu1  ;;  %v2436_v39 = vunpack.c.h.s8.bf16 %v1540_v19  ;;  %v1564_v10 = vld [vmem:[#allocation7 + $0xca8] sm:$0xff] }
 0x37e   :  { %3544 = vmatpush1.bf16.msra.mxu0 %v2195_v58  ;;  %3575 = vmatpush1.bf16.msra.mxu1 %v2363_v18  ;;  %v2316_v58 = vunpack.c.l.s8.bf16 %v1484_v11  ;;  %v1459_v18 = vld [vmem:[#allocation7 + $0x960] sm:$0xff]  ;;  %v1524_v11 = vld [vmem:[#allocation7 + $0xb68] sm:$0xff] }
 0x37f   :  { %v3283_v8 = vpop.f32.mrf.mxu1  ;;  %3545 = vmatprep.subr.bf16.mxu0 %v2188_v36  ;;  %3576 = vmatprep.subr.bf16.mxu1 %v2356_v2  ;;  %v2275_v36 = vunpack.c.h.s8.bf16 %v1459_v18  ;;  %v2315_v2 = vunpack.c.l.s8.bf16 %v1483_v61  ;;  %v1539_v26 = vld [vmem:[#allocation7 + $0xbe0] sm:$0xff]  ;;  %v2492_v61 = vunpack.c.l.s8.bf16 %v1572_v53 }
 0x380   :  { %v2435_v8 = vunpack.c.h.s8.bf16 %v1539_v26 }
 0x382   :  { %3546 = vmatpush1.bf16.msra.mxu0 %v2187_v22  ;;  %3577 = vmatpush1.bf16.msra.mxu1 %v2355_v7  ;;  %v1452_v22 = vld [vmem:[#allocation7 + $0x928] sm:$0xff]  ;;  %v2267_v7 = vunpack.c.l.s8.bf16 %v1459_v18 }
 0x383   :  { %3547 = vmatprep.subr.bf16.mxu0 %v2308_v40  ;;  %3578 = vmatprep.subr.bf16.mxu1 %v2348_v50  ;;  %v2260_v40 = vunpack.c.h.s8.bf16 %v1452_v22  ;;  %v2428_v50 = vunpack.c.l.s8.bf16 %v1540_v19  ;;  %v2396_v19 = vunpack.c.l.s8.bf16 %v1524_v11 }
 0x386   :  { %3548 = vmatpush2.bf16.msra.mxu0 %v2307_v51  ;;  %3579 = vmatpush1.bf16.msra.mxu1 %v2347_v15  ;;  %v2259_v51 = vunpack.c.h.s8.bf16 %v1451_v28  ;;  %v2427_v15 = vunpack.c.l.s8.bf16 %v1539_v26 }
 0x387   :  { %3549 = vmatprep.subr.bf16.mxu0 %v2300_v63  ;;  %3580 = vmatprep.subr.bf16.mxu1 %v2340_v37  ;;  %v2252_v63 = vunpack.c.l.s8.bf16 %v1452_v22  ;;  %v2420_v37 = vunpack.c.h.s8.bf16 %v1532_v0 }
 0x38a   :  { %3550 = vmatpush2.bf16.msra.mxu0 %v2299_v31  ;;  %3581 = vmatpush1.bf16.msra.mxu1 %v2339_v43  ;;  %v2251_v31 = vunpack.c.l.s8.bf16 %v1451_v28  ;;  %v2419_v43 = vunpack.c.h.s8.bf16 %v1531_v34  ;;  %v1556_v28 = vld [vmem:[#allocation7 + $0xc68] sm:$0xff] }
 0x38b   :  { %3551 = vmatprep.subr.bf16.mxu0 %v2292_v32  ;;  %3582 = vmatprep.subr.bf16.mxu1 %v2332_v24  ;;  %v2412_v32 = vunpack.c.l.s8.bf16 %v1532_v0  ;;  %v2500_v24 = vunpack.c.h.s8.bf16 %v1572_v53 }
 0x38e   :  { %3552 = vmatpush2.bf16.msra.mxu0 %v2291_v35  ;;  %3583 = vmatpush1.bf16.msra.mxu1 %v2331_v48  ;;  %v2411_v35 = vunpack.c.l.s8.bf16 %v1531_v34  ;;  %v2499_v48 = vunpack.c.h.s8.bf16 %v1571_v4 }
 0x38f   :  { %3553 = vmatprep.subr.bf16.mxu0 %v2284_v56  ;;  %3584 = vmatprep.subr.bf16.mxu1 %v2324_v59  ;;  %v2404_v56 = vunpack.c.h.s8.bf16 %v1524_v11  ;;  %v1523_v59 = vld [vmem:[#allocation7 + $0xb60] sm:$0xff] }
 0x390   :  { %v2395_v22 = vunpack.c.l.s8.bf16 %v1523_v59 }
 0x392   :  { %3554 = vmatpush2.bf16.msra.mxu0 %v2283_v23  ;;  %3585 = vmatpush1.bf16.msra.mxu1 %v2323_v20 }
 0x393   :  { %3555 = vmatprep.subr.bf16.mxu0 %v2276_v46  ;;  %3586 = vmatprep.subr.bf16.mxu1 %v2316_v58  ;;  %v2403_v46 = vunpack.c.h.s8.bf16 %v1523_v59  ;;  %v2491_v58 = vunpack.c.l.s8.bf16 %v1571_v4  ;;  %v1628_v59 = vld [vmem:[#allocation7 + $0xea8] sm:$0xff] }
 0x396   :  { %3556 = vmatpush2.bf16.msra.mxu0 %v2275_v36  ;;  %3587 = vmatpush1.bf16.msra.mxu1 %v2315_v2  ;;  %v2484_v36 = vunpack.c.h.s8.bf16 %v1564_v10  ;;  %v1563_v2 = vld [vmem:[#allocation7 + $0xca0] sm:$0xff] }
 0x397   :  { %3557 = vmatprep.subr.bf16.mxu0 %v2268_v3  ;;  %3588 = vmatprep.subr.bf16.mxu1 %v2436_v39  ;;  %v1516_v39 = vld [vmem:[#allocation7 + $0xb28] sm:$0xff] }
 0x39a   :  { %3558 = vmatpush2.bf16.msra.mxu0 %v2267_v7  ;;  %3589 = vmatpush2.bf16.msra.mxu1 %v2435_v8  ;;  %v2388_v8 = vunpack.c.h.s8.bf16 %v1516_v39 }
 0x39b   :  { %3559 = vmatprep.subr.bf16.mxu0 %v2260_v40  ;;  %3590 = vmatprep.subr.bf16.mxu1 %v2428_v50  ;;  %v2476_v40 = vunpack.c.l.s8.bf16 %v1564_v10  ;;  %v1515_v50 = vld [vmem:[#allocation7 + $0xb20] sm:$0xff] }
 0x39c   :  { %v2387_v0 = vunpack.c.h.s8.bf16 %v1515_v50  ;;  %v2379_v34 = vunpack.c.l.s8.bf16 %v1515_v50  ;;  %v1620_v50 = vld [vmem:[#allocation7 + $0xe68] sm:$0xff] }
 0x39e   :  { %3560 = vmatpush2.bf16.msra.mxu0 %v2259_v51  ;;  %3591 = vmatpush2.bf16.msra.mxu1 %v2427_v15  ;;  %v2475_v51 = vunpack.c.l.s8.bf16 %v1563_v2  ;;  %v2468_v15 = vunpack.c.h.s8.bf16 %v1556_v28 }
 0x39f   :  { %3561 = vmatprep.subr.bf16.mxu0 %v2252_v63  ;;  %3592 = vmatprep.subr.bf16.mxu1 %v2420_v37  ;;  %v1555_v63 = vld [vmem:[#allocation7 + $0xc60] sm:$0xff]  ;;  %v1636_v37 = vld [vmem:[#allocation7 + $0xee8] sm:$0xff] }
 0x3a0   :  { %v2467_v53 = vunpack.c.h.s8.bf16 %v1555_v63  ;;  %v2459_v4 = vunpack.c.l.s8.bf16 %v1555_v63 }
 0x3a2   :  { %3562 = vmatpush2.bf16.msra.mxu0 %v2251_v31  ;;  %3593 = vmatpush2.bf16.msra.mxu1 %v2419_v43  ;;  %v2460_v31 = vunpack.c.l.s8.bf16 %v1556_v28  ;;  %v2628_v43 = vunpack.c.h.s8.bf16 %v1636_v37 }
 0x3a3   :  { %3594 = vmatprep.subr.bf16.mxu1 %v2412_v32  ;;  %3613 = vmatprep.subr.bf16.mxu0 %v2500_v24  ;;  %v1635_v32 = vld [vmem:[#allocation7 + $0xee0] sm:$0xff]  ;;  %v1548_v24 = vld [vmem:[#allocation7 + $0xc28] sm:$0xff] }
 0x3a4   :  { %v2627_v11 = vunpack.c.h.s8.bf16 %v1635_v32 }
 0x3a5   :  { %v3319_v23 = vpop.f32.mrf.mxu0  ;;  %3564 = vmatmul.mubr.bf16.vlgmr.msra.gmra.mxu0 %v5470_v21 }
 0x3a6   :  { %v3320_v20 = vadd.f32 %v3319_v23, %v5554_v17  ;;  %3595 = vmatpush2.bf16.msra.mxu1 %v2411_v35  ;;  %3614 = vmatpush1.bf16.msra.mxu0 %v2499_v48  ;;  %v2483_v17 = vunpack.c.h.s8.bf16 %v1563_v2  ;;  %v2452_v35 = vunpack.c.h.s8.bf16 %v1548_v24  ;;  %v1547_v48 = vld [vmem:[#allocation7 + $0xc20] sm:$0xff] }
 0x3a7   :  { %3645 = vmatprep.mubr.bf16.mxu0 %v5472_v25  ;;  %v3321_v18 = vpop.f32.mrf.mxu0  ;;  %3596 = vmatprep.subr.bf16.mxu1 %v2404_v56  ;;  %v2620_v56 = vunpack.c.l.s8.bf16 %v1636_v37  ;;  %v2451_v23 = vunpack.c.h.s8.bf16 %v1547_v48 }
 0x3a8   :  { %v3322_v3 = vadd.f32 %v3321_v18, %v5557_v57  ;;  %3615 = vmatprep.subr.bf16.mxu0 %v2492_v61  ;;  %v2380_v57 = vunpack.c.l.s8.bf16 %v1516_v39  ;;  %v2444_v18 = vunpack.c.l.s8.bf16 %v1548_v24  ;;  %v1604_v39 = vld [vmem:[#allocation7 + $0xde8] sm:$0xff] }
 0x3a9   :  { %v3323_v26 = vpop.f32.mrf.mxu0 }
 0x3aa   :  { %3597 = vmatpush2.bf16.msra.mxu1 %v2403_v46  ;;  %3616 = vmatpush1.bf16.msra.mxu0 %v2491_v58  ;;  %v2619_v46 = vunpack.c.l.s8.bf16 %v1635_v32 }
 0x3ab   :  { %v3324_v7 = vpop.f32.mrf.mxu0  ;;  %3598 = vmatprep.subr.bf16.mxu1 %v2396_v19  ;;  %3617 = vmatprep.subr.bf16.mxu0 %v2484_v36  ;;  %v2612_v19 = vunpack.c.h.s8.bf16 %v1628_v59  ;;  %v1627_v36 = vld [vmem:[#allocation7 + $0xea0] sm:$0xff] }
 0x3ac   :  { %v2564_v7 = vunpack.c.h.s8.bf16 %v1604_v39 }
 0x3ae   :  { %3599 = vmatpush2.bf16.msra.mxu1 %v2395_v22  ;;  %3618 = vmatpush1.bf16.msra.mxu0 %v2483_v17  ;;  %v2611_v22 = vunpack.c.h.s8.bf16 %v1627_v36 }
 0x3af   :  { %3600 = vmatprep.subr.bf16.mxu1 %v2388_v8  ;;  %3619 = vmatprep.subr.bf16.mxu0 %v2476_v40  ;;  %v2604_v8 = vunpack.c.l.s8.bf16 %v1628_v59  ;;  %v1603_v40 = vld [vmem:[#allocation7 + $0xde0] sm:$0xff] }
 0x3b0   :  { %v2563_v28 = vunpack.c.h.s8.bf16 %v1603_v40  ;;  %v2555_v63 = vunpack.c.l.s8.bf16 %v1603_v40  ;;  %v1579_v40 = vld [vmem:[#allocation7 + $0xd20] sm:$0xff] }
 0x3b2   :  { %3601 = vmatpush2.bf16.msra.mxu1 %v2387_v0  ;;  %3620 = vmatpush1.bf16.msra.mxu0 %v2475_v51  ;;  %v2603_v0 = vunpack.c.l.s8.bf16 %v1627_v36  ;;  %v2596_v51 = vunpack.c.h.s8.bf16 %v1620_v50 }
 0x3b3   :  { %3602 = vmatprep.subr.bf16.mxu1 %v2380_v57  ;;  %3621 = vmatprep.subr.bf16.mxu0 %v2468_v15  ;;  %v1619_v57 = vld [vmem:[#allocation7 + $0xe60] sm:$0xff]  ;;  %v1596_v15 = vld [vmem:[#allocation7 + $0xda8] sm:$0xff] }
 0x3b4   :  { %v2595_v37 = vunpack.c.h.s8.bf16 %v1619_v57  ;;  %v2587_v24 = vunpack.c.l.s8.bf16 %v1619_v57  ;;  %v1659_v57 = vld [vmem:[#allocation7 + $0xfa0] sm:$0xff] }
 0x3b6   :  { %3603 = vmatpush2.bf16.msra.mxu1 %v2379_v34  ;;  %3622 = vmatpush1.bf16.msra.mxu0 %v2467_v53  ;;  %v2548_v34 = vunpack.c.h.s8.bf16 %v1596_v15  ;;  %v2588_v53 = vunpack.c.l.s8.bf16 %v1620_v50  ;;  %v1660_v50 = vld [vmem:[#allocation7 + $0xfa8] sm:$0xff] }
 0x3b7   :  { %3623 = vmatprep.subr.bf16.mxu0 %v2460_v31  ;;  %3654 = vmatprep.subr.bf16.mxu1 %v2628_v43  ;;  %v1595_v31 = vld [vmem:[#allocation7 + $0xda0] sm:$0xff]  ;;  %v1612_v43 = vld [vmem:[#allocation7 + $0xe28] sm:$0xff] }
 0x3b8   :  { %v2547_v32 = vunpack.c.h.s8.bf16 %v1595_v31 }
 0x3b9   :  { %v3360_v61 = vpop.f32.mrf.mxu1  ;;  %3605 = vmatmul.mubr.bf16.vlgmr.msra.gmra.mxu1 %v5478_v13 }
 0x3ba   :  { %v5564_v10 = vadd.f32 %v3360_v61, %v3320_v20  ;;  %3624 = vmatpush1.bf16.msra.mxu0 %v2459_v4  ;;  %3655 = vmatpush1.bf16.msra.mxu1 %v2627_v11  ;;  %v2443_v20 = vunpack.c.l.s8.bf16 %v1547_v48  ;;  %v2540_v4 = vunpack.c.l.s8.bf16 %v1596_v15  ;;  %v2580_v11 = vunpack.c.h.s8.bf16 %v1612_v43  ;;  %v1588_v48 = vld [vmem:[#allocation7 + $0xd68] sm:$0xff]  ;;  %v1190_v15 = vld [vmem:[#allocation7 + $0xf8] sm:$0xff] }
 0x3bb   :  { %3686 = vmatprep.mubr.bf16.mxu1 %v5480_v62  ;;  %v3362_v58 = vpop.f32.mrf.mxu1  ;;  %3625 = vmatprep.subr.bf16.mxu0 %v2452_v35  ;;  %v1611_v35 = vld [vmem:[#allocation7 + $0xe20] sm:$0xff]  ;;  %v2532_v61 = vunpack.c.h.s8.bf16 %v1588_v48  ;;  %v2524_v36 = vunpack.c.l.s8.bf16 %v1588_v48  ;;  %v1182_v48 = vld [vmem:[#allocation7 + $0xb8] sm:$0xff] }
 0x3bc   :  { %v5567_v2 = vadd.f32 %v3362_v58, %v3322_v3  ;;  %3656 = vmatprep.subr.bf16.mxu1 %v2620_v56  ;;  %v2556_v3 = vunpack.c.l.s8.bf16 %v1604_v39  ;;  %v2539_v56 = vunpack.c.l.s8.bf16 %v1595_v31  ;;  %v2579_v59 = vunpack.c.h.s8.bf16 %v1611_v35  ;;  %v1668_v58 = vld [vmem:[#allocation7 + $0xfe8] sm:$0xff]  ;;  %v1189_v31 = vld [vmem:[#allocation7 + $0xf0] sm:$0xff] }
 0x3bd   :  { %v3364_v26 = vpop.f32.mrf.mxu1  ;;  %v2692_v39 = vunpack.c.h.s8.bf16 %v1668_v58 }
 0x3be   :  { %3626 = vmatpush1.bf16.msra.mxu0 %v2451_v23  ;;  %3657 = vmatpush1.bf16.msra.mxu1 %v2619_v46  ;;  %v2572_v23 = vunpack.c.l.s8.bf16 %v1612_v43  ;;  %v1587_v46 = vld [vmem:[#allocation7 + $0xd60] sm:$0xff]  ;;  %v1652_v43 = vld [vmem:[#allocation7 + $0xf68] sm:$0xff] }
 0x3bf   :  { %v3365_v17 = vpop.f32.mrf.mxu1  ;;  %3627 = vmatprep.subr.bf16.mxu0 %v2444_v18  ;;  %3658 = vmatprep.subr.bf16.mxu1 %v2612_v19  ;;  %v2531_v18 = vunpack.c.h.s8.bf16 %v1587_v46  ;;  %v2571_v19 = vunpack.c.l.s8.bf16 %v1611_v35  ;;  %v1667_v26 = vld [vmem:[#allocation7 + $0xfe0] sm:$0xff]  ;;  %v1726_v35 = vunpack.c.l.s8.bf16 %v1190_v15 }
 0x3c0   :  { %v2691_v17 = vunpack.c.h.s8.bf16 %v1667_v26 }
 0x3c2   :  { %3628 = vmatpush1.bf16.msra.mxu0 %v2443_v20  ;;  %3659 = vmatpush1.bf16.msra.mxu1 %v2611_v22  ;;  %v1580_v20 = vld [vmem:[#allocation7 + $0xd28] sm:$0xff]  ;;  %v2523_v22 = vunpack.c.l.s8.bf16 %v1587_v46  ;;  %v2652_v46 = vunpack.c.l.s8.bf16 %v1652_v43 }
 0x3c3   :  { %3629 = vmatprep.subr.bf16.mxu0 %v2564_v7  ;;  %3660 = vmatprep.subr.bf16.mxu1 %v2604_v8  ;;  %v2516_v7 = vunpack.c.h.s8.bf16 %v1580_v20  ;;  %v2684_v8 = vunpack.c.l.s8.bf16 %v1668_v58  ;;  %v1718_v58 = vunpack.c.h.s8.bf16 %v1182_v48 }
 0x3c6   :  { %3630 = vmatpush2.bf16.msra.mxu0 %v2563_v28  ;;  %3661 = vmatpush1.bf16.msra.mxu1 %v2603_v0  ;;  %v2515_v28 = vunpack.c.h.s8.bf16 %v1579_v40  ;;  %v2683_v0 = vunpack.c.l.s8.bf16 %v1667_v26 }
 0x3c7   :  { %3631 = vmatprep.subr.bf16.mxu0 %v2556_v3  ;;  %3662 = vmatprep.subr.bf16.mxu1 %v2596_v51  ;;  %v2508_v3 = vunpack.c.l.s8.bf16 %v1580_v20  ;;  %v2676_v51 = vunpack.c.h.s8.bf16 %v1660_v50 }
 0x3ca   :  { %3632 = vmatpush2.bf16.msra.mxu0 %v2555_v63  ;;  %3663 = vmatpush1.bf16.msra.mxu1 %v2595_v37  ;;  %v2507_v63 = vunpack.c.l.s8.bf16 %v1579_v40  ;;  %v2675_v37 = vunpack.c.h.s8.bf16 %v1659_v57 }
 0x3cb   :  { %3633 = vmatprep.subr.bf16.mxu0 %v2548_v34  ;;  %3664 = vmatprep.subr.bf16.mxu1 %v2588_v53  ;;  %v2668_v34 = vunpack.c.l.s8.bf16 %v1660_v50  ;;  %v1734_v53 = vunpack.c.h.s8.bf16 %v1190_v15 }
 0x3ce   :  { %3634 = vmatpush2.bf16.msra.mxu0 %v2547_v32  ;;  %3665 = vmatpush1.bf16.msra.mxu1 %v2587_v24  ;;  %v2667_v32 = vunpack.c.l.s8.bf16 %v1659_v57  ;;  %v1733_v24 = vunpack.c.h.s8.bf16 %v1189_v31 }
 0x3cf   :  { %3635 = vmatprep.subr.bf16.mxu0 %v2540_v4  ;;  %3666 = vmatprep.subr.bf16.mxu1 %v2580_v11  ;;  %v2660_v4 = vunpack.c.h.s8.bf16 %v1652_v43  ;;  %v1651_v11 = vld [vmem:[#allocation7 + $0xf60] sm:$0xff] }
 0x3d2   :  { %3636 = vmatpush2.bf16.msra.mxu0 %v2539_v56  ;;  %3667 = vmatpush1.bf16.msra.mxu1 %v2579_v59  ;;  %v2659_v59 = vunpack.c.h.s8.bf16 %v1651_v11 }
 0x3d3   :  { %3637 = vmatprep.subr.bf16.mxu0 %v2532_v61  ;;  %3668 = vmatprep.subr.bf16.mxu1 %v2572_v23  ;;  %v1725_v61 = vunpack.c.l.s8.bf16 %v1189_v31 }
 0x3d6   :  { %3638 = vmatpush2.bf16.msra.mxu0 %v2531_v18  ;;  %3669 = vmatpush1.bf16.msra.mxu1 %v2571_v19  ;;  %v1181_v18 = vld [vmem:[#allocation7 + $0xb0] sm:$0xff]  ;;  %v1644_v19 = vld [vmem:[#allocation7 + $0xf28] sm:$0xff] }
 0x3d7   :  { %3639 = vmatprep.subr.bf16.mxu0 %v2524_v36  ;;  %3670 = vmatprep.subr.bf16.mxu1 %v2692_v39  ;;  %v2651_v39 = vunpack.c.l.s8.bf16 %v1651_v11  ;;  %v1717_v26 = vunpack.c.h.s8.bf16 %v1181_v18  ;;  %v1709_v40 = vunpack.c.l.s8.bf16 %v1181_v18  ;;  %v2636_v50 = vunpack.c.l.s8.bf16 %v1644_v19  ;;  %v1245_v18 = vld [vmem:[#allocation7 + $0x2b0] sm:$0xff] }
 0x3da   :  { %3640 = vmatpush2.bf16.msra.mxu0 %v2523_v22  ;;  %3671 = vmatpush2.bf16.msra.mxu1 %v2691_v17  ;;  %v2644_v22 = vunpack.c.h.s8.bf16 %v1644_v19  ;;  %v1710_v17 = vunpack.c.l.s8.bf16 %v1182_v48 }
 0x3db   :  { %3641 = vmatprep.subr.bf16.mxu0 %v2516_v7  ;;  %3672 = vmatprep.subr.bf16.mxu1 %v2684_v8  ;;  %v1643_v7 = vld [vmem:[#allocation7 + $0xf20] sm:$0xff]  ;;  %v1174_v8 = vld [vmem:[#allocation7 + $0x78] sm:$0xff] }
 0x3dc   :  { %v1694_v15 = vunpack.c.l.s8.bf16 %v1174_v8 }
 0x3de   :  { %3642 = vmatpush2.bf16.msra.mxu0 %v2515_v28  ;;  %3673 = vmatpush2.bf16.msra.mxu1 %v2683_v0  ;;  %v1702_v28 = vunpack.c.h.s8.bf16 %v1174_v8  ;;  %v1173_v0 = vld [vmem:[#allocation7 + $0x70] sm:$0xff] }
 0x3df   :  { %3643 = vmatprep.subr.bf16.mxu0 %v2508_v3  ;;  %3674 = vmatprep.subr.bf16.mxu1 %v2676_v51  ;;  %v1254_v3 = vld [vmem:[#allocation7 + $0x2f8] sm:$0xff]  ;;  %v2635_v51 = vunpack.c.l.s8.bf16 %v1643_v7  ;;  %v1701_v57 = vunpack.c.h.s8.bf16 %v1173_v0 }
 0x3e2   :  { %3644 = vmatpush2.bf16.msra.mxu0 %v2507_v63  ;;  %3675 = vmatpush2.bf16.msra.mxu1 %v2675_v37  ;;  %v1862_v63 = vunpack.c.h.s8.bf16 %v1254_v3  ;;  %v1253_v37 = vld [vmem:[#allocation7 + $0x2f0] sm:$0xff] }
 0x3e3   :  { %3676 = vmatprep.subr.bf16.mxu1 %v2668_v34  ;;  %3695 = vmatprep.subr.bf16.mxu0 %v1734_v53  ;;  %v1166_v34 = vld [vmem:[#allocation7 + $0x38] sm:$0xff]  ;;  %v1693_v53 = vunpack.c.l.s8.bf16 %v1173_v0  ;;  %v1861_v31 = vunpack.c.h.s8.bf16 %v1253_v37 }
 0x3e4   :  { %v1686_v43 = vunpack.c.h.s8.bf16 %v1166_v34 }
 0x3e5   :  { %v3401_v56 = vpop.f32.mrf.mxu0  ;;  %3646 = vmatmul.mubr.bf16.vlgmr.msra.gmra.mxu0 %v5485_v54 }
 0x3e6   :  { %3677 = vmatpush2.bf16.msra.mxu1 %v2667_v32  ;;  %3696 = vmatpush1.bf16.msra.mxu0 %v1733_v24  ;;  %v1165_v32 = vld [vmem:[#allocation7 + $0x30] sm:$0xff]  ;;  %v1854_v24 = vunpack.c.l.s8.bf16 %v1254_v3 }
 0x3e7   :  { %3727 = vmatprep.mubr.bf16.mxu0 %v5339_v41  ;;  %v3403_v23 = vpop.f32.mrf.mxu0  ;;  %3678 = vmatprep.subr.bf16.mxu1 %v2660_v4  ;;  %v2643_v41 = vunpack.c.h.s8.bf16 %v1643_v7  ;;  %v1246_v4 = vld [vmem:[#allocation7 + $0x2b8] sm:$0xff]  ;;  %v1685_v48 = vunpack.c.h.s8.bf16 %v1165_v32 }
 0x3e8   :  { %3697 = vmatprep.subr.bf16.mxu0 %v1726_v35  ;;  %v1238_v7 = vld [vmem:[#allocation7 + $0x278] sm:$0xff] }
 0x3e9   :  { %v3405_v36 = vpop.f32.mrf.mxu0 }
 0x3ea   :  { %3679 = vmatpush2.bf16.msra.mxu1 %v2659_v59  ;;  %3698 = vmatpush1.bf16.msra.mxu0 %v1725_v61  ;;  %v1853_v59 = vunpack.c.l.s8.bf16 %v1253_v37  ;;  %v1222_v36 = vld [vmem:[#allocation7 + $0x1f8] sm:$0xff] }
 0x3eb   :  { %v3406_v20 = vpop.f32.mrf.mxu0  ;;  %3680 = vmatprep.subr.bf16.mxu1 %v2652_v46  ;;  %3699 = vmatprep.subr.bf16.mxu0 %v1718_v58  ;;  %v1678_v46 = vunpack.c.l.s8.bf16 %v1166_v34  ;;  %v1846_v58 = vunpack.c.h.s8.bf16 %v1246_v4 }
 0x3ee   :  { %3681 = vmatpush2.bf16.msra.mxu1 %v2651_v39  ;;  %3700 = vmatpush1.bf16.msra.mxu0 %v1717_v26  ;;  %v1845_v26 = vunpack.c.h.s8.bf16 %v1245_v18 }
 0x3ef   :  { %3682 = vmatprep.subr.bf16.mxu1 %v2644_v22  ;;  %3701 = vmatprep.subr.bf16.mxu0 %v1710_v17  ;;  %v1798_v22 = vunpack.c.h.s8.bf16 %v1222_v36  ;;  %v1838_v17 = vunpack.c.l.s8.bf16 %v1246_v4 }
 0x3f2   :  { %3683 = vmatpush2.bf16.msra.mxu1 %v2643_v41  ;;  %3702 = vmatpush1.bf16.msra.mxu0 %v1709_v40  ;;  %v1837_v41 = vunpack.c.l.s8.bf16 %v1245_v18  ;;  %v1830_v40 = vunpack.c.h.s8.bf16 %v1238_v7 }
 0x3f3   :  { %3684 = vmatprep.subr.bf16.mxu1 %v2636_v50  ;;  %3703 = vmatprep.subr.bf16.mxu0 %v1702_v28  ;;  %v1237_v50 = vld [vmem:[#allocation7 + $0x270] sm:$0xff]  ;;  %v1214_v28 = vld [vmem:[#allocation7 + $0x1b8] sm:$0xff] }
 0x3f4   :  { %v1829_v3 = vunpack.c.h.s8.bf16 %v1237_v50  ;;  %v1821_v34 = vunpack.c.l.s8.bf16 %v1237_v50  ;;  %v1277_v50 = vld [vmem:[#allocation7 + $0x3b0] sm:$0xff] }
 0x3f6   :  { %3685 = vmatpush2.bf16.msra.mxu1 %v2635_v51  ;;  %3704 = vmatpush1.bf16.msra.mxu0 %v1701_v57  ;;  %v1782_v51 = vunpack.c.h.s8.bf16 %v1214_v28  ;;  %v1822_v57 = vunpack.c.l.s8.bf16 %v1238_v7  ;;  %v1278_v7 = vld [vmem:[#allocation7 + $0x3b8] sm:$0xff] }
 0x3f7   :  { %3705 = vmatprep.subr.bf16.mxu0 %v1694_v15  ;;  %3736 = vmatprep.subr.bf16.mxu1 %v1862_v63  ;;  %v1213_v15 = vld [vmem:[#allocation7 + $0x1b0] sm:$0xff]  ;;  %v1230_v63 = vld [vmem:[#allocation7 + $0x238] sm:$0xff] }
 0x3f8   :  { %v1781_v37 = vunpack.c.h.s8.bf16 %v1213_v15 }
 0x3f9   :  { %v3442_v11 = vpop.f32.mrf.mxu1  ;;  %3687 = vmatmul.mubr.bf16.vlgmr.msra.gmra.mxu1 %v5492_v45 }
 0x3fa   :  { %v5572_v35 = vadd.f32 %v3442_v11, %v3401_v56  ;;  %3706 = vmatpush1.bf16.msra.mxu0 %v1693_v53  ;;  %3737 = vmatpush1.bf16.msra.mxu1 %v1861_v31  ;;  %v1677_v56 = vunpack.c.l.s8.bf16 %v1165_v32  ;;  %v1774_v53 = vunpack.c.l.s8.bf16 %v1214_v28  ;;  %v1814_v31 = vunpack.c.h.s8.bf16 %v1230_v63  ;;  %v1206_v32 = vld [vmem:[#allocation7 + $0x178] sm:$0xff] }
 0x3fb   :  { %3768 = vmatprep.mubr.bf16.mxu1 %v5367_v5  ;;  %v3444_v61 = vpop.f32.mrf.mxu1  ;;  %3707 = vmatprep.subr.bf16.mxu0 %v1686_v43  ;;  %v1221_v5 = vld [vmem:[#allocation7 + $0x1f0] sm:$0xff]  ;;  %v1766_v11 = vunpack.c.h.s8.bf16 %v1206_v32  ;;  %v1758_v18 = vunpack.c.l.s8.bf16 %v1206_v32  ;;  %v1318_v28 = vld [vmem:[#allocation7 + $0x4f8] sm:$0xff] }
 0x3fc   :  { %v5575_v19 = vadd.f32 %v3444_v61, %v3403_v23  ;;  %3738 = vmatprep.subr.bf16.mxu1 %v1854_v24  ;;  %v1797_v8 = vunpack.c.h.s8.bf16 %v1221_v5  ;;  %v1790_v23 = vunpack.c.l.s8.bf16 %v1222_v36  ;;  %v1789_v0 = vunpack.c.l.s8.bf16 %v1221_v5  ;;  %v1229_v43 = vld [vmem:[#allocation7 + $0x230] sm:$0xff]  ;;  %v1286_v61 = vld [vmem:[#allocation7 + $0x3f8] sm:$0xff] }
 0x3fd   :  { %v3446_v39 = vpop.f32.mrf.mxu1  ;;  %v1773_v24 = vunpack.c.l.s8.bf16 %v1213_v15  ;;  %v1813_v4 = vunpack.c.h.s8.bf16 %v1229_v43  ;;  %v1926_v36 = vunpack.c.h.s8.bf16 %v1286_v61  ;;  %v1197_v5 = vld [vmem:[#allocation7 + $0x130] sm:$0xff]  ;;  %v1310_v32 = vld [vmem:[#allocation7 + $0x4b8] sm:$0xff] }
 0x3fe   :  { %3708 = vmatpush1.bf16.msra.mxu0 %v1685_v48  ;;  %3739 = vmatpush1.bf16.msra.mxu1 %v1853_v59  ;;  %v1806_v48 = vunpack.c.l.s8.bf16 %v1230_v63  ;;  %v1205_v59 = vld [vmem:[#allocation7 + $0x170] sm:$0xff]  ;;  %v1270_v63 = vld [vmem:[#allocation7 + $0x378] sm:$0xff] }
 0x3ff   :  { %v3447_v20 = vpop.f32.mrf.mxu1  ;;  %3709 = vmatprep.subr.bf16.mxu0 %v1678_v46  ;;  %3740 = vmatprep.subr.bf16.mxu1 %v1846_v58  ;;  %v1765_v46 = vunpack.c.h.s8.bf16 %v1205_v59  ;;  %v1805_v58 = vunpack.c.l.s8.bf16 %v1229_v43  ;;  %v1285_v39 = vld [vmem:[#allocation7 + $0x3f0] sm:$0xff]  ;;  %v1982_v43 = vunpack.c.l.s8.bf16 %v1318_v28 }
 0x400   :  { %v1925_v20 = vunpack.c.h.s8.bf16 %v1285_v39  ;;  %v1317_v15 = vld [vmem:[#allocation7 + $0x4f0] sm:$0xff] }
 0x402   :  { %3710 = vmatpush1.bf16.msra.mxu0 %v1677_v56  ;;  %3741 = vmatpush1.bf16.msra.mxu1 %v1845_v26  ;;  %v1198_v56 = vld [vmem:[#allocation7 + $0x138] sm:$0xff]  ;;  %v1757_v26 = vunpack.c.l.s8.bf16 %v1205_v59 }
 0x403   :  { %3711 = vmatprep.subr.bf16.mxu0 %v1798_v22  ;;  %3742 = vmatprep.subr.bf16.mxu1 %v1838_v17  ;;  %v1750_v22 = vunpack.c.h.s8.bf16 %v1198_v56  ;;  %v1918_v17 = vunpack.c.l.s8.bf16 %v1286_v61  ;;  %v1886_v61 = vunpack.c.l.s8.bf16 %v1270_v63 }
 0x406   :  { %3712 = vmatpush2.bf16.msra.mxu0 %v1797_v8  ;;  %3743 = vmatpush1.bf16.msra.mxu1 %v1837_v41  ;;  %v1749_v8 = vunpack.c.h.s8.bf16 %v1197_v5  ;;  %v1917_v41 = vunpack.c.l.s8.bf16 %v1285_v39 }
 0x407   :  { %3713 = vmatprep.subr.bf16.mxu0 %v1790_v23  ;;  %3744 = vmatprep.subr.bf16.mxu1 %v1830_v40  ;;  %v1742_v23 = vunpack.c.l.s8.bf16 %v1198_v56  ;;  %v1910_v40 = vunpack.c.h.s8.bf16 %v1278_v7 }
 0x40a   :  { %3714 = vmatpush2.bf16.msra.mxu0 %v1789_v0  ;;  %3745 = vmatpush1.bf16.msra.mxu1 %v1829_v3  ;;  %v1741_v0 = vunpack.c.l.s8.bf16 %v1197_v5  ;;  %v1909_v3 = vunpack.c.h.s8.bf16 %v1277_v50 }
 0x40b   :  { %3715 = vmatprep.subr.bf16.mxu0 %v1782_v51  ;;  %3746 = vmatprep.subr.bf16.mxu1 %v1822_v57  ;;  %v1902_v51 = vunpack.c.l.s8.bf16 %v1278_v7  ;;  %v1990_v57 = vunpack.c.h.s8.bf16 %v1318_v28 }
 0x40e   :  { %3716 = vmatpush2.bf16.msra.mxu0 %v1781_v37  ;;  %3747 = vmatpush1.bf16.msra.mxu1 %v1821_v34  ;;  %v1901_v37 = vunpack.c.l.s8.bf16 %v1277_v50  ;;  %v1989_v34 = vunpack.c.h.s8.bf16 %v1317_v15 }
 0x40f   :  { %3717 = vmatprep.subr.bf16.mxu0 %v1774_v53  ;;  %3748 = vmatprep.subr.bf16.mxu1 %v1814_v31  ;;  %v1894_v53 = vunpack.c.h.s8.bf16 %v1270_v63  ;;  %v1269_v31 = vld [vmem:[#allocation7 + $0x370] sm:$0xff] }
 0x410   :  { %v1293_v63 = vld [vmem:[#allocation7 + $0x430] sm:$0xff] }
 0x412   :  { %3718 = vmatpush2.bf16.msra.mxu0 %v1773_v24  ;;  %3749 = vmatpush1.bf16.msra.mxu1 %v1813_v4 }
 0x413   :  { %3719 = vmatprep.subr.bf16.mxu0 %v1766_v11  ;;  %3750 = vmatprep.subr.bf16.mxu1 %v1806_v48  ;;  %v1893_v11 = vunpack.c.h.s8.bf16 %v1269_v31  ;;  %v1981_v48 = vunpack.c.l.s8.bf16 %v1317_v15 }
 0x416   :  { %3720 = vmatpush2.bf16.msra.mxu0 %v1765_v46  ;;  %3751 = vmatpush1.bf16.msra.mxu1 %v1805_v58  ;;  %v1974_v46 = vunpack.c.h.s8.bf16 %v1310_v32  ;;  %v1309_v58 = vld [vmem:[#allocation7 + $0x4b0] sm:$0xff] }
 0x417   :  { %3721 = vmatprep.subr.bf16.mxu0 %v1758_v18  ;;  %3752 = vmatprep.subr.bf16.mxu1 %v1926_v36  ;;  %v1262_v36 = vld [vmem:[#allocation7 + $0x338] sm:$0xff]  ;;  %v1965_v5 = vunpack.c.l.s8.bf16 %v1309_v58 }
 0x41a   :  { %3722 = vmatpush2.bf16.msra.mxu0 %v1757_v26  ;;  %3753 = vmatpush2.bf16.msra.mxu1 %v1925_v20  ;;  %v1878_v26 = vunpack.c.h.s8.bf16 %v1262_v36  ;;  %v1966_v20 = vunpack.c.l.s8.bf16 %v1310_v32 }
 0x41b   :  { %3723 = vmatprep.subr.bf16.mxu0 %v1750_v22  ;;  %3754 = vmatprep.subr.bf16.mxu1 %v1918_v17  ;;  %v1302_v22 = vld [vmem:[#allocation7 + $0x478] sm:$0xff] }
 0x41c   :  { %v1958_v7 = vunpack.c.h.s8.bf16 %v1302_v22  ;;  %v1950_v50 = vunpack.c.l.s8.bf16 %v1302_v22  ;;  %v1342_v22 = vld [vmem:[#allocation7 + $0x5b8] sm:$0xff] }
 0x41e   :  { %3724 = vmatpush2.bf16.msra.mxu0 %v1749_v8  ;;  %3755 = vmatpush2.bf16.msra.mxu1 %v1917_v41  ;;  %v1301_v8 = vld [vmem:[#allocation7 + $0x470] sm:$0xff]  ;;  %v1382_v41 = vld [vmem:[#allocation7 + $0x6f8] sm:$0xff] }
 0x41f   :  { %3725 = vmatprep.subr.bf16.mxu0 %v1742_v23  ;;  %3756 = vmatprep.subr.bf16.mxu1 %v1910_v40  ;;  %v1957_v40 = vunpack.c.h.s8.bf16 %v1301_v8  ;;  %v2118_v28 = vunpack.c.h.s8.bf16 %v1382_v41 }
 0x422   :  { %3726 = vmatpush2.bf16.msra.mxu0 %v1741_v0  ;;  %3757 = vmatpush2.bf16.msra.mxu1 %v1909_v3  ;;  %v1381_v0 = vld [vmem:[#allocation7 + $0x6f0] sm:$0xff]  ;;  %v1294_v3 = vld [vmem:[#allocation7 + $0x438] sm:$0xff] }
 0x423   :  { %3758 = vmatprep.subr.bf16.mxu1 %v1902_v51  ;;  %3777 = vmatprep.subr.bf16.mxu0 %v1990_v57  ;;  %v1949_v51 = vunpack.c.l.s8.bf16 %v1301_v8  ;;  %v2117_v57 = vunpack.c.h.s8.bf16 %v1381_v0  ;;  %v1942_v15 = vunpack.c.h.s8.bf16 %v1294_v3  ;;  %v2109_v32 = vunpack.c.l.s8.bf16 %v1381_v0  ;;  %v1341_v8 = vld [vmem:[#allocation7 + $0x5b0] sm:$0xff] }
 0x424   :  { %v1357_v0 = vld [vmem:[#allocation7 + $0x630] sm:$0xff] }
 0x425   :  { %v3483_v24 = vpop.f32.mrf.mxu0  ;;  %3728 = vmatmul.mubr.bf16.vlgmr.msra.gmra.mxu0 %v5343_v29  ;;  %v1885_v29 = vunpack.c.l.s8.bf16 %v1269_v31 }
 0x426   :  { %v3484_v4 = vadd.f32 %v3483_v24, %v5572_v35  ;;  %3759 = vmatpush2.bf16.msra.mxu1 %v1901_v37  ;;  %3778 = vmatpush1.bf16.msra.mxu0 %v1989_v34  ;;  %v1973_v35 = vunpack.c.h.s8.bf16 %v1309_v58  ;;  %v2110_v37 = vunpack.c.l.s8.bf16 %v1382_v41  ;;  %v1374_v34 = vld [vmem:[#allocation7 + $0x6b8] sm:$0xff] }
 0x427   :  { %3809 = vmatprep.mubr.bf16.mxu0 %v5358_v44  ;;  %v3485_v59 = vpop.f32.mrf.mxu0  ;;  %3760 = vmatprep.subr.bf16.mxu1 %v1894_v53  ;;  %v1261_v44 = vld [vmem:[#allocation7 + $0x330] sm:$0xff]  ;;  %v1358_v41 = vld [vmem:[#allocation7 + $0x638] sm:$0xff] }
 0x428   :  { %v3486_v18 = vadd.f32 %v3485_v59, %v5575_v19  ;;  %3779 = vmatprep.subr.bf16.mxu0 %v1982_v43  ;;  %v1877_v17 = vunpack.c.h.s8.bf16 %v1261_v44  ;;  %v1870_v19 = vunpack.c.l.s8.bf16 %v1262_v36  ;;  %v1869_v23 = vunpack.c.l.s8.bf16 %v1261_v44  ;;  %v1373_v59 = vld [vmem:[#allocation7 + $0x6b0] sm:$0xff] }
 0x429   :  { %v3487_v39 = vpop.f32.mrf.mxu0  ;;  %v1941_v43 = vunpack.c.h.s8.bf16 %v1293_v63  ;;  %v1365_v44 = vld [vmem:[#allocation7 + $0x670] sm:$0xff] }
 0x42a   :  { %3761 = vmatpush2.bf16.msra.mxu1 %v1893_v11  ;;  %3780 = vmatpush1.bf16.msra.mxu0 %v1981_v48  ;;  %v1934_v11 = vunpack.c.l.s8.bf16 %v1294_v3  ;;  %v2102_v48 = vunpack.c.h.s8.bf16 %v1374_v34  ;;  %v1334_v3 = vld [vmem:[#allocation7 + $0x578] sm:$0xff] }
 0x42b   :  { %v3488_v56 = vpop.f32.mrf.mxu0  ;;  %3762 = vmatprep.subr.bf16.mxu1 %v1886_v61  ;;  %3781 = vmatprep.subr.bf16.mxu0 %v1974_v46  ;;  %v1350_v46 = vld [vmem:[#allocation7 + $0x5f8] sm:$0xff] }
 0x42c   :  { %v2054_v39 = vunpack.c.h.s8.bf16 %v1350_v46 }
 0x42e   :  { %3763 = vmatpush2.bf16.msra.mxu1 %v1885_v29  ;;  %3782 = vmatpush1.bf16.msra.mxu0 %v1973_v35  ;;  %v2094_v29 = vunpack.c.l.s8.bf16 %v1374_v34  ;;  %v1366_v35 = vld [vmem:[#allocation7 + $0x678] sm:$0xff] }
 0x42f   :  { %3764 = vmatprep.subr.bf16.mxu1 %v1878_v26  ;;  %3783 = vmatprep.subr.bf16.mxu0 %v1966_v20  ;;  %v2093_v26 = vunpack.c.l.s8.bf16 %v1373_v59  ;;  %v2086_v20 = vunpack.c.h.s8.bf16 %v1366_v35  ;;  %v1414_v34 = vld [vmem:[#allocation7 + $0x7f8] sm:$0xff] }
 0x432   :  { %3765 = vmatpush2.bf16.msra.mxu1 %v1877_v17  ;;  %3784 = vmatpush1.bf16.msra.mxu0 %v1965_v5  ;;  %v2085_v5 = vunpack.c.h.s8.bf16 %v1365_v44 }
 0x433   :  { %3766 = vmatprep.subr.bf16.mxu1 %v1870_v19  ;;  %3785 = vmatprep.subr.bf16.mxu0 %v1958_v7  ;;  %v2038_v19 = vunpack.c.h.s8.bf16 %v1342_v22  ;;  %v2078_v7 = vunpack.c.l.s8.bf16 %v1366_v35 }
 0x436   :  { %3767 = vmatpush2.bf16.msra.mxu1 %v1869_v23  ;;  %3786 = vmatpush1.bf16.msra.mxu0 %v1957_v40  ;;  %v2037_v23 = vunpack.c.h.s8.bf16 %v1341_v8  ;;  %v2077_v40 = vunpack.c.l.s8.bf16 %v1365_v44 }
 0x437   :  { %3787 = vmatprep.subr.bf16.mxu0 %v1950_v50  ;;  %3818 = vmatprep.subr.bf16.mxu1 %v2118_v28  ;;  %v2030_v50 = vunpack.c.l.s8.bf16 %v1342_v22  ;;  %v2070_v28 = vunpack.c.h.s8.bf16 %v1358_v41 }
 0x439   :  { %v3524_v53 = vpop.f32.mrf.mxu1  ;;  %3769 = vmatmul.mubr.bf16.vlgmr.msra.gmra.mxu1 %v5371_v6  ;;  %v1933_v6 = vunpack.c.l.s8.bf16 %v1293_v63  ;;  %v2062_v63 = vunpack.c.l.s8.bf16 %v1358_v41  ;;  %v1397_v41 = vld [vmem:[#allocation7 + $0x770] sm:$0xff] }
 0x43a   :  { %v5582_v31 = vadd.f32 %v3524_v53, %v3484_v4  ;;  %3788 = vmatpush1.bf16.msra.mxu0 %v1949_v51  ;;  %3819 = vmatpush1.bf16.msra.mxu1 %v2117_v57  ;;  %v2101_v4 = vunpack.c.h.s8.bf16 %v1373_v59  ;;  %v2029_v51 = vunpack.c.l.s8.bf16 %v1341_v8  ;;  %v2069_v57 = vunpack.c.h.s8.bf16 %v1357_v0 }
 0x43b   :  { %3850 = vmatprep.mubr.bf16.mxu1 %v5400_v9  ;;  %v3526_v24 = vpop.f32.mrf.mxu1  ;;  %3789 = vmatprep.subr.bf16.mxu0 %v1942_v15  ;;  %v1349_v9 = vld [vmem:[#allocation7 + $0x5f0] sm:$0xff]  ;;  %v2022_v15 = vunpack.c.h.s8.bf16 %v1334_v3 }
 0x43c   :  { %v5585_v61 = vadd.f32 %v3526_v24, %v3486_v18  ;;  %3820 = vmatprep.subr.bf16.mxu1 %v2110_v37  ;;  %v2053_v56 = vunpack.c.h.s8.bf16 %v1349_v9  ;;  %v2046_v18 = vunpack.c.l.s8.bf16 %v1350_v46  ;;  %v2045_v17 = vunpack.c.l.s8.bf16 %v1349_v9  ;;  %v1333_v37 = vld [vmem:[#allocation7 + $0x570] sm:$0xff] }
 0x43d   :  { %v3528_v58 = vpop.f32.mrf.mxu1  ;;  %v2021_v53 = vunpack.c.h.s8.bf16 %v1333_v37  ;;  %v2182_v24 = vunpack.c.h.s8.bf16 %v1414_v34  ;;  %v2013_v59 = vunpack.c.l.s8.bf16 %v1333_v37 }
 0x43e   :  { %3790 = vmatpush1.bf16.msra.mxu0 %v1941_v43  ;;  %3821 = vmatpush1.bf16.msra.mxu1 %v2109_v32  ;;  %v2061_v43 = vunpack.c.l.s8.bf16 %v1357_v0  ;;  %v2014_v32 = vunpack.c.l.s8.bf16 %v1334_v3  ;;  %v2149_v0 = vunpack.c.h.s8.bf16 %v1397_v41 }
 0x43f   :  { %v3529_v36 = vpop.f32.mrf.mxu1  ;;  %3791 = vmatprep.subr.bf16.mxu0 %v1934_v11  ;;  %3822 = vmatprep.subr.bf16.mxu1 %v2102_v48  ;;  %v1413_v11 = vld [vmem:[#allocation7 + $0x7f0] sm:$0xff]  ;;  %v1326_v48 = vld [vmem:[#allocation7 + $0x538] sm:$0xff] }
 0x440   :  { %v2181_v46 = vunpack.c.h.s8.bf16 %v1413_v11  ;;  %v2006_v58 = vunpack.c.h.s8.bf16 %v1326_v48  ;;  %v1406_v36 = vld [vmem:[#allocation7 + $0x7b8] sm:$0xff]  ;;  %v1998_v9 = vunpack.c.l.s8.bf16 %v1326_v48 }
 0x441   :  { %v2166_v35 = vunpack.c.h.s8.bf16 %v1406_v36  ;;  %v2158_v44 = vunpack.c.l.s8.bf16 %v1406_v36 }
 0x442   :  { %3792 = vmatpush1.bf16.msra.mxu0 %v1933_v6  ;;  %3823 = vmatpush1.bf16.msra.mxu1 %v2101_v4  ;;  %v2174_v6 = vunpack.c.l.s8.bf16 %v1414_v34  ;;  %v1325_v4 = vld [vmem:[#allocation7 + $0x530] sm:$0xff]  ;;  %v1390_v34 = vld [vmem:[#allocation7 + $0x738] sm:$0xff] }
 0x443   :  { %3793 = vmatprep.subr.bf16.mxu0 %v2054_v39  ;;  %3824 = vmatprep.subr.bf16.mxu1 %v2094_v29  ;;  %v2005_v39 = vunpack.c.h.s8.bf16 %v1325_v4  ;;  %v2173_v29 = vunpack.c.l.s8.bf16 %v1413_v11  ;;  %v1430_v11 = vld [vmem:[#allocation7 + $0x878] sm:$0xff] }
 0x446   :  { %3794 = vmatpush2.bf16.msra.mxu0 %v2053_v56  ;;  %3825 = vmatpush1.bf16.msra.mxu1 %v2093_v26  ;;  %v1405_v56 = vld [vmem:[#allocation7 + $0x7b0] sm:$0xff]  ;;  %v1446_v26 = vld [vmem:[#allocation7 + $0x8f8] sm:$0xff] }
 0x447   :  { %3795 = vmatprep.subr.bf16.mxu0 %v2046_v18  ;;  %3826 = vmatprep.subr.bf16.mxu1 %v2086_v20  ;;  %v1997_v18 = vunpack.c.l.s8.bf16 %v1325_v4  ;;  %v2165_v20 = vunpack.c.h.s8.bf16 %v1405_v56  ;;  %v2246_v22 = vunpack.c.h.s8.bf16 %v1446_v26 }
 0x44a   :  { %3796 = vmatpush2.bf16.msra.mxu0 %v2045_v17  ;;  %3827 = vmatpush1.bf16.msra.mxu1 %v2085_v5  ;;  %v1445_v17 = vld [vmem:[#allocation7 + $0x8f0] sm:$0xff]  ;;  %v1398_v5 = vld [vmem:[#allocation7 + $0x778] sm:$0xff] }
 0x44b   :  { %3797 = vmatprep.subr.bf16.mxu0 %v2038_v19  ;;  %3828 = vmatprep.subr.bf16.mxu1 %v2078_v7  ;;  %v2157_v19 = vunpack.c.l.s8.bf16 %v1405_v56  ;;  %v2245_v7 = vunpack.c.h.s8.bf16 %v1445_v17  ;;  %v2150_v8 = vunpack.c.h.s8.bf16 %v1398_v5  ;;  %v2237_v3 = vunpack.c.l.s8.bf16 %v1445_v17 }
 0x44e   :  { %3798 = vmatpush2.bf16.msra.mxu0 %v2037_v23  ;;  %3829 = vmatpush1.bf16.msra.mxu1 %v2077_v40  ;;  %v2238_v23 = vunpack.c.l.s8.bf16 %v1446_v26  ;;  %v1438_v40 = vld [vmem:[#allocation7 + $0x8b8] sm:$0xff] }
 0x44f   :  { %3799 = vmatprep.subr.bf16.mxu0 %v2030_v50  ;;  %3830 = vmatprep.subr.bf16.mxu1 %v2070_v28 }
 0x452   :  { %3800 = vmatpush2.bf16.msra.mxu0 %v2029_v51  ;;  %3831 = vmatpush1.bf16.msra.mxu1 %v2069_v57  ;;  %v2142_v57 = vunpack.c.l.s8.bf16 %v1398_v5 }
 0x453   :  { %3801 = vmatprep.subr.bf16.mxu0 %v2022_v15  ;;  %3832 = vmatprep.subr.bf16.mxu1 %v2062_v63  ;;  %v2230_v15 = vunpack.c.h.s8.bf16 %v1438_v40  ;;  %v1437_v63 = vld [vmem:[#allocation7 + $0x8b0] sm:$0xff] }
 0x456   :  { %3802 = vmatpush2.bf16.msra.mxu0 %v2021_v53  ;;  %3833 = vmatpush1.bf16.msra.mxu1 %v2061_v43 }
 0x457   :  { %3803 = vmatprep.subr.bf16.mxu0 %v2014_v32  ;;  %3834 = vmatprep.subr.bf16.mxu1 %v2182_v24  ;;  %v2134_v32 = vunpack.c.h.s8.bf16 %v1390_v34  ;;  %v2222_v24 = vunpack.c.l.s8.bf16 %v1438_v40  ;;  %v1501_v40 = vld [vmem:[#allocation7 + $0xab0] sm:$0xff] }
 0x45a   :  { %3804 = vmatpush2.bf16.msra.mxu0 %v2013_v59  ;;  %3835 = vmatpush2.bf16.msra.mxu1 %v2181_v46  ;;  %v2221_v59 = vunpack.c.l.s8.bf16 %v1437_v63  ;;  %v2214_v46 = vunpack.c.h.s8.bf16 %v1430_v11 }
 0x45b   :  { %3805 = vmatprep.subr.bf16.mxu0 %v2006_v58  ;;  %3836 = vmatprep.subr.bf16.mxu1 %v2174_v6  ;;  %v1429_v58 = vld [vmem:[#allocation7 + $0x870] sm:$0xff]  ;;  %v1510_v6 = vld [vmem:[#allocation7 + $0xaf8] sm:$0xff] }
 0x45c   :  { %v2213_v36 = vunpack.c.h.s8.bf16 %v1429_v58  ;;  %v2205_v56 = vunpack.c.l.s8.bf16 %v1429_v58 }
 0x45e   :  { %3806 = vmatpush2.bf16.msra.mxu0 %v2005_v39  ;;  %3837 = vmatpush2.bf16.msra.mxu1 %v2173_v29  ;;  %v2206_v39 = vunpack.c.l.s8.bf16 %v1430_v11  ;;  %v2374_v29 = vunpack.c.h.s8.bf16 %v1510_v6 }
 0x45f   :  { %3807 = vmatprep.subr.bf16.mxu0 %v1998_v9  ;;  %3838 = vmatprep.subr.bf16.mxu1 %v2166_v35  ;;  %v1509_v9 = vld [vmem:[#allocation7 + $0xaf0] sm:$0xff]  ;;  %v1422_v35 = vld [vmem:[#allocation7 + $0x838] sm:$0xff] }
 0x460   :  { %v2373_v26 = vunpack.c.h.s8.bf16 %v1509_v9 }
 0x462   :  { %3808 = vmatpush2.bf16.msra.mxu0 %v1997_v18  ;;  %3839 = vmatpush2.bf16.msra.mxu1 %v2165_v20  ;;  %v2198_v18 = vunpack.c.h.s8.bf16 %v1422_v35  ;;  %v1421_v20 = vld [vmem:[#allocation7 + $0x830] sm:$0xff] }
 0x463   :  { %3840 = vmatprep.subr.bf16.mxu1 %v2158_v44  ;;  %3859 = vmatprep.subr.bf16.mxu0 %v2246_v22  ;;  %v2366_v44 = vunpack.c.l.s8.bf16 %v1510_v6  ;;  %v1502_v22 = vld [vmem:[#allocation7 + $0xab8] sm:$0xff] }
 0x465   :  { %v3565_v50 = vpop.f32.mrf.mxu0  ;;  %3810 = vmatmul.mubr.bf16.vlgmr.msra.gmra.mxu0 %v5427_v42  ;;  %v2141_v42 = vunpack.c.l.s8.bf16 %v1397_v41  ;;  %v2190_v41 = vunpack.c.l.s8.bf16 %v1422_v35 }
 0x466   :  { %v3566_v28 = vadd.f32 %v3565_v50, %v5582_v31  ;;  %3841 = vmatpush2.bf16.msra.mxu1 %v2157_v19  ;;  %3860 = vmatpush1.bf16.msra.mxu0 %v2245_v7  ;;  %v2229_v31 = vunpack.c.h.s8.bf16 %v1437_v63  ;;  %v2197_v19 = vunpack.c.h.s8.bf16 %v1421_v20  ;;  %v2365_v7 = vunpack.c.l.s8.bf16 %v1509_v9  ;;  %v1494_v63 = vld [vmem:[#allocation7 + $0xa78] sm:$0xff] }
 0x467   :  { %3891 = vmatprep.mubr.bf16.mxu0 %v5432_v52  ;;  %v3567_v51 = vpop.f32.mrf.mxu0  ;;  %3842 = vmatprep.subr.bf16.mxu1 %v2150_v8  ;;  %v1389_v52 = vld [vmem:[#allocation7 + $0x730] sm:$0xff]  ;;  %v2334_v11 = vunpack.c.l.s8.bf16 %v1494_v63 }
 0x468   :  { %v3568_v37 = vadd.f32 %v3567_v51, %v5585_v61  ;;  %3861 = vmatprep.subr.bf16.mxu0 %v2238_v23  ;;  %v2133_v48 = vunpack.c.h.s8.bf16 %v1389_v52  ;;  %v2126_v61 = vunpack.c.l.s8.bf16 %v1390_v34  ;;  %v2125_v4 = vunpack.c.l.s8.bf16 %v1389_v52 }
 0x469   :  { %v3569_v53 = vpop.f32.mrf.mxu0  ;;  %v2358_v23 = vunpack.c.h.s8.bf16 %v1502_v22 }
 0x46a   :  { %3843 = vmatpush2.bf16.msra.mxu1 %v2149_v0  ;;  %3862 = vmatpush1.bf16.msra.mxu0 %v2237_v3  ;;  %v1478_v0 = vld [vmem:[#allocation7 + $0x9f8] sm:$0xff]  ;;  %v2349_v53 = vunpack.c.l.s8.bf16 %v1501_v40 }
 0x46b   :  { %v3570_v43 = vpop.f32.mrf.mxu0  ;;  %3844 = vmatprep.subr.bf16.mxu1 %v2142_v57  ;;  %3863 = vmatprep.subr.bf16.mxu0 %v2230_v15  ;;  %v2310_v57 = vunpack.c.h.s8.bf16 %v1478_v0  ;;  %v2350_v15 = vunpack.c.l.s8.bf16 %v1502_v22 }
 0x46c   :  { %v1470_v43 = vld [vmem:[#allocation7 + $0x9b8] sm:$0xff] }
 0x46d   :  { %v2294_v52 = vunpack.c.h.s8.bf16 %v1470_v43  ;;  %v2286_v58 = vunpack.c.l.s8.bf16 %v1470_v43 }
 0x46e   :  { %3845 = vmatpush2.bf16.msra.mxu1 %v2141_v42  ;;  %3864 = vmatpush1.bf16.msra.mxu0 %v2229_v31  ;;  %v2342_v42 = vunpack.c.h.s8.bf16 %v1494_v63  ;;  %v1493_v31 = vld [vmem:[#allocation7 + $0xa70] sm:$0xff] }
 0x46f   :  { %3846 = vmatprep.subr.bf16.mxu1 %v2134_v32  ;;  %3865 = vmatprep.subr.bf16.mxu0 %v2222_v24  ;;  %v2341_v24 = vunpack.c.h.s8.bf16 %v1493_v31 }
 0x472   :  { %3847 = vmatpush2.bf16.msra.mxu1 %v2133_v48  ;;  %3866 = vmatpush1.bf16.msra.mxu0 %v2221_v59  ;;  %v1469_v48 = vld [vmem:[#allocation7 + $0x9b0] sm:$0xff]  ;;  %v1486_v59 = vld [vmem:[#allocation7 + $0xa38] sm:$0xff] }
 0x473   :  { %3848 = vmatprep.subr.bf16.mxu1 %v2126_v61  ;;  %3867 = vmatprep.subr.bf16.mxu0 %v2214_v46  ;;  %v2293_v61 = vunpack.c.h.s8.bf16 %v1469_v48  ;;  %v2333_v46 = vunpack.c.l.s8.bf16 %v1493_v31  ;;  %v2326_v6 = vunpack.c.h.s8.bf16 %v1486_v59  ;;  %v2318_v35 = vunpack.c.l.s8.bf16 %v1486_v59 }
 0x476   :  { %3849 = vmatpush2.bf16.msra.mxu1 %v2125_v4  ;;  %3868 = vmatpush1.bf16.msra.mxu0 %v2213_v36  ;;  %v1485_v4 = vld [vmem:[#allocation7 + $0xa30] sm:$0xff]  ;;  %v1462_v36 = vld [vmem:[#allocation7 + $0x978] sm:$0xff] }
 0x477   :  { %3869 = vmatprep.subr.bf16.mxu0 %v2206_v39  ;;  %3900 = vmatprep.subr.bf16.mxu1 %v2374_v29  ;;  %v2285_v39 = vunpack.c.l.s8.bf16 %v1469_v48  ;;  %v2325_v29 = vunpack.c.h.s8.bf16 %v1485_v4  ;;  %v2278_v9 = vunpack.c.h.s8.bf16 %v1462_v36 }
 0x479   :  { %v3606_v17 = vpop.f32.mrf.mxu1  ;;  %3851 = vmatmul.mubr.bf16.vlgmr.msra.gmra.mxu1 %v5458_v55  ;;  %v2189_v55 = vunpack.c.l.s8.bf16 %v1421_v20  ;;  %v2317_v20 = vunpack.c.l.s8.bf16 %v1485_v4 }
 0x47a   :  { %v5592_v5 = vadd.f32 %v3606_v17, %v3566_v28  ;;  %3870 = vmatpush1.bf16.msra.mxu0 %v2205_v56  ;;  %3901 = vmatpush1.bf16.msra.mxu1 %v2373_v26  ;;  %v2357_v28 = vunpack.c.h.s8.bf16 %v1501_v40  ;;  %v1461_v56 = vld [vmem:[#allocation7 + $0x970] sm:$0xff]  ;;  %v1542_v26 = vld [vmem:[#allocation7 + $0xbf8] sm:$0xff] }
 0x47b   :  { %3932 = vmatprep.mubr.bf16.mxu1 %v5460_v30  ;;  %v3608_v8 = vpop.f32.mrf.mxu1  ;;  %3871 = vmatprep.subr.bf16.mxu0 %v2198_v18  ;;  %v1477_v30 = vld [vmem:[#allocation7 + $0x9f0] sm:$0xff]  ;;  %v2277_v18 = vunpack.c.h.s8.bf16 %v1461_v56  ;;  %v2438_v22 = vunpack.c.h.s8.bf16 %v1542_v26 }
 0x47c   :  { %v5595_v50 = vadd.f32 %v3608_v8, %v3568_v37  ;;  %3902 = vmatprep.subr.bf16.mxu1 %v2366_v44  ;;  %v2309_v34 = vunpack.c.h.s8.bf16 %v1477_v30  ;;  %v2302_v37 = vunpack.c.l.s8.bf16 %v1478_v0  ;;  %v2301_v32 = vunpack.c.l.s8.bf16 %v1477_v30  ;;  %v1541_v17 = vld [vmem:[#allocation7 + $0xbf0] sm:$0xff]  ;;  %v1534_v0 = vld [vmem:[#allocation7 + $0xbb8] sm:$0xff] }
 0x47d   :  { %v3610_v3 = vpop.f32.mrf.mxu1  ;;  %v2270_v44 = vunpack.c.l.s8.bf16 %v1462_v36  ;;  %v2437_v8 = vunpack.c.h.s8.bf16 %v1541_v17  ;;  %v1453_v40 = vld [vmem:[#allocation7 + $0x930] sm:$0xff] }
 0x47e   :  { %3872 = vmatpush1.bf16.msra.mxu0 %v2197_v19  ;;  %3903 = vmatpush1.bf16.msra.mxu1 %v2365_v7  ;;  %v1454_v19 = vld [vmem:[#allocation7 + $0x938] sm:$0xff]  ;;  %v2269_v7 = vunpack.c.l.s8.bf16 %v1461_v56  ;;  %v2261_v3 = vunpack.c.h.s8.bf16 %v1453_v40  ;;  %v2253_v30 = vunpack.c.l.s8.bf16 %v1453_v40  ;;  %v1565_v36 = vld [vmem:[#allocation7 + $0xcb0] sm:$0xff] }
 0x47f   :  { %v3611_v51 = vpop.f32.mrf.mxu1  ;;  %3873 = vmatprep.subr.bf16.mxu0 %v2190_v41  ;;  %3904 = vmatprep.subr.bf16.mxu1 %v2358_v23  ;;  %v2262_v41 = vunpack.c.h.s8.bf16 %v1454_v19  ;;  %v2430_v23 = vunpack.c.l.s8.bf16 %v1542_v26  ;;  %v1637_v40 = vld [vmem:[#allocation7 + $0xef0] sm:$0xff] }
 0x480   :  { %v2422_v51 = vunpack.c.h.s8.bf16 %v1534_v0 }
 0x482   :  { %3874 = vmatpush1.bf16.msra.mxu0 %v2189_v55  ;;  %3905 = vmatpush1.bf16.msra.mxu1 %v2357_v28  ;;  %v2429_v55 = vunpack.c.l.s8.bf16 %v1541_v17  ;;  %v2254_v28 = vunpack.c.l.s8.bf16 %v1454_v19  ;;  %v1557_v17 = vld [vmem:[#allocation7 + $0xc70] sm:$0xff]  ;;  %v1638_v19 = vld [vmem:[#allocation7 + $0xef8] sm:$0xff] }
 0x483   :  { %3875 = vmatprep.subr.bf16.mxu0 %v2310_v57  ;;  %3906 = vmatprep.subr.bf16.mxu1 %v2350_v15  ;;  %v1533_v57 = vld [vmem:[#allocation7 + $0xbb0] sm:$0xff]  ;;  %v1574_v15 = vld [vmem:[#allocation7 + $0xcf8] sm:$0xff] }
 0x484   :  { %v2421_v63 = vunpack.c.h.s8.bf16 %v1533_v57  ;;  %v2413_v31 = vunpack.c.l.s8.bf16 %v1533_v57  ;;  %v2622_v57 = vunpack.c.l.s8.bf16 %v1638_v19 }
 0x486   :  { %3876 = vmatpush2.bf16.msra.mxu0 %v2309_v34  ;;  %3907 = vmatpush1.bf16.msra.mxu1 %v2349_v53  ;;  %v2414_v34 = vunpack.c.l.s8.bf16 %v1534_v0  ;;  %v2502_v53 = vunpack.c.h.s8.bf16 %v1574_v15  ;;  %v1550_v0 = vld [vmem:[#allocation7 + $0xc38] sm:$0xff] }
 0x487   :  { %3877 = vmatprep.subr.bf16.mxu0 %v2302_v37  ;;  %3908 = vmatprep.subr.bf16.mxu1 %v2342_v42  ;;  %v1573_v37 = vld [vmem:[#allocation7 + $0xcf0] sm:$0xff]  ;;  %v1526_v42 = vld [vmem:[#allocation7 + $0xb78] sm:$0xff] }
 0x488   :  { %v2501_v43 = vunpack.c.h.s8.bf16 %v1573_v37 }
 0x48a   :  { %3878 = vmatpush2.bf16.msra.mxu0 %v2301_v32  ;;  %3909 = vmatpush1.bf16.msra.mxu1 %v2341_v24  ;;  %v2406_v32 = vunpack.c.h.s8.bf16 %v1526_v42  ;;  %v1525_v24 = vld [vmem:[#allocation7 + $0xb70] sm:$0xff] }
 0x48b   :  { %3879 = vmatprep.subr.bf16.mxu0 %v2294_v52  ;;  %3910 = vmatprep.subr.bf16.mxu1 %v2334_v11  ;;  %v2494_v52 = vunpack.c.l.s8.bf16 %v1574_v15  ;;  %v1566_v11 = vld [vmem:[#allocation7 + $0xcb8] sm:$0xff] }
 0x48c   :  { %v2486_v4 = vunpack.c.h.s8.bf16 %v1566_v11  ;;  %v2478_v26 = vunpack.c.l.s8.bf16 %v1566_v11  ;;  %v1630_v15 = vld [vmem:[#allocation7 + $0xeb8] sm:$0xff] }
 0x48e   :  { %3880 = vmatpush2.bf16.msra.mxu0 %v2293_v61  ;;  %3911 = vmatpush1.bf16.msra.mxu1 %v2333_v46  ;;  %v2405_v61 = vunpack.c.h.s8.bf16 %v1525_v24  ;;  %v2493_v46 = vunpack.c.l.s8.bf16 %v1573_v37 }
 0x48f   :  { %3881 = vmatprep.subr.bf16.mxu0 %v2286_v58  ;;  %3912 = vmatprep.subr.bf16.mxu1 %v2326_v6  ;;  %v2398_v6 = vunpack.c.l.s8.bf16 %v1526_v42  ;;  %v2446_v42 = vunpack.c.l.s8.bf16 %v1550_v0 }
 0x492   :  { %3882 = vmatpush2.bf16.msra.mxu0 %v2285_v39  ;;  %3913 = vmatpush1.bf16.msra.mxu1 %v2325_v29  ;;  %v1518_v29 = vld [vmem:[#allocation7 + $0xb38] sm:$0xff] }
 0x493   :  { %3883 = vmatprep.subr.bf16.mxu0 %v2278_v9  ;;  %3914 = vmatprep.subr.bf16.mxu1 %v2318_v35  ;;  %v2390_v56 = vunpack.c.h.s8.bf16 %v1518_v29 }
 0x496   :  { %3884 = vmatpush2.bf16.msra.mxu0 %v2277_v18  ;;  %3915 = vmatpush1.bf16.msra.mxu1 %v2317_v20  ;;  %v1558_v18 = vld [vmem:[#allocation7 + $0xc78] sm:$0xff] }
 0x497   :  { %3885 = vmatprep.subr.bf16.mxu0 %v2270_v44  ;;  %3916 = vmatprep.subr.bf16.mxu1 %v2438_v22  ;;  %v2477_v44 = vunpack.c.l.s8.bf16 %v1565_v36  ;;  %v2470_v22 = vunpack.c.h.s8.bf16 %v1558_v18 }
 0x49a   :  { %3886 = vmatpush2.bf16.msra.mxu0 %v2269_v7  ;;  %3917 = vmatpush2.bf16.msra.mxu1 %v2437_v8  ;;  %v2469_v8 = vunpack.c.h.s8.bf16 %v1557_v17 }
 0x49b   :  { %3887 = vmatprep.subr.bf16.mxu0 %v2262_v41  ;;  %3918 = vmatprep.subr.bf16.mxu1 %v2430_v23  ;;  %v2462_v41 = vunpack.c.l.s8.bf16 %v1558_v18  ;;  %v2630_v23 = vunpack.c.h.s8.bf16 %v1638_v19 }
 0x49e   :  { %3888 = vmatpush2.bf16.msra.mxu0 %v2261_v3  ;;  %3919 = vmatpush2.bf16.msra.mxu1 %v2429_v55  ;;  %v2461_v3 = vunpack.c.l.s8.bf16 %v1557_v17  ;;  %v2629_v55 = vunpack.c.h.s8.bf16 %v1637_v40 }
 0x49f   :  { %3889 = vmatprep.subr.bf16.mxu0 %v2254_v28  ;;  %3920 = vmatprep.subr.bf16.mxu1 %v2422_v51  ;;  %v2454_v28 = vunpack.c.h.s8.bf16 %v1550_v0  ;;  %v1549_v51 = vld [vmem:[#allocation7 + $0xc30] sm:$0xff] }
 0x4a2   :  { %3890 = vmatpush2.bf16.msra.mxu0 %v2253_v30  ;;  %3921 = vmatpush2.bf16.msra.mxu1 %v2421_v63 }
 0x4a3   :  { %3922 = vmatprep.subr.bf16.mxu1 %v2414_v34  ;;  %3941 = vmatprep.subr.bf16.mxu0 %v2502_v53  ;;  %v2453_v34 = vunpack.c.h.s8.bf16 %v1549_v51  ;;  %v2621_v53 = vunpack.c.l.s8.bf16 %v1637_v40 }
 0x4a5   :  { %v3647_v48 = vpop.f32.mrf.mxu0  ;;  %3892 = vmatmul.mubr.bf16.vlgmr.msra.gmra.mxu0 %v5470_v21  ;;  %v2397_v21 = vunpack.c.l.s8.bf16 %v1525_v24  ;;  %v1606_v24 = vld [vmem:[#allocation7 + $0xdf8] sm:$0xff] }
 0x4a6   :  { %v3648_v59 = vadd.f32 %v3647_v48, %v5592_v5  ;;  %3923 = vmatpush2.bf16.msra.mxu1 %v2413_v31  ;;  %3942 = vmatpush1.bf16.msra.mxu0 %v2501_v43  ;;  %v2485_v5 = vunpack.c.h.s8.bf16 %v1565_v36  ;;  %v2614_v31 = vunpack.c.h.s8.bf16 %v1630_v15  ;;  %v1629_v43 = vld [vmem:[#allocation7 + $0xeb0] sm:$0xff] }
 0x4a7   :  { %3973 = vmatprep.mubr.bf16.mxu0 %v5472_v25  ;;  %v3649_v58 = vpop.f32.mrf.mxu0  ;;  %3924 = vmatprep.subr.bf16.mxu1 %v2406_v32  ;;  %v1517_v25 = vld [vmem:[#allocation7 + $0xb30] sm:$0xff]  ;;  %v2613_v11 = vunpack.c.h.s8.bf16 %v1629_v43 }
 0x4a8   :  { %v3650_v39 = vadd.f32 %v3649_v58, %v5595_v50  ;;  %3943 = vmatprep.subr.bf16.mxu0 %v2494_v52  ;;  %v2389_v20 = vunpack.c.h.s8.bf16 %v1517_v25  ;;  %v2382_v50 = vunpack.c.l.s8.bf16 %v1518_v29  ;;  %v2381_v7 = vunpack.c.l.s8.bf16 %v1517_v25  ;;  %v1598_v29 = vld [vmem:[#allocation7 + $0xdb8] sm:$0xff] }
 0x4a9   :  { %v3651_v9 = vpop.f32.mrf.mxu0 }
 0x4aa   :  { %3925 = vmatpush2.bf16.msra.mxu1 %v2405_v61  ;;  %3944 = vmatpush1.bf16.msra.mxu0 %v2493_v46  ;;  %v2606_v61 = vunpack.c.l.s8.bf16 %v1630_v15  ;;  %v1622_v46 = vld [vmem:[#allocation7 + $0xe78] sm:$0xff] }
 0x4ab   :  { %v3652_v35 = vpop.f32.mrf.mxu0  ;;  %3926 = vmatprep.subr.bf16.mxu1 %v2398_v6  ;;  %3945 = vmatprep.subr.bf16.mxu0 %v2486_v4  ;;  %v2605_v6 = vunpack.c.l.s8.bf16 %v1629_v43  ;;  %v2558_v4 = vunpack.c.l.s8.bf16 %v1606_v24  ;;  %v2598_v36 = vunpack.c.h.s8.bf16 %v1622_v46  ;;  %v1662_v43 = vld [vmem:[#allocation7 + $0xfb8] sm:$0xff] }
 0x4ac   :  { %v2590_v35 = vunpack.c.l.s8.bf16 %v1622_v46 }
 0x4ae   :  { %3927 = vmatpush2.bf16.msra.mxu1 %v2397_v21  ;;  %3946 = vmatpush1.bf16.msra.mxu0 %v2485_v5  ;;  %v2550_v5 = vunpack.c.h.s8.bf16 %v1598_v29 }
 0x4af   :  { %3928 = vmatprep.subr.bf16.mxu1 %v2390_v56  ;;  %3947 = vmatprep.subr.bf16.mxu0 %v2478_v26  ;;  %v1597_v56 = vld [vmem:[#allocation7 + $0xdb0] sm:$0xff]  ;;  %v1614_v26 = vld [vmem:[#allocation7 + $0xe38] sm:$0xff] }
 0x4b0   :  { %v2549_v25 = vunpack.c.h.s8.bf16 %v1597_v56  ;;  %v2541_v17 = vunpack.c.l.s8.bf16 %v1597_v56 }
 0x4b2   :  { %3929 = vmatpush2.bf16.msra.mxu1 %v2389_v20  ;;  %3948 = vmatpush1.bf16.msra.mxu0 %v2477_v44  ;;  %v2542_v20 = vunpack.c.l.s8.bf16 %v1598_v29  ;;  %v2582_v44 = vunpack.c.h.s8.bf16 %v1614_v26 }
 0x4b3   :  { %3930 = vmatprep.subr.bf16.mxu1 %v2382_v50  ;;  %3949 = vmatprep.subr.bf16.mxu0 %v2470_v22  ;;  %v1613_v50 = vld [vmem:[#allocation7 + $0xe30] sm:$0xff]  ;;  %v1590_v22 = vld [vmem:[#allocation7 + $0xd78] sm:$0xff] }
 0x4b4   :  { %v2581_v19 = vunpack.c.h.s8.bf16 %v1613_v50  ;;  %v2573_v0 = vunpack.c.l.s8.bf16 %v1613_v50 }
 0x4b6   :  { %3931 = vmatpush2.bf16.msra.mxu1 %v2381_v7  ;;  %3950 = vmatpush1.bf16.msra.mxu0 %v2469_v8  ;;  %v2534_v7 = vunpack.c.h.s8.bf16 %v1590_v22  ;;  %v2574_v8 = vunpack.c.l.s8.bf16 %v1614_v26  ;;  %v4138_v26 = vld [vmem:[#allocation8 + $0x28] sm:$0xff] }
 0x4b7   :  { %3951 = vmatprep.subr.bf16.mxu0 %v2462_v41  ;;  %3982 = vmatprep.subr.bf16.mxu1 %v2630_v23  ;;  %v1589_v41 = vld [vmem:[#allocation7 + $0xd70] sm:$0xff]  ;;  %v1670_v23 = vld [vmem:[#allocation7 + $0xff8] sm:$0xff] }
 0x4b8   :  { %v2533_v40 = vunpack.c.h.s8.bf16 %v1589_v41 }
 0x4b9   :  { %v3688_v30 = vpop.f32.mrf.mxu1  ;;  %3933 = vmatmul.mubr.bf16.vlgmr.msra.gmra.mxu1 %v5478_v13  ;;  %v2445_v13 = vunpack.c.l.s8.bf16 %v1549_v51  ;;  %v5607_v51 = vld [vmem:[#allocation10 + $0x20] ss:$2 sm:$0xff] }
 0x4ba   :  { %v5602_v63 = vadd.f32 %v3688_v30, %v3648_v59  ;;  %3952 = vmatpush1.bf16.msra.mxu0 %v2461_v3  ;;  %3983 = vmatpush1.bf16.msra.mxu1 %v2629_v55  ;;  %v2566_v59 = vunpack.c.h.s8.bf16 %v1606_v24  ;;  %v2526_v3 = vunpack.c.l.s8.bf16 %v1590_v22  ;;  %v2694_v55 = vunpack.c.h.s8.bf16 %v1670_v23 }
 0x4bb   :  { %4014 = vmatprep.mubr.bf16.mxu1 %v5480_v62  ;;  %v3690_v37 = vpop.f32.mrf.mxu1  ;;  %3953 = vmatprep.subr.bf16.mxu0 %v2454_v28  ;;  %v1605_v62 = vld [vmem:[#allocation7 + $0xdf0] sm:$0xff]  ;;  %v4035_v15 = vrot.slane %v5607_v51, %v5322_v1  ;;  %v2525_v30 = vunpack.c.l.s8.bf16 %v1589_v41 }
 0x4bc   :  { %v5605_v32 = vadd.f32 %v3690_v37, %v3650_v39  ;;  %3984 = vmatprep.subr.bf16.mxu1 %v2622_v57  ;;  %v2565_v58 = vunpack.c.h.s8.bf16 %v1605_v62  ;;  %v1621_v39 = vld [vmem:[#allocation7 + $0xe70] sm:$0xff]  ;;  %v2557_v9 = vunpack.c.l.s8.bf16 %v1605_v62  ;;  %v1582_v57 = vld [vmem:[#allocation7 + $0xd38] sm:$0xff]  ;;  %v2686_v37 = vunpack.c.l.s8.bf16 %v1670_v23 }
 0x4bd   :  { %v3692_v52 = vpop.f32.mrf.mxu1  ;;  %v2597_v21 = vunpack.c.h.s8.bf16 %v1621_v39  ;;  %v2589_v18 = vunpack.c.l.s8.bf16 %v1621_v39  ;;  %v1669_v28 = vld [vmem:[#allocation7 + $0xff0] sm:$0xff]  ;;  %v4069_v24 = vmul.f32 %v4035_v15, %v5529_v47  ;;  %v4140_v62 = vld [vmem:[#allocation8 + $0x38] sm:$0xff]  ;;  %v2670_v47 = vunpack.c.l.s8.bf16 %v1662_v43 }
 0x4be   :  { %3954 = vmatpush1.bf16.msra.mxu0 %v2453_v34  ;;  %3985 = vmatpush1.bf16.msra.mxu1 %v2621_v53  ;;  %v2693_v34 = vunpack.c.h.s8.bf16 %v1669_v28  ;;  %v2518_v53 = vunpack.c.h.s8.bf16 %v1582_v57  ;;  %v1654_v39 = vld [vmem:[#allocation7 + $0xf78] sm:$0xff]  ;;  %v4210_v56 = vunpack.c.l.s8.bf16 %v4140_v62 }
 0x4bf   :  { %v3693_v48 = vpop.f32.mrf.mxu1  ;;  %3955 = vmatprep.subr.bf16.mxu0 %v2446_v42  ;;  %3986 = vmatprep.subr.bf16.mxu1 %v2614_v31  ;;  %v1581_v42 = vld [vmem:[#allocation7 + $0xd30] sm:$0xff]  ;;  %v5611_v31 = vld [vmem:[#allocation10 + $0x21] ss:$2 sm:$0xff]  ;;  %v2654_v22 = vunpack.c.l.s8.bf16 %v1654_v39 }
 0x4c0   :  { %v4084_v52 = vrot.slane %v5611_v31, %v5322_v1  ;;  %v2510_v48 = vunpack.c.l.s8.bf16 %v1582_v57  ;;  %v4092_v15 = vrot.slane %v5611_v31, %v5354_v38 }
 0x4c2   :  { %3956 = vmatpush1.bf16.msra.mxu0 %v2445_v13  ;;  %3987 = vmatpush1.bf16.msra.mxu1 %v2613_v11  ;;  %v2517_v13 = vunpack.c.h.s8.bf16 %v1581_v42  ;;  %v2685_v11 = vunpack.c.l.s8.bf16 %v1669_v28  ;;  %v4118_v46 = vadd.f32 %v4084_v52, %v4069_v24  ;;  %v4136_v28 = vld [vmem:[#allocation8 + $0x18] sm:$0xff] }
 0x4c3   :  { %3957 = vmatprep.subr.bf16.mxu0 %v2566_v59  ;;  %3988 = vmatprep.subr.bf16.mxu1 %v2606_v61  ;;  %v2678_v59 = vunpack.c.h.s8.bf16 %v1662_v43  ;;  %v1661_v61 = vld [vmem:[#allocation7 + $0xfb0] sm:$0xff]  ;;  %v4156_v43 = vld [vmem:[#allocation8 + $0xb8] sm:$0xff] }
 0x4c4   :  { %v4126_v29 = vmax.f32 %v4118_v46, 0.0 }
 0x4c6   :  { %3958 = vmatpush2.bf16.msra.mxu0 %v2565_v58  ;;  %3989 = vmatpush1.bf16.msra.mxu1 %v2605_v6  ;;  %v2509_v58 = vunpack.c.l.s8.bf16 %v1581_v42  ;;  %v2677_v6 = vunpack.c.h.s8.bf16 %v1661_v61  ;;  %v4135_v42 = vld [vmem:[#allocation8 + $0x10] sm:$0xff] }
 0x4c7   :  { %3959 = vmatprep.subr.bf16.mxu0 %v2558_v4  ;;  %3990 = vmatprep.subr.bf16.mxu1 %v2598_v36  ;;  %v4212_v4 = vunpack.c.h.s8.bf16 %v4140_v62  ;;  %v4139_v36 = vld [vmem:[#allocation8 + $0x30] sm:$0xff] }
 0x4ca   :  { %3960 = vmatpush2.bf16.msra.mxu0 %v2557_v9  ;;  %3991 = vmatpush1.bf16.msra.mxu1 %v2597_v21  ;;  %v2669_v9 = vunpack.c.l.s8.bf16 %v1661_v61  ;;  %v4211_v21 = vunpack.c.h.s8.bf16 %v4139_v36  ;;  %v4201_v61 = vunpack.c.l.s8.bf16 %v4135_v42 }
 0x4cb   :  { %3961 = vmatprep.subr.bf16.mxu0 %v2550_v5  ;;  %3992 = vmatprep.subr.bf16.mxu1 %v2590_v35  ;;  %v2662_v5 = vunpack.c.h.s8.bf16 %v1654_v39  ;;  %v1653_v35 = vld [vmem:[#allocation7 + $0xf70] sm:$0xff] }
 0x4ce   :  { %3962 = vmatpush2.bf16.msra.mxu0 %v2549_v25  ;;  %3993 = vmatpush1.bf16.msra.mxu1 %v2589_v18  ;;  %v4326_v18 = vpack.c.bf16 %v4126_v29, %v4126_v29 }
 0x4cf   :  { %3963 = vmatprep.subr.bf16.mxu0 %v2542_v20  ;;  %3994 = vmatprep.subr.bf16.mxu1 %v2582_v44  ;;  %v2661_v20 = vunpack.c.h.s8.bf16 %v1653_v35  ;;  %v4209_v44 = vunpack.c.l.s8.bf16 %v4139_v36 }
 0x4d2   :  { %3964 = vmatpush2.bf16.msra.mxu0 %v2541_v17  ;;  %3995 = vmatpush1.bf16.msra.mxu1 %v2581_v19  ;;  %v4208_v17 = vunpack.c.h.s8.bf16 %v4138_v26  ;;  %v4137_v19 = vld [vmem:[#allocation8 + $0x20] sm:$0xff] }
 0x4d3   :  { %3965 = vmatprep.subr.bf16.mxu0 %v2534_v7  ;;  %3996 = vmatprep.subr.bf16.mxu1 %v2574_v8  ;;  %v1646_v7 = vld [vmem:[#allocation7 + $0xf38] sm:$0xff]  ;;  %v4043_v8 = vrot.slane %v5607_v51, %v5354_v38  ;;  %v4207_v23 = vunpack.c.h.s8.bf16 %v4137_v19  ;;  %v4155_v38 = vld [vmem:[#allocation8 + $0xb0] sm:$0xff] }
 0x4d4   :  { %v4243_v62 = vunpack.c.h.s8.bf16 %v4155_v38 }
 0x4d5   :  { %v4071_v57 = vmul.f32 %v4043_v8, %v5567_v2  ;;  %v4202_v2 = vunpack.c.l.s8.bf16 %v4136_v28 }
 0x4d6   :  { %3966 = vmatpush2.bf16.msra.mxu0 %v2533_v40  ;;  %3997 = vmatpush1.bf16.msra.mxu1 %v2573_v0  ;;  %v2646_v0 = vunpack.c.h.s8.bf16 %v1646_v7 }
 0x4d7   :  { %3967 = vmatprep.subr.bf16.mxu0 %v2526_v3  ;;  %3998 = vmatprep.subr.bf16.mxu1 %v2694_v55  ;;  %v4206_v3 = vunpack.c.l.s8.bf16 %v4138_v26  ;;  %v1645_v55 = vld [vmem:[#allocation7 + $0xf30] sm:$0xff]  ;;  %v4120_v24 = vadd.f32 %v4092_v15, %v4071_v57  ;;  %v4145_v57 = vld [vmem:[#allocation8 + $0x60] sm:$0xff]  ;;  %v4150_v15 = vld [vmem:[#allocation8 + $0x88] sm:$0xff] }
 0x4d8   :  { %v2637_v52 = vunpack.c.l.s8.bf16 %v1645_v55 }
 0x4da   :  { %3968 = vmatpush2.bf16.msra.mxu0 %v2525_v30  ;;  %3999 = vmatpush2.bf16.msra.mxu1 %v2693_v34  ;;  %v2645_v30 = vunpack.c.h.s8.bf16 %v1645_v55  ;;  %v4205_v34 = vunpack.c.l.s8.bf16 %v4137_v19  ;;  %v4147_v19 = vld [vmem:[#allocation8 + $0x70] sm:$0xff] }
 0x4db   :  { %3969 = vmatprep.subr.bf16.mxu0 %v2518_v53  ;;  %4000 = vmatprep.subr.bf16.mxu1 %v2686_v37  ;;  %v2638_v53 = vunpack.c.l.s8.bf16 %v1646_v7  ;;  %v4204_v37 = vunpack.c.h.s8.bf16 %v4136_v28  ;;  %v4152_v7 = vld [vmem:[#allocation8 + $0x98] sm:$0xff]  ;;  %v4227_v8 = vunpack.c.h.s8.bf16 %v4147_v19 }
 0x4dc   :  { %v4234_v28 = vunpack.c.l.s8.bf16 %v4152_v7 }
 0x4de   :  { %3970 = vmatpush2.bf16.msra.mxu0 %v2517_v13  ;;  %4001 = vmatpush2.bf16.msra.mxu1 %v2685_v11  ;;  %v4203_v13 = vunpack.c.h.s8.bf16 %v4135_v42  ;;  %v4244_v11 = vunpack.c.h.s8.bf16 %v4156_v43  ;;  %v4149_v42 = vld [vmem:[#allocation8 + $0x80] sm:$0xff] }
 0x4df   :  { %3971 = vmatprep.subr.bf16.mxu0 %v2510_v48  ;;  %4002 = vmatprep.subr.bf16.mxu1 %v2678_v59  ;;  %v4134_v48 = vld [vmem:[#allocation8 + $0x8] sm:$0xff]  ;;  %v4128_v59 = vmax.f32 %v4120_v24, 0.0  ;;  %v4221_v24 = vunpack.c.l.s8.bf16 %v4145_v57 }
 0x4e0   :  { %v4200_v46 = vunpack.c.h.s8.bf16 %v4134_v48 }
 0x4e1   :  { %v4328_v36 = vpack.c.bf16 %v4128_v59, %v4128_v59  ;;  %v4229_v59 = vunpack.c.l.s8.bf16 %v4149_v42 }
 0x4e2   :  { %3972 = vmatpush2.bf16.msra.mxu0 %v2509_v58  ;;  %4003 = vmatpush2.bf16.msra.mxu1 %v2677_v6  ;;  %v4133_v58 = vld [vmem:[#allocation8] sm:$0xff]  ;;  %v4242_v6 = vunpack.c.l.s8.bf16 %v4156_v43  ;;  %v4144_v43 = vld [vmem:[#allocation8 + $0x58] sm:$0xff] }
 0x4e3   :  { %4004 = vmatprep.subr.bf16.mxu1 %v2670_v47  ;;  %4333 = vmatprep.subr.bf16.mxu0 %v4212_v4  ;;  %v4154_v47 = vld [vmem:[#allocation8 + $0xa8] sm:$0xff]  ;;  %v4199_v29 = vunpack.c.h.s8.bf16 %v4133_v58 }
 0x4e5   :  { %v5616_v25 = vpop.f32.mrf.mxu0  ;;  %3974 = vmatmul.mubr.bf16.vlgmr.msra.gmra.mxu0 %v5485_v54  ;;  %v2653_v54 = vunpack.c.l.s8.bf16 %v1653_v35  ;;  %v4240_v35 = vunpack.c.h.s8.bf16 %v4154_v47 }
 0x4e6   :  { %4005 = vmatpush2.bf16.msra.mxu1 %v2669_v9  ;;  %4334 = vmatpush1.bf16.msra.mxu0 %v4211_v21  ;;  %v4241_v9 = vunpack.c.l.s8.bf16 %v4155_v38  ;;  %v4164_v38 = vld [vmem:[#allocation8 + $0xf8] sm:$0xff] }
 0x4e7   :  { %4365 = vmatprep.mubr.bf16.mxu0 %v4326_v18  ;;  %v5619_v50 = vpop.f32.mrf.mxu0  ;;  %4006 = vmatprep.subr.bf16.mxu1 %v2662_v5  ;;  %v4198_v5 = vunpack.c.l.s8.bf16 %v4134_v48  ;;  %v4148_v18 = vld [vmem:[#allocation8 + $0x78] sm:$0xff] }
 0x4e8   :  { %4335 = vmatprep.subr.bf16.mxu0 %v4210_v56  ;;  %v4153_v56 = vld [vmem:[#allocation8 + $0xa0] sm:$0xff] }
 0x4e9   :  { %v3733_v41 = vpop.f32.mrf.mxu0 }
 0x4ea   :  { %4007 = vmatpush2.bf16.msra.mxu1 %v2661_v20  ;;  %4336 = vmatpush1.bf16.msra.mxu0 %v4209_v44  ;;  %v4239_v20 = vunpack.c.h.s8.bf16 %v4153_v56  ;;  %v4237_v41 = vunpack.c.l.s8.bf16 %v4153_v56  ;;  %v4162_v56 = vld [vmem:[#allocation8 + $0xe8] sm:$0xff] }
 0x4eb   :  { %v3734_v40 = vpop.f32.mrf.mxu0  ;;  %4008 = vmatprep.subr.bf16.mxu1 %v2654_v22  ;;  %4337 = vmatprep.subr.bf16.mxu0 %v4208_v17  ;;  %v4228_v22 = vunpack.c.h.s8.bf16 %v4148_v18  ;;  %v4238_v17 = vunpack.c.l.s8.bf16 %v4154_v47  ;;  %v4051_v47 = vrot.slane %v5607_v51, %v5335_v12 }
 0x4ec   :  { %v4146_v40 = vld [vmem:[#allocation8 + $0x68] sm:$0xff] }
 0x4ed   :  { %v4224_v55 = vunpack.c.h.s8.bf16 %v4146_v40 }
 0x4ee   :  { %4009 = vmatpush2.bf16.msra.mxu1 %v2653_v54  ;;  %4338 = vmatpush1.bf16.msra.mxu0 %v4207_v23  ;;  %v4236_v54 = vunpack.c.h.s8.bf16 %v4152_v7  ;;  %v4151_v23 = vld [vmem:[#allocation8 + $0x90] sm:$0xff] }
 0x4ef   :  { %4010 = vmatprep.subr.bf16.mxu1 %v2646_v0  ;;  %4339 = vmatprep.subr.bf16.mxu0 %v4206_v3  ;;  %v4225_v0 = vunpack.c.l.s8.bf16 %v4147_v19  ;;  %v4235_v3 = vunpack.c.h.s8.bf16 %v4151_v23  ;;  %v4172_v19 = vld [vmem:[#allocation8 + $0x138] sm:$0xff] }
 0x4f2   :  { %4011 = vmatpush2.bf16.msra.mxu1 %v2645_v30  ;;  %4340 = vmatpush1.bf16.msra.mxu0 %v4205_v34  ;;  %v4223_v30 = vunpack.c.h.s8.bf16 %v4145_v57  ;;  %v4233_v34 = vunpack.c.l.s8.bf16 %v4151_v23  ;;  %v4160_v23 = vld [vmem:[#allocation8 + $0xd8] sm:$0xff]  ;;  %v4159_v57 = vld [vmem:[#allocation8 + $0xd0] sm:$0xff] }
 0x4f3   :  { %4012 = vmatprep.subr.bf16.mxu1 %v2638_v53  ;;  %4341 = vmatprep.subr.bf16.mxu0 %v4204_v37  ;;  %v4222_v53 = vunpack.c.l.s8.bf16 %v4146_v40  ;;  %v4232_v37 = vunpack.c.h.s8.bf16 %v4150_v15 }
 0x4f6   :  { %4013 = vmatpush2.bf16.msra.mxu1 %v2637_v52  ;;  %4342 = vmatpush1.bf16.msra.mxu0 %v4203_v13  ;;  %v4231_v52 = vunpack.c.h.s8.bf16 %v4149_v42  ;;  %v4220_v13 = vunpack.c.h.s8.bf16 %v4144_v43  ;;  %v4251_v42 = vunpack.c.h.s8.bf16 %v4159_v57 }
 0x4f7   :  { %4343 = vmatprep.subr.bf16.mxu0 %v4202_v2  ;;  %4374 = vmatprep.subr.bf16.mxu1 %v4244_v11  ;;  %v4230_v2 = vunpack.c.l.s8.bf16 %v4150_v15  ;;  %v4143_v11 = vld [vmem:[#allocation8 + $0x50] sm:$0xff]  ;;  %v4274_v15 = vunpack.c.l.s8.bf16 %v4172_v19 }
 0x4f8   :  { %v4219_v48 = vunpack.c.h.s8.bf16 %v4143_v11 }
 0x4f9   :  { %v3770_v4 = vpop.f32.mrf.mxu1  ;;  %4015 = vmatmul.mubr.bf16.vlgmr.msra.gmra.mxu1 %v5492_v45 }
 0x4fa   :  { %v5628_v39 = vadd.f32 %v3770_v4, %v5616_v25  ;;  %4344 = vmatpush1.bf16.msra.mxu0 %v4201_v61  ;;  %4375 = vmatpush1.bf16.msra.mxu1 %v4243_v62  ;;  %v4197_v25 = vunpack.c.l.s8.bf16 %v4133_v58  ;;  %v4031_v61 = vrot.slane %v5607_v51, %v5317_v60  ;;  %v4218_v62 = vunpack.c.l.s8.bf16 %v4144_v43  ;;  %v4163_v58 = vld [vmem:[#allocation8 + $0xf0] sm:$0xff] }
 0x4fb   :  { %4406 = vmatprep.mubr.bf16.mxu1 %v4328_v36  ;;  %v3772_v21 = vpop.f32.mrf.mxu1  ;;  %4345 = vmatprep.subr.bf16.mxu0 %v4200_v46  ;;  %v4260_v46 = vunpack.c.h.s8.bf16 %v4164_v38  ;;  %v4217_v4 = vunpack.c.l.s8.bf16 %v4143_v11  ;;  %v4259_v36 = vunpack.c.h.s8.bf16 %v4163_v58  ;;  %v4169_v11 = vld [vmem:[#allocation8 + $0x120] sm:$0xff] }
 0x4fc   :  { %v5631_v26 = vadd.f32 %v3772_v21, %v5619_v50  ;;  %4376 = vmatprep.subr.bf16.mxu1 %v4242_v6  ;;  %v4226_v50 = vunpack.c.l.s8.bf16 %v4148_v18  ;;  %v4142_v6 = vld [vmem:[#allocation8 + $0x48] sm:$0xff]  ;;  %v4073_v18 = vmul.f32 %v4051_v47, %v5605_v32 }
 0x4fd   :  { %v3774_v45 = vpop.f32.mrf.mxu1  ;;  %v4216_v21 = vunpack.c.h.s8.bf16 %v4142_v6 }
 0x4fe   :  { %4346 = vmatpush1.bf16.msra.mxu0 %v4199_v29  ;;  %4377 = vmatpush1.bf16.msra.mxu1 %v4241_v9  ;;  %v4068_v29 = vmul.f32 %v4031_v61, %v5526_v16  ;;  %v4080_v9 = vrot.slane %v5611_v31, %v5317_v60  ;;  %v4100_v45 = vrot.slane %v5611_v31, %v5335_v12  ;;  %v4214_v16 = vunpack.c.l.s8.bf16 %v4142_v6 }
 0x4ff   :  { %v3775_v44 = vpop.f32.mrf.mxu1  ;;  %4347 = vmatprep.subr.bf16.mxu0 %v4198_v5  ;;  %4378 = vmatprep.subr.bf16.mxu1 %v4240_v35  ;;  %v4258_v5 = vunpack.c.l.s8.bf16 %v4164_v38  ;;  %v4141_v35 = vld [vmem:[#allocation8 + $0x40] sm:$0xff]  ;;  %v4254_v12 = vunpack.c.l.s8.bf16 %v4162_v56  ;;  %v4271_v61 = vunpack.c.h.s8.bf16 %v4169_v11 }
 0x500   :  { %v4117_v44 = vadd.f32 %v4080_v9, %v4068_v29  ;;  %v4122_v7 = vadd.f32 %v4100_v45, %v4073_v18  ;;  %v4269_v29 = vunpack.c.l.s8.bf16 %v4169_v11  ;;  %v4183_v11 = vld [vmem:[#allocation8 + $0x190] sm:$0xff] }
 0x502   :  { %4348 = vmatpush1.bf16.msra.mxu0 %v4197_v25  ;;  %4379 = vmatpush1.bf16.msra.mxu1 %v4239_v20  ;;  %v4215_v25 = vunpack.c.h.s8.bf16 %v4141_v35  ;;  %v4257_v20 = vunpack.c.l.s8.bf16 %v4163_v58  ;;  %v4125_v32 = vmax.f32 %v4117_v44, 0.0  ;;  %v4130_v40 = vmax.f32 %v4122_v7, 0.0  ;;  %v4166_v44 = vld [vmem:[#allocation8 + $0x108] sm:$0xff]  ;;  %v4165_v7 = vld [vmem:[#allocation8 + $0x100] sm:$0xff] }
 0x503   :  { %4349 = vmatprep.subr.bf16.mxu0 %v4228_v22  ;;  %4380 = vmatprep.subr.bf16.mxu1 %v4238_v17  ;;  %v4256_v22 = vunpack.c.h.s8.bf16 %v4162_v56  ;;  %v4161_v17 = vld [vmem:[#allocation8 + $0xe0] sm:$0xff] }
 0x506   :  { %4350 = vmatpush2.bf16.msra.mxu0 %v4227_v8  ;;  %4381 = vmatpush1.bf16.msra.mxu1 %v4237_v41  ;;  %v4213_v8 = vunpack.c.l.s8.bf16 %v4141_v35  ;;  %v4255_v41 = vunpack.c.h.s8.bf16 %v4161_v17  ;;  %v4188_v35 = vld [vmem:[#allocation8 + $0x1b8] sm:$0xff] }
 0x507   :  { %4351 = vmatprep.subr.bf16.mxu0 %v4226_v50  ;;  %4382 = vmatprep.subr.bf16.mxu1 %v4236_v54  ;;  %v4276_v50 = vunpack.c.h.s8.bf16 %v4172_v19  ;;  %v4171_v54 = vld [vmem:[#allocation8 + $0x130] sm:$0xff]  ;;  %v4264_v19 = vunpack.c.h.s8.bf16 %v4166_v44 }
 0x508   :  { %v4273_v43 = vunpack.c.l.s8.bf16 %v4171_v54 }
 0x50a   :  { %4352 = vmatpush2.bf16.msra.mxu0 %v4225_v0  ;;  %4383 = vmatpush1.bf16.msra.mxu1 %v4235_v3  ;;  %v4253_v0 = vunpack.c.l.s8.bf16 %v4161_v17  ;;  %v4275_v3 = vunpack.c.h.s8.bf16 %v4171_v54 }
 0x50b   :  { %4353 = vmatprep.subr.bf16.mxu0 %v4224_v55  ;;  %4384 = vmatprep.subr.bf16.mxu1 %v4234_v28  ;;  %v4325_v55 = vpack.c.bf16 %v4125_v32, %v4125_v32  ;;  %v4252_v28 = vunpack.c.h.s8.bf16 %v4160_v23 }
 0x50e   :  { %4354 = vmatpush2.bf16.msra.mxu0 %v4223_v30  ;;  %4385 = vmatpush1.bf16.msra.mxu1 %v4233_v34  ;;  %v4170_v30 = vld [vmem:[#allocation8 + $0x128] sm:$0xff] }
 0x50f   :  { %4355 = vmatprep.subr.bf16.mxu0 %v4222_v53  ;;  %4386 = vmatprep.subr.bf16.mxu1 %v4232_v37  ;;  %v4330_v53 = vpack.c.bf16 %v4130_v40, %v4130_v40  ;;  %v4270_v47 = vunpack.c.l.s8.bf16 %v4170_v30  ;;  %v4262_v40 = vunpack.c.l.s8.bf16 %v4166_v44  ;;  %v4174_v44 = vld [vmem:[#allocation8 + $0x148] sm:$0xff] }
 0x512   :  { %4356 = vmatpush2.bf16.msra.mxu0 %v4221_v24  ;;  %4387 = vmatpush1.bf16.msra.mxu1 %v4231_v52  ;;  %v4039_v24 = vrot.slane %v5607_v51, %v5351_v33 }
 0x513   :  { %4357 = vmatprep.subr.bf16.mxu0 %v4220_v13  ;;  %4388 = vmatprep.subr.bf16.mxu1 %v4230_v2  ;;  %v4250_v13 = vunpack.c.l.s8.bf16 %v4160_v23  ;;  %v4272_v2 = vunpack.c.h.s8.bf16 %v4170_v30 }
 0x516   :  { %4358 = vmatpush2.bf16.msra.mxu0 %v4219_v48  ;;  %4389 = vmatpush1.bf16.msra.mxu1 %v4229_v59  ;;  %v4158_v48 = vld [vmem:[#allocation8 + $0xc8] sm:$0xff]  ;;  %v4249_v59 = vunpack.c.l.s8.bf16 %v4159_v57 }
 0x517   :  { %4359 = vmatprep.subr.bf16.mxu0 %v4218_v62  ;;  %4390 = vmatprep.subr.bf16.mxu1 %v4260_v46  ;;  %v4070_v62 = vmul.f32 %v4039_v24, %v5564_v10  ;;  %v4088_v46 = vrot.slane %v5611_v31, %v5351_v33  ;;  %v4248_v6 = vunpack.c.h.s8.bf16 %v4158_v48  ;;  %v4167_v10 = vld [vmem:[#allocation8 + $0x110] sm:$0xff] }
 0x518   :  { %v4267_v56 = vunpack.c.h.s8.bf16 %v4167_v10 }
 0x519   :  { %v4119_v9 = vadd.f32 %v4088_v46, %v4070_v62  ;;  %v4182_v46 = vld [vmem:[#allocation8 + $0x188] sm:$0xff] }
 0x51a   :  { %4360 = vmatpush2.bf16.msra.mxu0 %v4217_v4  ;;  %4391 = vmatpush2.bf16.msra.mxu1 %v4259_v36  ;;  %v4157_v4 = vld [vmem:[#allocation8 + $0xc0] sm:$0xff] }
 0x51b   :  { %4361 = vmatprep.subr.bf16.mxu0 %v4216_v21  ;;  %4392 = vmatprep.subr.bf16.mxu1 %v4258_v5  ;;  %v4247_v36 = vunpack.c.h.s8.bf16 %v4157_v4  ;;  %v4246_v21 = vunpack.c.l.s8.bf16 %v4158_v48  ;;  %v4245_v33 = vunpack.c.l.s8.bf16 %v4157_v4  ;;  %v4127_v18 = vmax.f32 %v4119_v9, 0.0 }
 0x51c   :  { %v4296_v4 = vunpack.c.h.s8.bf16 %v4182_v46 }
 0x51d   :  { %v4327_v17 = vpack.c.bf16 %v4127_v18, %v4127_v18  ;;  %v4047_v18 = vrot.slane %v5607_v51, %v5388_v49 }
 0x51e   :  { %4362 = vmatpush2.bf16.msra.mxu0 %v4215_v25  ;;  %4393 = vmatpush2.bf16.msra.mxu1 %v4257_v20  ;;  %v4308_v25 = vunpack.c.h.s8.bf16 %v4188_v35  ;;  %v4187_v20 = vld [vmem:[#allocation8 + $0x1b0] sm:$0xff] }
 0x51f   :  { %4363 = vmatprep.subr.bf16.mxu0 %v4214_v16  ;;  %4394 = vmatprep.subr.bf16.mxu1 %v4256_v22  ;;  %v4265_v16 = vunpack.c.l.s8.bf16 %v4167_v10  ;;  %v4307_v22 = vunpack.c.h.s8.bf16 %v4187_v20  ;;  %v4305_v54 = vunpack.c.l.s8.bf16 %v4187_v20  ;;  %v4294_v10 = vunpack.c.l.s8.bf16 %v4182_v46  ;;  %v4195_v20 = vld [vmem:[#allocation8 + $0x1f0] sm:$0xff] }
 0x522   :  { %4364 = vmatpush2.bf16.msra.mxu0 %v4213_v8  ;;  %4395 = vmatpush2.bf16.msra.mxu1 %v4255_v41  ;;  %v4306_v8 = vunpack.c.l.s8.bf16 %v4188_v35  ;;  %v4186_v41 = vld [vmem:[#allocation8 + $0x1a8] sm:$0xff]  ;;  %v4196_v35 = vld [vmem:[#allocation8 + $0x1f8] sm:$0xff] }
 0x523   :  { %4396 = vmatprep.subr.bf16.mxu1 %v4254_v12  ;;  %4415 = vmatprep.subr.bf16.mxu0 %v4276_v50  ;;  %v4263_v50 = vunpack.c.h.s8.bf16 %v4165_v7 }
 0x525   :  { %v3811_v34 = vpop.f32.mrf.mxu0  ;;  %4366 = vmatmul.mubr.bf16.vlgmr.msra.gmra.mxu0 %v4325_v55 }
 0x526   :  { %v5644_v37 = vadd.f32 %v3811_v34, %v5628_v39  ;;  %4397 = vmatpush2.bf16.msra.mxu1 %v4253_v0  ;;  %4416 = vmatpush1.bf16.msra.mxu0 %v4275_v3  ;;  %v4304_v0 = vunpack.c.h.s8.bf16 %v4186_v41  ;;  %v4185_v3 = vld [vmem:[#allocation8 + $0x1a0] sm:$0xff] }
 0x527   :  { %4447 = vmatprep.mubr.bf16.mxu0 %v4330_v53  ;;  %v3813_v52 = vpop.f32.mrf.mxu0  ;;  %4398 = vmatprep.subr.bf16.mxu1 %v4252_v28  ;;  %v4180_v28 = vld [vmem:[#allocation8 + $0x178] sm:$0xff]  ;;  %v4303_v30 = vunpack.c.h.s8.bf16 %v4185_v3 }
 0x528   :  { %v5649_v38 = vadd.f32 %v3813_v52, %v5631_v26  ;;  %4417 = vmatprep.subr.bf16.mxu0 %v4274_v15  ;;  %v4168_v26 = vld [vmem:[#allocation8 + $0x118] sm:$0xff]  ;;  %v4261_v15 = vunpack.c.l.s8.bf16 %v4165_v7  ;;  %v4292_v53 = vunpack.c.h.s8.bf16 %v4180_v28  ;;  %v4301_v52 = vunpack.c.l.s8.bf16 %v4185_v3  ;;  %v4193_v3 = vld [vmem:[#allocation8 + $0x1e0] sm:$0xff] }
 0x529   :  { %v3815_v39 = vpop.f32.mrf.mxu0  ;;  %v4268_v5 = vunpack.c.h.s8.bf16 %v4168_v26  ;;  %v4266_v45 = vunpack.c.l.s8.bf16 %v4168_v26  ;;  %v4181_v26 = vld [vmem:[#allocation8 + $0x180] sm:$0xff]  ;;  %v4280_v7 = vunpack.c.h.s8.bf16 %v4174_v44 }
 0x52a   :  { %4399 = vmatpush2.bf16.msra.mxu1 %v4251_v42  ;;  %4418 = vmatpush1.bf16.msra.mxu0 %v4273_v43  ;;  %v4302_v42 = vunpack.c.l.s8.bf16 %v4186_v41  ;;  %v4184_v43 = vld [vmem:[#allocation8 + $0x198] sm:$0xff]  ;;  %v4299_v39 = vunpack.c.h.s8.bf16 %v4183_v11  ;;  %v4295_v9 = vunpack.c.h.s8.bf16 %v4181_v26  ;;  %v4322_v41 = vunpack.c.l.s8.bf16 %v4196_v35 }
 0x52b   :  { %v3816_v58 = vpop.f32.mrf.mxu0  ;;  %4400 = vmatprep.subr.bf16.mxu1 %v4250_v13  ;;  %4419 = vmatprep.subr.bf16.mxu0 %v4272_v2  ;;  %v4290_v13 = vunpack.c.l.s8.bf16 %v4180_v28  ;;  %v4300_v2 = vunpack.c.h.s8.bf16 %v4184_v43  ;;  %v4298_v62 = vunpack.c.l.s8.bf16 %v4184_v43 }
 0x52e   :  { %4401 = vmatpush2.bf16.msra.mxu1 %v4249_v59  ;;  %4420 = vmatpush1.bf16.msra.mxu0 %v4271_v61  ;;  %v4177_v61 = vld [vmem:[#allocation8 + $0x160] sm:$0xff] }
 0x52f   :  { %4402 = vmatprep.subr.bf16.mxu1 %v4248_v6  ;;  %4421 = vmatprep.subr.bf16.mxu0 %v4270_v47  ;;  %v4287_v58 = vunpack.c.h.s8.bf16 %v4177_v61  ;;  %v4297_v6 = vunpack.c.l.s8.bf16 %v4183_v11  ;;  %v4190_v11 = vld [vmem:[#allocation8 + $0x1c8] sm:$0xff] }
 0x532   :  { %4403 = vmatpush2.bf16.msra.mxu1 %v4247_v36  ;;  %4422 = vmatpush1.bf16.msra.mxu0 %v4269_v29  ;;  %v4176_v36 = vld [vmem:[#allocation8 + $0x158] sm:$0xff]  ;;  %v4285_v29 = vunpack.c.l.s8.bf16 %v4177_v61  ;;  %v4189_v61 = vld [vmem:[#allocation8 + $0x1c0] sm:$0xff] }
 0x533   :  { %4404 = vmatprep.subr.bf16.mxu1 %v4246_v21  ;;  %4423 = vmatprep.subr.bf16.mxu0 %v4268_v5  ;;  %v4284_v21 = vunpack.c.h.s8.bf16 %v4176_v36  ;;  %v4175_v5 = vld [vmem:[#allocation8 + $0x150] sm:$0xff]  ;;  %v4309_v46 = vunpack.c.l.s8.bf16 %v4189_v61 }
 0x536   :  { %4405 = vmatpush2.bf16.msra.mxu1 %v4245_v33  ;;  %4424 = vmatpush1.bf16.msra.mxu0 %v4267_v56  ;;  %v4283_v33 = vunpack.c.h.s8.bf16 %v4175_v5  ;;  %v4293_v56 = vunpack.c.l.s8.bf16 %v4181_v26 }
 0x537   :  { %4425 = vmatprep.subr.bf16.mxu0 %v4266_v45  ;;  %4456 = vmatprep.subr.bf16.mxu1 %v4308_v25  ;;  %v4282_v45 = vunpack.c.l.s8.bf16 %v4176_v36  ;;  %v4324_v25 = vunpack.c.h.s8.bf16 %v4196_v35 }
 0x539   :  { %v3852_v32 = vpop.f32.mrf.mxu1  ;;  %4407 = vmatmul.mubr.bf16.vlgmr.msra.gmra.mxu1 %v4327_v17  ;;  %v4072_v17 = vmul.f32 %v4047_v18, %v5602_v63  ;;  %v4557_v18 = vld [vmem:[%s5793_s4 + $0x38] sm:$0x3] }
 0x53a   :  { %v5655_v12 = vadd.f32 %v3852_v32, %v5644_v37  ;;  %4426 = vmatpush1.bf16.msra.mxu0 %v4265_v16  ;;  %4457 = vmatpush1.bf16.msra.mxu1 %v4307_v22  ;;  %v4179_v37 = vld [vmem:[#allocation8 + $0x170] sm:$0xff]  ;;  %v4281_v16 = vunpack.c.l.s8.bf16 %v4175_v5  ;;  %v4323_v22 = vunpack.c.h.s8.bf16 %v4195_v20  ;;  %v4194_v32 = vld [vmem:[#allocation8 + $0x1e8] sm:$0xff] }
 0x53b   :  { %v3854_v23 = vpop.f32.mrf.mxu1  ;;  %4427 = vmatprep.subr.bf16.mxu0 %v4264_v19  ;;  %4458 = vmatprep.subr.bf16.mxu1 %v4306_v8  ;;  %v4291_v24 = vunpack.c.h.s8.bf16 %v4179_v37  ;;  %v4289_v48 = vunpack.c.l.s8.bf16 %v4179_v37  ;;  %v4096_v19 = vrot.slane %v5611_v31, %v5388_v49  ;;  %v4173_v8 = vld [vmem:[#allocation8 + $0x140] sm:$0xff]  ;;  %v4319_v49 = vunpack.c.h.s8.bf16 %v4193_v3  ;;  %v4191_v37 = vld [vmem:[#allocation8 + $0x1d0] sm:$0xff] }
 0x53c   :  { %v5658_v55 = vadd.f32 %v3854_v23, %v5649_v38  ;;  %v4178_v38 = vld [vmem:[#allocation8 + $0x168] sm:$0xff]  ;;  %v4277_v63 = vunpack.c.l.s8.bf16 %v4173_v8  ;;  %v4543_v5 = vld [vmem:[%s5793_s4 + $0x1c] sm:$0x3] }
 0x53d   :  { %v3856_v57 = vpop.f32.mrf.mxu1  ;;  %v4288_v59 = vunpack.c.h.s8.bf16 %v4178_v38  ;;  %v4286_v47 = vunpack.c.l.s8.bf16 %v4178_v38  ;;  %v4121_v23 = vadd.f32 %v4096_v19, %v4072_v17  ;;  %v4555_v17 = vld [vmem:[%s5793_s4 + $0x34] sm:$0x3] }
 0x53e   :  { %4428 = vmatpush1.bf16.msra.mxu0 %v4263_v50  ;;  %4459 = vmatpush1.bf16.msra.mxu1 %v4305_v54  ;;  %v4279_v50 = vunpack.c.h.s8.bf16 %v4173_v8  ;;  %v4321_v54 = vunpack.c.l.s8.bf16 %v4195_v20  ;;  %v4318_v57 = vunpack.c.l.s8.bf16 %v4194_v32  ;;  %v4589_v20 = vunpack.c.l.s8.bf16 %v4557_v18 }
 0x53f   :  { %v3857_v34 = vpop.f32.mrf.mxu1  ;;  %4429 = vmatprep.subr.bf16.mxu0 %v4262_v40  ;;  %4460 = vmatprep.subr.bf16.mxu1 %v4304_v0  ;;  %v4278_v40 = vunpack.c.l.s8.bf16 %v4174_v44  ;;  %v4320_v0 = vunpack.c.h.s8.bf16 %v4194_v32  ;;  %v4129_v28 = vmax.f32 %v4121_v23, 0.0  ;;  %v4587_v32 = vunpack.c.l.s8.bf16 %v4555_v17 }
 0x541   :  { %v4329_v34 = vpack.c.bf16 %v4129_v28, %v4129_v28 }
 0x542   :  { %4430 = vmatpush1.bf16.msra.mxu0 %v4261_v15  ;;  %4461 = vmatpush1.bf16.msra.mxu1 %v4303_v30  ;;  %v4192_v15 = vld [vmem:[#allocation8 + $0x1d8] sm:$0xff]  ;;  %v4317_v30 = vunpack.c.l.s8.bf16 %v4193_v3  ;;  %v4553_v3 = vld [vmem:[%s5793_s4 + $0x30] sm:$0x3] }
 0x543   :  { %4431 = vmatprep.subr.bf16.mxu0 %v4292_v53  ;;  %4462 = vmatprep.subr.bf16.mxu1 %v4302_v42  ;;  %v4316_v53 = vunpack.c.h.s8.bf16 %v4192_v15 }
 0x546   :  { %4432 = vmatpush2.bf16.msra.mxu0 %v4291_v24  ;;  %4463 = vmatpush1.bf16.msra.mxu1 %v4301_v52  ;;  %v4315_v24 = vunpack.c.h.s8.bf16 %v4191_v37 }
 0x547   :  { %4433 = vmatprep.subr.bf16.mxu0 %v4290_v13  ;;  %4464 = vmatprep.subr.bf16.mxu1 %v4300_v2  ;;  %v4314_v13 = vunpack.c.l.s8.bf16 %v4192_v15 }
 0x54a   :  { %4434 = vmatpush2.bf16.msra.mxu0 %v4289_v48  ;;  %4465 = vmatpush1.bf16.msra.mxu1 %v4299_v39  ;;  %v4313_v48 = vunpack.c.l.s8.bf16 %v4191_v37  ;;  %v4538_v37 = vld [vmem:[%s5793_s4 + $0x12] sm:$0x3] }
 0x54b   :  { %4435 = vmatprep.subr.bf16.mxu0 %v4288_v59  ;;  %4466 = vmatprep.subr.bf16.mxu1 %v4298_v62  ;;  %v4312_v59 = vunpack.c.h.s8.bf16 %v4190_v11  ;;  %v4311_v62 = vunpack.c.h.s8.bf16 %v4189_v61  ;;  %v4535_v61 = vld [vmem:[%s5793_s4 + $0xc] sm:$0x3] }
 0x54e   :  { %4436 = vmatpush2.bf16.msra.mxu0 %v4287_v58  ;;  %4467 = vmatpush1.bf16.msra.mxu1 %v4297_v6 }
 0x54f   :  { %4437 = vmatprep.subr.bf16.mxu0 %v4286_v47  ;;  %4468 = vmatprep.subr.bf16.mxu1 %v4296_v4 }
 0x552   :  { %4438 = vmatpush2.bf16.msra.mxu0 %v4285_v29  ;;  %4469 = vmatpush1.bf16.msra.mxu1 %v4295_v9  ;;  %v4559_v9 = vld [vmem:[%s5793_s4 + $0x3c] sm:$0x3] }
 0x553   :  { %4439 = vmatprep.subr.bf16.mxu0 %v4284_v21  ;;  %4470 = vmatprep.subr.bf16.mxu1 %v4294_v10  ;;  %v4560_v21 = vld [vmem:[%s5793_s4 + $0x3e] sm:$0x3]  ;;  %v4591_v10 = vunpack.c.l.s8.bf16 %v4559_v9 }
 0x554   :  { %v4592_v35 = vunpack.c.l.s8.bf16 %v4560_v21 }
 0x556   :  { %4440 = vmatpush2.bf16.msra.mxu0 %v4283_v33  ;;  %4471 = vmatpush1.bf16.msra.mxu1 %v4293_v56  ;;  %v4544_v33 = vld [vmem:[%s5793_s4 + $0x1e] sm:$0x3]  ;;  %v4575_v56 = vunpack.c.l.s8.bf16 %v4543_v5  ;;  %v4892_v19 = vcombine.low %v4591_v10, %v4592_v35  ;;  %v4934_v5 = vld [vmem:[#allocation10 + $0x20] ss:$2 sm:$0xff] }
 0x557   :  { %4441 = vmatprep.subr.bf16.mxu0 %v4282_v45  ;;  %4472 = vmatprep.subr.bf16.mxu1 %v4324_v25  ;;  %v4558_v45 = vld [vmem:[%s5793_s4 + $0x3a] sm:$0x3]  ;;  %v4576_v25 = vunpack.c.l.s8.bf16 %v4544_v33  ;;  %v4059_v10 = vrot.slane %v4934_v5, %v5379_v27 }
 0x558   :  { %v4590_v44 = vunpack.c.l.s8.bf16 %v4558_v45 }
 0x559   :  { %v4884_v23 = vcombine.low %v4575_v56, %v4576_v25 }
 0x55a   :  { %4442 = vmatpush2.bf16.msra.mxu0 %v4281_v16  ;;  %4473 = vmatpush2.bf16.msra.mxu1 %v4323_v22  ;;  %v4541_v16 = vld [vmem:[%s5793_s4 + $0x18] sm:$0x3]  ;;  %v4542_v22 = vld [vmem:[%s5793_s4 + $0x1a] sm:$0x3] }
 0x55b   :  { %4443 = vmatprep.subr.bf16.mxu0 %v4280_v7  ;;  %4474 = vmatprep.subr.bf16.mxu1 %v4322_v41  ;;  %v4573_v7 = vunpack.c.l.s8.bf16 %v4541_v16  ;;  %v4574_v8 = vunpack.c.l.s8.bf16 %v4542_v22  ;;  %v4556_v41 = vld [vmem:[%s5793_s4 + $0x36] sm:$0x3] }
 0x55e   :  { %4444 = vmatpush2.bf16.msra.mxu0 %v4279_v50  ;;  %4475 = vmatpush2.bf16.msra.mxu1 %v4321_v54  ;;  %v4539_v50 = vld [vmem:[%s5793_s4 + $0x14] sm:$0x3]  ;;  %v4540_v54 = vld [vmem:[%s5793_s4 + $0x16] sm:$0x3] }
 0x55f   :  { %4445 = vmatprep.subr.bf16.mxu0 %v4278_v40  ;;  %4476 = vmatprep.subr.bf16.mxu1 %v4320_v0  ;;  %v4891_v40 = vcombine.low %v4589_v20, %v4590_v44  ;;  %v4588_v0 = vunpack.c.l.s8.bf16 %v4556_v41  ;;  %v4571_v28 = vunpack.c.l.s8.bf16 %v4539_v50 }
 0x561   :  { %v4890_v15 = vcombine.low %v4587_v32, %v4588_v0 }
 0x562   :  { %4446 = vmatpush2.bf16.msra.mxu0 %v4277_v63  ;;  %4477 = vmatpush2.bf16.msra.mxu1 %v4319_v49  ;;  %v4554_v63 = vld [vmem:[%s5793_s4 + $0x32] sm:$0x3]  ;;  %v4883_v49 = vcombine.low %v4573_v7, %v4574_v8 }
 0x563   :  { %4478 = vmatprep.subr.bf16.mxu1 %v4318_v57  ;;  %4895 = vmatprep.subr.bf16.mxu0 %v4892_v19  ;;  %v4572_v57 = vunpack.c.l.s8.bf16 %v4540_v54  ;;  %v4549_v54 = vld [vmem:[%s5793_s4 + $0x28] sm:$0x3] }
 0x565   :  { %v3893_v42 = vpop.f32.mrf.mxu0  ;;  %4448 = vmatmul.mubr.bf16.vlgmr.msra.gmra.mxu0 %v4329_v34  ;;  %v4586_v34 = vunpack.c.l.s8.bf16 %v4554_v63  ;;  %v4534_v63 = vld [vmem:[%s5793_s4 + $0xa] sm:$0x3] }
 0x566   :  { %v5666_v43 = vadd.f32 %v3893_v42, %v5655_v12  ;;  %4479 = vmatpush2.bf16.msra.mxu1 %v4317_v30  ;;  %v4310_v12 = vunpack.c.l.s8.bf16 %v4190_v11  ;;  %4896 = vmatpush3.bf16.msra.mxu0 %v4884_v23  ;;  %v4585_v30 = vunpack.c.l.s8.bf16 %v4553_v3  ;;  %v4551_v42 = vld [vmem:[%s5793_s4 + $0x2c] sm:$0x3]  ;;  %v4570_v11 = vunpack.c.l.s8.bf16 %v4538_v37  ;;  %v4550_v23 = vld [vmem:[%s5793_s4 + $0x2a] sm:$0x3]  ;;  %v4533_v3 = vld [vmem:[%s5793_s4 + $0x8] sm:$0x3] }
 0x567   :  { %v3895_v52 = vpop.f32.mrf.mxu0  ;;  %4480 = vmatprep.subr.bf16.mxu1 %v4316_v53  ;;  %4897 = vmatprep.subr.bf16.mxu0 %v4891_v40  ;;  %v4537_v53 = vld [vmem:[%s5793_s4 + $0x10] sm:$0x3]  ;;  %v4581_v40 = vunpack.c.l.s8.bf16 %v4549_v54  ;;  %v4582_v0 = vunpack.c.l.s8.bf16 %v4550_v23 }
 0x568   :  { %v5669_v2 = vadd.f32 %v3895_v52, %v5658_v55  ;;  %v4882_v52 = vcombine.low %v4571_v28, %v4572_v57  ;;  %v4566_v28 = vunpack.c.l.s8.bf16 %v4534_v63 }
 0x569   :  { %v3897_v38 = vpop.f32.mrf.mxu0  ;;  %v4887_v57 = vcombine.low %v4581_v40, %v4582_v0 }
 0x56a   :  { %4481 = vmatpush2.bf16.msra.mxu1 %v4315_v24  ;;  %v4552_v24 = vld [vmem:[%s5793_s4 + $0x2e] sm:$0x3]  ;;  %4898 = vmatpush3.bf16.msra.mxu0 %v4883_v49  ;;  %v4565_v49 = vunpack.c.l.s8.bf16 %v4533_v3 }
 0x56b   :  { %v3898_v39 = vpop.f32.mrf.mxu0  ;;  %4482 = vmatprep.subr.bf16.mxu1 %v4314_v13  ;;  %v4569_v13 = vunpack.c.l.s8.bf16 %v4537_v53  ;;  %4899 = vmatprep.subr.bf16.mxu0 %v4890_v15 }
 0x56c   :  { %v4583_v39 = vunpack.c.l.s8.bf16 %v4551_v42  ;;  %v4879_v15 = vcombine.low %v4565_v49, %v4566_v28  ;;  %v4531_v42 = vld [vmem:[%s5793_s4 + $0x4] sm:$0x3] }
 0x56e   :  { %4483 = vmatpush2.bf16.msra.mxu1 %v4313_v48  ;;  %v4889_v48 = vcombine.low %v4585_v30, %v4586_v34  ;;  %4900 = vmatpush3.bf16.msra.mxu0 %v4882_v52  ;;  %v4547_v30 = vld [vmem:[%s5793_s4 + $0x24] sm:$0x3]  ;;  %v4548_v34 = vld [vmem:[%s5793_s4 + $0x26] sm:$0x3]  ;;  %v4563_v52 = vunpack.c.l.s8.bf16 %v4531_v42 }
 0x56f   :  { %4484 = vmatprep.subr.bf16.mxu1 %v4312_v59  ;;  %v4584_v59 = vunpack.c.l.s8.bf16 %v4552_v24  ;;  %v4579_v53 = vunpack.c.l.s8.bf16 %v4547_v30  ;;  %v4580_v37 = vunpack.c.l.s8.bf16 %v4548_v34  ;;  %v4532_v24 = vld [vmem:[%s5793_s4 + $0x6] sm:$0x3] }
 0x570   :  { %4901 = vmatprep.subr.bf16.mxu0 %v4889_v48  ;;  %v4545_v48 = vld [vmem:[%s5793_s4 + $0x20] sm:$0x3] }
 0x572   :  { %4485 = vmatpush2.bf16.msra.mxu1 %v4311_v62  ;;  %v4536_v62 = vld [vmem:[%s5793_s4 + $0xe] sm:$0x3] }
 0x573   :  { %4486 = vmatprep.subr.bf16.mxu1 %v4310_v12 }
 0x576   :  { %4487 = vmatpush2.bf16.msra.mxu1 %v4309_v46 }
 0x579   :  { %v3934_v58 = vpop.f32.mrf.mxu1 }
 0x57a   :  { %v3935_v38 = vadd.f32 %v3934_v58, %v5666_v43  ;;  %v4104_v43 = vrot.slane %v5611_v31, %v5430_v14  ;;  %v4881_v58 = vcombine.low %v4569_v13, %v4570_v11  ;;  %v4564_v13 = vunpack.c.l.s8.bf16 %v4532_v24 }
 0x57b   :  { %v3936_v6 = vpop.f32.mrf.mxu1  ;;  %v4886_v11 = vcombine.low %v4579_v53, %v4580_v37 }
 0x57c   :  { %v3937_v12 = vadd.f32 %v3936_v6, %v5669_v2  ;;  %v4888_v2 = vcombine.low %v4583_v39, %v4584_v59  ;;  %4902 = vmatpush3.bf16.msra.mxu0 %v4881_v58  ;;  %v4546_v39 = vld [vmem:[%s5793_s4 + $0x22] sm:$0x3]  ;;  %v4577_v59 = vunpack.c.l.s8.bf16 %v4545_v48 }
 0x57d   :  { %v3938_v55 = vpop.f32.mrf.mxu1 }
 0x57e   :  { %v4055_v55 = vrot.slane %v5607_v51, %v5430_v14  ;;  %v4108_v51 = vrot.slane %v5611_v31, %v5379_v27  ;;  %4903 = vmatprep.subr.bf16.mxu0 %v4888_v2  ;;  %v4500_v2 = vld [vmem:[#allocation10 + $0x31] ss:$2 sm:$0x3] }
 0x57f   :  { %v3939_v47 = vpop.f32.mrf.mxu1 }
 0x5a5   :  { %v3975_v4 = vpop.f32.mrf.mxu0 }
 0x5a6   :  { %v3976_v46 = vadd.f32 %v3975_v4, %v3935_v38  ;;  %v4878_v38 = vcombine.low %v4563_v52, %v4564_v13 }
 0x5a7   :  { %v5671_v26 = vpop.f32.mrf.mxu0 }
 0x5a8   :  { %v3978_v9 = vadd.f32 %v5671_v26, %v3937_v12  ;;  %v4530_v12 = vld [vmem:[%s5793_s4 + $0x2] sm:$0x3] }
 0x5a9   :  { %v3979_v36 = vpop.f32.mrf.mxu0 }
 0x5aa   :  { %v4567_v36 = vunpack.c.l.s8.bf16 %v4535_v61  ;;  %v4578_v61 = vunpack.c.l.s8.bf16 %v4546_v39 }
 0x5ab   :  { %v3980_v29 = vpop.f32.mrf.mxu0 }
 0x5ac   :  { %v4568_v29 = vunpack.c.l.s8.bf16 %v4536_v62  ;;  %v4529_v62 = vld [vmem:[%s5793_s4] sm:$0x3]  ;;  %s5075_s4 = smov [#allocation11]  }
 0x5ad   :  { %s4770_s29 = sshll.u32 %s5075_s4, 4  ;;  %s4771_s29 = int_to_ptr.vmem [resolvable:$true] %s4770_s29 }
 0x5ae   :  { %v4880_v14 = vcombine.low %v4567_v36, %v4568_v29  ;;  %s5035_s30 = scalar_lea.vmem %s4771_s29, 128  ;;  %p5040_p12 = scmp.lt.s32.totalorder %s4771_s29, %s4771_s29 }
 0x5af   :  { %p5036_p11 = scmp.ne.s32.totalorder %s4771_s29, %s5035_s30  ;;  %p5041_p13 = scmp.lt.s32.totalorder %s5035_s30, %s5035_s30 }
 0x5b0   :  { %4904 = vmatpush3.bf16.msra.mxu0 %v4880_v14 }
 0x5b1   :  { %4905 = vmatprep.subr.bf16.mxu0 %v4887_v57  ;;  %p5042_p0 = por %p5041_p13, %p5040_p12 }
 0x5b3   :  { %p5043_p1 = pnand %p5042_p0, %p5036_p11 }
 0x5b4   :  { %4906 = vmatpush3.bf16.msra.mxu0 %v4879_v15 }
 0x5b5   :  { %4907 = vmatprep.subr.bf16.mxu0 %v4886_v11 }
 0x5b8   :  { %4908 = vmatpush3.bf16.msra.mxu0 %v4878_v38 }
 0x5b9   :  { %v4016_v47 = vpop.f32.mrf.mxu1 }
 0x5ba   :  { %v4017_v21 = vadd.f32 %v4016_v47, %v3976_v46  ;;  %v4561_v46 = vunpack.c.l.s8.bf16 %v4529_v62  ;;  %v4885_v47 = vcombine.low %v4577_v59, %v4578_v61 }
 0x5bb   :  { %v4018_v6 = vpop.f32.mrf.mxu1 }
 0x5bc   :  { %v4074_v4 = vmul.f32 %v4055_v55, %v4017_v21  ;;  %v4019_v35 = vadd.f32 %v4018_v6, %v3978_v9  ;;  %v4562_v55 = vunpack.c.l.s8.bf16 %v4530_v12  ;;  %4909 = vmatprep.subr.bf16.mxu0 %v4885_v47 }
 0x5bd   :  { %v4020_v33 = vpop.f32.mrf.mxu1 }
 0x5be   :  { %v4123_v56 = vadd.f32 %v4104_v43, %v4074_v4  ;;  %v4075_v18 = vmul.f32 %v4059_v10, %v4019_v35  ;;  %v4877_v43 = vcombine.low %v4561_v46, %v4562_v55  ;;  %v4498_v10 = vld [vmem:[#allocation10 + $0x30] ss:$2 sm:$0x3] }
 0x5bf   :  { %v4021_v45 = vpop.f32.mrf.mxu1  ;;  %v4505_v6 = vrot.slane %v4498_v10, %v5317_v60  ;;  %v4509_v33 = vrot.slane %v4498_v10, %v5322_v1 }
 0x5c0   :  { %v4124_v26 = vadd.f32 %v4108_v51, %v4075_v18  ;;  %v4131_v25 = vmax.f32 %v4123_v56, 0.0  ;;  %4910 = vmatpush3.bf16.msra.mxu0 %v4877_v43  ;;  %v4518_v51 = vrot.slane %v4500_v2, %v5317_v60  ;;  %v4522_v45 = vrot.slane %v4500_v2, %v5322_v1 }
 0x5c2   :  { %v4132_v20 = vmax.f32 %v4124_v26, 0.0  ;;  %v4331_v16 = vpack.c.bf16 %v4131_v25, %v4131_v25 }
 0x5c4   :  { %v4332_v44 = vpack.c.bf16 %v4132_v20, %v4132_v20 }
 0x5c6   :  { %4488 = vmatprep.mubr.bf16.mxu1 %v4332_v44 }
 0x5c7   :  { %4489 = vmatmul.mubr.bf16.vlgmr.msra.gmra.mxu1 %v4331_v16 }
 0x5e5   :  { %v4367_v22 = vpop.f32.mrf.mxu0 }
 0x5e7   :  { %v4369_v17 = vpop.f32.mrf.mxu0 }
 0x5e9   :  { %v4371_v19 = vpop.f32.mrf.mxu0 }
 0x5eb   :  { %v4372_v7 = vpop.f32.mrf.mxu0 }
 0x5f9   :  { %v4408_v27 = vpop.f32.mrf.mxu1 }
 0x5fa   :  { %v4409_v31 = vadd.f32 %v4408_v27, %v4367_v22 }
 0x5fb   :  { %v4410_v8 = vpop.f32.mrf.mxu1 }
 0x5fc   :  { %v4411_v41 = vadd.f32 %v4410_v8, %v4369_v17 }
 0x5fd   :  { %v4412_v32 = vpop.f32.mrf.mxu1 }
 0x5ff   :  { %v4413_v50 = vpop.f32.mrf.mxu1 }
 0x625   :  { %v4449_v58 = vpop.f32.mrf.mxu0 }
 0x626   :  { %v4450_v36 = vadd.f32 %v4449_v58, %v4409_v31  ;;  %v4893_v31 = vld [vmem:[#allocation10 + $0x34] ss:$0 sm:$0xff] }
 0x627   :  { %v4451_v29 = vpop.f32.mrf.mxu0 }
 0x628   :  { %v4452_v9 = vadd.f32 %v4451_v29, %v4411_v41  ;;  %v4894_v41 = vld [vmem:[#allocation10 + $0x35] ss:$0 sm:$0xff] }
 0x629   :  { %v4453_v21 = vpop.f32.mrf.mxu0 }
 0x62b   :  { %v4454_v5 = vpop.f32.mrf.mxu0 }
 0x687   :  { %v4490_v4 = vpop.f32.mrf.mxu1 }
 0x688   :  { %v4491_v35 = vadd.f32 %v4490_v4, %v4450_v36 }
 0x689   :  { %v4492_v14 = vpop.f32.mrf.mxu1 }
 0x68a   :  { %v4512_v56 = vmul.f32 %v4505_v6, %v4491_v35  ;;  %v4493_v18 = vadd.f32 %v4492_v14, %v4452_v9 }
 0x68b   :  { %v4494_v26 = vpop.f32.mrf.mxu1 }
 0x68c   :  { %v4525_v25 = vadd.f32 %v4518_v51, %v4512_v56  ;;  %v4513_v20 = vmul.f32 %v4509_v33, %v4493_v18 }
 0x68d   :  { %v4495_v44 = vpop.f32.mrf.mxu1 }
 0x68e   :  { %v4526_v16 = vadd.f32 %v4522_v45, %v4513_v20  ;;  %v4527_v22 = vmax.f32 %v4525_v25, 0.0 }
 0x690   :  { %v4528_v17 = vmax.f32 %v4526_v16, 0.0  ;;  %v4593_v7 = vpack.c.bf16 %v4527_v22, %v4527_v22 }
 0x692   :  { %v4594_v19 = vpack.c.bf16 %v4528_v17, %v4528_v17 }
 0x694   :  { %4723 = vmatprep.mubr.bf16.mxu0 %v4594_v19 }
 0x695   :  { %4724 = vmatmul.mubr.bf16.vlgmr.msra.gmra.mxu0 %v4593_v7 }
 0x755   :  { %v4911_v27 = vpop.f32.mrf.mxu0 }
 0x757   :  { %v4912_v60 = vpop.f32.mrf.mxu0 }
 0x758   :  { %v4913_v8 = vadd.f32 %v4912_v60, %v4911_v27 }
 0x759   :  { %v4914_v32 = vpop.f32.mrf.mxu0 }
 0x75a   :  { %v4737_v50 = vmul.f32 %v4913_v8, %v4893_v31 }
 0x75b   :  { %v4915_v54 = vpop.f32.mrf.mxu0 }
 0x75c   :  { %v4742_v1 = vadd.f32 %v4894_v41, %v4737_v50 }
 0x75e   :  { %v4744_v23 = vsel %vm4743_vm2, %v4742_v1, -inf }
 0x75f   :  { %v4745_v40 = vrot.slane %v4744_v23, 4 }
 0x761   :  { %v4746_v0 = vmax.f32 %v4744_v23, %v4745_v40 }
 0x763   :  { %v4747_v3 = vrot.slane %v4746_v0, 2 }
 0x765   :  { %v4748_v63 = vmax.f32 %v4746_v0, %v4747_v3 }
 0x767   :  { %v4749_v49 = vrot.slane %v4748_v63, 1 }
 0x769   :  { %v4750_v28 = vmax.f32 %v4748_v63, %v4749_v49 }
 0x76b   :  { %v4751_v57 = vsub.f32 %v4742_v1, %v4750_v28 }
 0x76d   :  { %v4752_v15 = vmul.f32 1.442695, %v4751_v57 }
 0x76f   :  { %4930 = vpow2.f32 %v4752_v15 }
 0x77c   :  { %v4931_v30 = vpop.eup %4930 }
 0x77d   :  { %v4754_v34 = vsel %vm4743_vm2, %v4931_v30, 0.0 }
 0x77e   :  { %v4755_v53 = vrot.slane %v4754_v34, 4 }
 0x780   :  { %v4756_v37 = vadd.f32 %v4755_v53, %v4754_v34 }
 0x782   :  { %v4757_v42 = vrot.slane %v4756_v37, 2 }
 0x784   :  { %v4758_v24 = vadd.f32 %v4757_v42, %v4756_v37 }
 0x786   :  { %v4759_v52 = vrot.slane %v4758_v24, 1 }
 0x788   :  { %v4760_v13 = vadd.f32 %v4759_v52, %v4758_v24 }
 0x78a   :  { %4932 = vrcp.f32 %v4760_v13 }
 0x797   :  { %v4933_v11 = vpop.eup %4932 }
 0x798   :  { %v4762_v38 = vmul.f32 %v4933_v11, %v4931_v30 }
 0x79a   :  { %4763 = vst.msk [vmem:[#allocation11] sm:$0xff] %vm4743_vm2, %v4762_v38 }
 0x79b   :  { %5046 = shalt.err (!%p5043_p1)
}
 0x79c   :  { %4773 = dma.vmem_to_hbm [thread:$0]  %s4771_s29, 128, %s5795_s6, [#allocation4]  }
 0x79d   :  { %5061 = dma.done.wait [#allocation4], 128  }
 0x79e   :  { %5062 = vsyncadd [#allocation4], 4294967168 }
 0x79f   :  { %4777 = vsyncpa [#allocation3], 1 }
 0x7a0   :  { %4778 = vsyncpa [#allocation6], 1 }
 0x7a1   :  { %4779 = vsyncpa [#allocation9], 1 }
 0x7a2   :  { %4780 = vsyncpa [#allocation4], 1 }

</bundles_post_ra>
